<compile_context>
chip_gen: v7x
topology: tpu7x:2x2x1
jax: 0.10.0
libtpu: 0.0.40
codegen_flags: <defaults>
</compile_context>

<pallas_src>
import functools

import jax
import jax.numpy as jnp
import numpy as np
from jax.experimental import pallas as pl
from jax.experimental.pallas import tpu as pltpu

NEG_SLOPE = 0.2
KH = KW = 3  # 3x3 convs, padding=1


def _leaky(v):
    return jnp.where(v > 0, v, NEG_SLOPE * v)


def res_kernel(x_ref, mask_ref, w1_ref, b1_ref, w2_ref, b2_ref, o_ref, y1_ref,
               *, wp, l, lext, m):
    # x_ref   : (1, C, l + 4m)  zero-padded image flattened row-major with row
    #                           stride wp, plus a 2m zero margin on each side
    # mask_ref: (1, lext)       1.0 at interior pixels of conv1's domain, else 0
    # w*_ref  : (9, C, C)       per-tap (C_out, C_in) weights, tap = dy*3 + dx
    # b*_ref  : (C, 1)
    # o_ref   : (1, C, l)       result on the padded flat domain (border columns
    #                           are don't-care; the wrapper slices the interior)
    # y1_ref  : VMEM scratch (C, lext) for the masked conv1 intermediate
    C = w1_ref.shape[1]
    shifts = [(dy - 1) * wp + (dx - 1) for dy in range(KH) for dx in range(KW)]
    highest = jax.lax.Precision.HIGHEST

    # ---- conv1: 9 per-tap MXU matmuls, f32 accumulate ----------------------
    acc1 = jnp.zeros((C, lext), jnp.float32)
    for t, s in enumerate(shifts):
        tap = x_ref[0, :, m + s:m + s + lext]                    # (C, lext)
        acc1 = acc1 + jnp.dot(w1_ref[t], tap,
                              preferred_element_type=jnp.float32,
                              precision=highest)
    y1 = _leaky(acc1 + b1_ref[...]) * mask_ref[...]   # zero outside the image
    y1_ref[...] = y1                                  # single full store

    # ---- conv2: same pattern on the intermediate ---------------------------
    acc2 = jnp.zeros((C, l), jnp.float32)
    for t, s in enumerate(shifts):
        tap = y1_ref[:, m + s:m + s + l]                         # (C, l)
        acc2 = acc2 + jnp.dot(w2_ref[t], tap,
                              preferred_element_type=jnp.float32,
                              precision=highest)
    acc2 = acc2 + b2_ref[...]

    # ---- residual add + fused LeakyReLU ------------------------------------
    x_center = x_ref[0, :, 2 * m:2 * m + l]                      # (C, l)
    o_ref[0] = _leaky(x_center + acc2)


def res_forward(x_nchw, w1, b1, w2, b2):
    """x_nchw: (N, C, H, W) f32 (PyTorch layout); weights OIHW; biases (C,)."""
    N, C, H, W = x_nchw.shape
    Hp, Wp = H + 2, W + 2
    L = Hp * Wp          # flattened padded image length (lane axis)
    M = Wp + 1           # max |flat shift| of a 3x3 tap
    Lext = L + 2 * M     # conv1 evaluated on this extended flat domain
    Lin = L + 4 * M      # input margin so every conv1 tap is a plain slice

    x = x_nchw.astype(jnp.float32)
    xpad = jnp.pad(x, ((0, 0), (0, 0), (1, 1), (1, 1)))            # (N,C,Hp,Wp)
    x_ext = jnp.pad(xpad.reshape(N, C, L), ((0, 0), (0, 0), (2 * M, 2 * M)))

    # Interior indicator on conv1's extended flat domain.
    mask2d = jnp.zeros((Hp, Wp), jnp.float32).at[1:H + 1, 1:W + 1].set(1.0)
    mask_ext = jnp.pad(mask2d.reshape(1, L), ((0, 0), (M, M)))     # (1, Lext)

    # PyTorch OIHW -> (tap, C_out, C_in), tap = dy*3 + dx.
    w1k = jnp.transpose(w1, (2, 3, 0, 1)).reshape(KH * KW, C, C).astype(jnp.float32)
    w2k = jnp.transpose(w2, (2, 3, 0, 1)).reshape(KH * KW, C, C).astype(jnp.float32)
    b1k = b1.reshape(C, 1).astype(jnp.float32)
    b2k = b2.reshape(C, 1).astype(jnp.float32)

    kernel = functools.partial(res_kernel, wp=Wp, l=L, lext=Lext, m=M)

    flops = 2 * KH * KW * C * C * (Lext + L) * N
    bytes_accessed = 4 * (N * C * (Lin + L) + Lext + 2 * (KH * KW * C * C + C))

    out_flat = pl.pallas_call(
        kernel,
        out_shape=jax.ShapeDtypeStruct((N, C, L), jnp.float32),
        grid_spec=pltpu.PrefetchScalarGridSpec(
            num_scalar_prefetch=0,
            grid=(N,),
            in_specs=[
                pl.BlockSpec((1, C, Lin), lambda i: (i, 0, 0)),
                pl.BlockSpec((1, Lext), lambda i: (0, 0)),
                pl.BlockSpec((KH * KW, C, C), lambda i: (0, 0, 0)),
                pl.BlockSpec((C, 1), lambda i: (0, 0)),
                pl.BlockSpec((KH * KW, C, C), lambda i: (0, 0, 0)),
                pl.BlockSpec((C, 1), lambda i: (0, 0)),
            ],
            out_specs=pl.BlockSpec((1, C, L), lambda i: (i, 0, 0)),
            scratch_shapes=[pltpu.VMEM((C, Lext), jnp.float32)],
        ),
        compiler_params=pltpu.CompilerParams(
            dimension_semantics=("parallel",)),
        cost_estimate=pl.CostEstimate(
            flops=flops, transcendentals=0, bytes_accessed=bytes_accessed),
    )(x_ext, mask_ext, w1k, b1k, w2k, b2k)

    # Drop the 1-pixel padding frame (cheap XLA reshape + slice).
    out_pad = out_flat.reshape(N, C, Hp, Wp)
    return out_pad[:, :, 1:H + 1, 1:W + 1]


def res_reference(x_nchw, w1, b1, w2, b2):
    """Pure-JAX reference (NCHW convs) matching the PyTorch module."""
    dn = jax.lax.conv_dimension_numbers(x_nchw.shape, w1.shape,
                                        ('NCHW', 'OIHW', 'NCHW'))
    hp = jax.lax.Precision.HIGHEST
    y = jax.lax.conv_general_dilated(x_nchw, w1, (1, 1), ((1, 1), (1, 1)),
                                     dimension_numbers=dn, precision=hp)
    y = y + b1[None, :, None, None]
    y = jnp.where(y > 0, y, NEG_SLOPE * y)
    y = jax.lax.conv_general_dilated(y, w2, (1, 1), ((1, 1), (1, 1)),
                                     dimension_numbers=dn, precision=hp)
    y = y + b2[None, :, None, None]
    z = x_nchw + y
    return jnp.where(z > 0, z, NEG_SLOPE * z)


if __name__ == "__main__":
    N, C, H, W = 2, 4, 16, 16
    key = jax.random.PRNGKey(0)
    kx, kw1, kb1, kw2, kb2 = jax.random.split(key, 5)

    x = jax.random.normal(kx, (N, C, H, W), jnp.float32)

    # Deterministic Conv2d-style init (kaiming-uniform-like bounds).
    fan_in = C * KH * KW
    bound = 1.0 / np.sqrt(fan_in)
    w1 = jax.random.uniform(kw1, (C, C, KH, KW), jnp.float32, -bound, bound)
    b1 = jax.random.uniform(kb1, (C,), jnp.float32, -bound, bound)
    w2 = jax.random.uniform(kw2, (C, C, KH, KW), jnp.float32, -bound, bound)
    b2 = jax.random.uniform(kb2, (C,), jnp.float32, -bound, bound)

    out = jax.block_until_ready(jax.jit(res_forward)(x, w1, b1, w2, b2))
    ref = res_reference(x, w1, b1, w2, b2)
    np.testing.assert_allclose(np.asarray(out), np.asarray(ref),
                               rtol=1e-5, atol=1e-5)
    print("KERNEL_OK")
</pallas_src>

<mosaic_0001>
module attributes {stable_mosaic.version = 11 : i64} {
  func.func @res_kernel(%arg0: i32, %arg1: memref<1x4x400xf32, #tpu.memory_space<vmem>>, %arg2: memref<1x362xf32, #tpu.memory_space<vmem>>, %arg3: memref<9x4x4xf32, #tpu.memory_space<vmem>>, %arg4: memref<4x1xf32, #tpu.memory_space<vmem>>, %arg5: memref<9x4x4xf32, #tpu.memory_space<vmem>>, %arg6: memref<4x1xf32, #tpu.memory_space<vmem>>, %arg7: memref<1x4x324xf32, #tpu.memory_space<vmem>>, %arg8: memref<4x362xf32, #tpu.memory_space<vmem>>) attributes {dimension_semantics = [#tpu.dimension_semantics<parallel>], iteration_bounds = array<i64: 2>, scalar_prefetch = 0 : i64, scratch_operands = 1 : i64, tpu.core_type = #tpu.core_type<tc>, window_params = [{transform_indices = @transform_0, window_bounds = array<i64: 1, 4, 400>}, {pipeline_mode = #tpu.pipeline_mode<synchronous>, transform_indices = @transform_1, window_bounds = array<i64: 1, 362>}, {pipeline_mode = #tpu.pipeline_mode<synchronous>, transform_indices = @transform_2, window_bounds = array<i64: 9, 4, 4>}, {pipeline_mode = #tpu.pipeline_mode<synchronous>, transform_indices = @transform_3, window_bounds = array<i64: 4, 1>}, {pipeline_mode = #tpu.pipeline_mode<synchronous>, transform_indices = @transform_4, window_bounds = array<i64: 9, 4, 4>}, {pipeline_mode = #tpu.pipeline_mode<synchronous>, transform_indices = @transform_5, window_bounds = array<i64: 4, 1>}, {transform_indices = @transform_6, window_bounds = array<i64: 1, 4, 324>}]} {
    %cst = arith.constant 0.000000e+00 : f32
    %0 = vector.broadcast %cst : f32 to vector<4x362xf32>
    %c0 = arith.constant 0 : index
    %c0_0 = arith.constant 0 : index
    %c0_1 = arith.constant 0 : index
    %1 = vector.load %arg1[%c0, %c0_0, %c0_1] : memref<1x4x400xf32, #tpu.memory_space<vmem>>, vector<1x4x362xf32>
    %2 = vector.shape_cast %1 : vector<1x4x362xf32> to vector<4x362xf32>
    %c0_2 = arith.constant 0 : index
    %c0_3 = arith.constant 0 : index
    %c0_4 = arith.constant 0 : index
    %3 = vector.load %arg3[%c0_2, %c0_3, %c0_4] : memref<9x4x4xf32, #tpu.memory_space<vmem>>, vector<1x4x4xf32>
    %4 = vector.shape_cast %3 : vector<1x4x4xf32> to vector<4x4xf32>
    %cst_5 = arith.constant dense<0.000000e+00> : vector<4x362xf32>
    %5 = tpu.matmul %4, %2, %cst_5 {dimension_numbers = #tpu.dot_dimension_numbers<[1], [0], [0], [1], [0, 0, 1, 1], [], []>, precision = #tpu.contract_precision<fp32>} : vector<4x4xf32>, vector<4x362xf32>, vector<4x362xf32> -> vector<4x362xf32>
    %6 = arith.addf %0, %5 : vector<4x362xf32>
    %c0_6 = arith.constant 0 : index
    %c0_7 = arith.constant 0 : index
    %c1 = arith.constant 1 : index
    %7 = vector.load %arg1[%c0_6, %c0_7, %c1] : memref<1x4x400xf32, #tpu.memory_space<vmem>>, vector<1x4x362xf32>
    %8 = vector.shape_cast %7 : vector<1x4x362xf32> to vector<4x362xf32>
    %c1_8 = arith.constant 1 : index
    %c0_9 = arith.constant 0 : index
    %c0_10 = arith.constant 0 : index
    %9 = vector.load %arg3[%c1_8, %c0_9, %c0_10] : memref<9x4x4xf32, #tpu.memory_space<vmem>>, vector<1x4x4xf32>
    %10 = vector.shape_cast %9 : vector<1x4x4xf32> to vector<4x4xf32>
    %cst_11 = arith.constant dense<0.000000e+00> : vector<4x362xf32>
    %11 = tpu.matmul %10, %8, %cst_11 {dimension_numbers = #tpu.dot_dimension_numbers<[1], [0], [0], [1], [0, 0, 1, 1], [], []>, precision = #tpu.contract_precision<fp32>} : vector<4x4xf32>, vector<4x362xf32>, vector<4x362xf32> -> vector<4x362xf32>
    %12 = arith.addf %6, %11 : vector<4x362xf32>
    %c0_12 = arith.constant 0 : index
    %c0_13 = arith.constant 0 : index
    %c2 = arith.constant 2 : index
    %13 = vector.load %arg1[%c0_12, %c0_13, %c2] : memref<1x4x400xf32, #tpu.memory_space<vmem>>, vector<1x4x362xf32>
    %14 = vector.shape_cast %13 : vector<1x4x362xf32> to vector<4x362xf32>
    %c2_14 = arith.constant 2 : index
    %c0_15 = arith.constant 0 : index
    %c0_16 = arith.constant 0 : index
    %15 = vector.load %arg3[%c2_14, %c0_15, %c0_16] : memref<9x4x4xf32, #tpu.memory_space<vmem>>, vector<1x4x4xf32>
    %16 = vector.shape_cast %15 : vector<1x4x4xf32> to vector<4x4xf32>
    %cst_17 = arith.constant dense<0.000000e+00> : vector<4x362xf32>
    %17 = tpu.matmul %16, %14, %cst_17 {dimension_numbers = #tpu.dot_dimension_numbers<[1], [0], [0], [1], [0, 0, 1, 1], [], []>, precision = #tpu.contract_precision<fp32>} : vector<4x4xf32>, vector<4x362xf32>, vector<4x362xf32> -> vector<4x362xf32>
    %18 = arith.addf %12, %17 : vector<4x362xf32>
    %c0_18 = arith.constant 0 : index
    %c0_19 = arith.constant 0 : index
    %c18 = arith.constant 18 : index
    %19 = vector.load %arg1[%c0_18, %c0_19, %c18] : memref<1x4x400xf32, #tpu.memory_space<vmem>>, vector<1x4x362xf32>
    %20 = vector.shape_cast %19 : vector<1x4x362xf32> to vector<4x362xf32>
    %c3 = arith.constant 3 : index
    %c0_20 = arith.constant 0 : index
    %c0_21 = arith.constant 0 : index
    %21 = vector.load %arg3[%c3, %c0_20, %c0_21] : memref<9x4x4xf32, #tpu.memory_space<vmem>>, vector<1x4x4xf32>
    %22 = vector.shape_cast %21 : vector<1x4x4xf32> to vector<4x4xf32>
    %cst_22 = arith.constant dense<0.000000e+00> : vector<4x362xf32>
    %23 = tpu.matmul %22, %20, %cst_22 {dimension_numbers = #tpu.dot_dimension_numbers<[1], [0], [0], [1], [0, 0, 1, 1], [], []>, precision = #tpu.contract_precision<fp32>} : vector<4x4xf32>, vector<4x362xf32>, vector<4x362xf32> -> vector<4x362xf32>
    %24 = arith.addf %18, %23 : vector<4x362xf32>
    %c0_23 = arith.constant 0 : index
    %c0_24 = arith.constant 0 : index
    %c19 = arith.constant 19 : index
    %25 = vector.load %arg1[%c0_23, %c0_24, %c19] : memref<1x4x400xf32, #tpu.memory_space<vmem>>, vector<1x4x362xf32>
    %26 = vector.shape_cast %25 : vector<1x4x362xf32> to vector<4x362xf32>
    %c4 = arith.constant 4 : index
    %c0_25 = arith.constant 0 : index
    %c0_26 = arith.constant 0 : index
    %27 = vector.load %arg3[%c4, %c0_25, %c0_26] : memref<9x4x4xf32, #tpu.memory_space<vmem>>, vector<1x4x4xf32>
    %28 = vector.shape_cast %27 : vector<1x4x4xf32> to vector<4x4xf32>
    %cst_27 = arith.constant dense<0.000000e+00> : vector<4x362xf32>
    %29 = tpu.matmul %28, %26, %cst_27 {dimension_numbers = #tpu.dot_dimension_numbers<[1], [0], [0], [1], [0, 0, 1, 1], [], []>, precision = #tpu.contract_precision<fp32>} : vector<4x4xf32>, vector<4x362xf32>, vector<4x362xf32> -> vector<4x362xf32>
    %30 = arith.addf %24, %29 : vector<4x362xf32>
    %c0_28 = arith.constant 0 : index
    %c0_29 = arith.constant 0 : index
    %c20 = arith.constant 20 : index
    %31 = vector.load %arg1[%c0_28, %c0_29, %c20] : memref<1x4x400xf32, #tpu.memory_space<vmem>>, vector<1x4x362xf32>
    %32 = vector.shape_cast %31 : vector<1x4x362xf32> to vector<4x362xf32>
    %c5 = arith.constant 5 : index
    %c0_30 = arith.constant 0 : index
    %c0_31 = arith.constant 0 : index
    %33 = vector.load %arg3[%c5, %c0_30, %c0_31] : memref<9x4x4xf32, #tpu.memory_space<vmem>>, vector<1x4x4xf32>
    %34 = vector.shape_cast %33 : vector<1x4x4xf32> to vector<4x4xf32>
    %cst_32 = arith.constant dense<0.000000e+00> : vector<4x362xf32>
    %35 = tpu.matmul %34, %32, %cst_32 {dimension_numbers = #tpu.dot_dimension_numbers<[1], [0], [0], [1], [0, 0, 1, 1], [], []>, precision = #tpu.contract_precision<fp32>} : vector<4x4xf32>, vector<4x362xf32>, vector<4x362xf32> -> vector<4x362xf32>
    %36 = arith.addf %30, %35 : vector<4x362xf32>
    %c0_33 = arith.constant 0 : index
    %c0_34 = arith.constant 0 : index
    %c36 = arith.constant 36 : index
    %37 = vector.load %arg1[%c0_33, %c0_34, %c36] : memref<1x4x400xf32, #tpu.memory_space<vmem>>, vector<1x4x362xf32>
    %38 = vector.shape_cast %37 : vector<1x4x362xf32> to vector<4x362xf32>
    %c6 = arith.constant 6 : index
    %c0_35 = arith.constant 0 : index
    %c0_36 = arith.constant 0 : index
    %39 = vector.load %arg3[%c6, %c0_35, %c0_36] : memref<9x4x4xf32, #tpu.memory_space<vmem>>, vector<1x4x4xf32>
    %40 = vector.shape_cast %39 : vector<1x4x4xf32> to vector<4x4xf32>
    %cst_37 = arith.constant dense<0.000000e+00> : vector<4x362xf32>
    %41 = tpu.matmul %40, %38, %cst_37 {dimension_numbers = #tpu.dot_dimension_numbers<[1], [0], [0], [1], [0, 0, 1, 1], [], []>, precision = #tpu.contract_precision<fp32>} : vector<4x4xf32>, vector<4x362xf32>, vector<4x362xf32> -> vector<4x362xf32>
    %42 = arith.addf %36, %41 : vector<4x362xf32>
    %c0_38 = arith.constant 0 : index
    %c0_39 = arith.constant 0 : index
    %c37 = arith.constant 37 : index
    %43 = vector.load %arg1[%c0_38, %c0_39, %c37] : memref<1x4x400xf32, #tpu.memory_space<vmem>>, vector<1x4x362xf32>
    %44 = vector.shape_cast %43 : vector<1x4x362xf32> to vector<4x362xf32>
    %c7 = arith.constant 7 : index
    %c0_40 = arith.constant 0 : index
    %c0_41 = arith.constant 0 : index
    %45 = vector.load %arg3[%c7, %c0_40, %c0_41] : memref<9x4x4xf32, #tpu.memory_space<vmem>>, vector<1x4x4xf32>
    %46 = vector.shape_cast %45 : vector<1x4x4xf32> to vector<4x4xf32>
    %cst_42 = arith.constant dense<0.000000e+00> : vector<4x362xf32>
    %47 = tpu.matmul %46, %44, %cst_42 {dimension_numbers = #tpu.dot_dimension_numbers<[1], [0], [0], [1], [0, 0, 1, 1], [], []>, precision = #tpu.contract_precision<fp32>} : vector<4x4xf32>, vector<4x362xf32>, vector<4x362xf32> -> vector<4x362xf32>
    %48 = arith.addf %42, %47 : vector<4x362xf32>
    %c0_43 = arith.constant 0 : index
    %c0_44 = arith.constant 0 : index
    %c38 = arith.constant 38 : index
    %49 = vector.load %arg1[%c0_43, %c0_44, %c38] : memref<1x4x400xf32, #tpu.memory_space<vmem>>, vector<1x4x362xf32>
    %50 = vector.shape_cast %49 : vector<1x4x362xf32> to vector<4x362xf32>
    %c8 = arith.constant 8 : index
    %c0_45 = arith.constant 0 : index
    %c0_46 = arith.constant 0 : index
    %51 = vector.load %arg3[%c8, %c0_45, %c0_46] : memref<9x4x4xf32, #tpu.memory_space<vmem>>, vector<1x4x4xf32>
    %52 = vector.shape_cast %51 : vector<1x4x4xf32> to vector<4x4xf32>
    %cst_47 = arith.constant dense<0.000000e+00> : vector<4x362xf32>
    %53 = tpu.matmul %52, %50, %cst_47 {dimension_numbers = #tpu.dot_dimension_numbers<[1], [0], [0], [1], [0, 0, 1, 1], [], []>, precision = #tpu.contract_precision<fp32>} : vector<4x4xf32>, vector<4x362xf32>, vector<4x362xf32> -> vector<4x362xf32>
    %54 = arith.addf %48, %53 : vector<4x362xf32>
    %c0_48 = arith.constant 0 : index
    %c0_49 = arith.constant 0 : index
    %55 = vector.load %arg4[%c0_48, %c0_49] : memref<4x1xf32, #tpu.memory_space<vmem>>, vector<4x1xf32>
    %56 = vector.broadcast %55 : vector<4x1xf32> to vector<4x362xf32>
    %57 = arith.addf %54, %56 : vector<4x362xf32>
    %cst_50 = arith.constant 0.000000e+00 : f32
    %58 = vector.broadcast %cst_50 : f32 to vector<4x362xf32>
    %59 = arith.cmpf ogt, %57, %58 : vector<4x362xf32>
    %cst_51 = arith.constant 2.000000e-01 : f32
    %60 = vector.broadcast %cst_51 : f32 to vector<4x362xf32>
    %61 = arith.mulf %60, %57 : vector<4x362xf32>
    %62 = arith.select %59, %57, %61 : vector<4x362xi1>, vector<4x362xf32>
    %c0_52 = arith.constant 0 : index
    %c0_53 = arith.constant 0 : index
    %63 = vector.load %arg2[%c0_52, %c0_53] : memref<1x362xf32, #tpu.memory_space<vmem>>, vector<1x362xf32>
    %64 = vector.broadcast %63 : vector<1x362xf32> to vector<4x362xf32>
    %65 = arith.mulf %62, %64 : vector<4x362xf32>
    %c0_54 = arith.constant 0 : index
    %c0_55 = arith.constant 0 : index
    %66 = vector.load %arg8[%c0_54, %c0_55] : memref<4x362xf32, #tpu.memory_space<vmem>>, vector<4x362xf32>
    tpu.vector_store %arg8[%c0_54, %c0_55], %65 {strides = array<i32>} : memref<4x362xf32, #tpu.memory_space<vmem>>, vector<4x362xf32>,
    %cst_56 = arith.constant 0.000000e+00 : f32
    %67 = vector.broadcast %cst_56 : f32 to vector<4x324xf32>
    %c0_57 = arith.constant 0 : index
    %c0_58 = arith.constant 0 : index
    %68 = vector.load %arg8[%c0_57, %c0_58] : memref<4x362xf32, #tpu.memory_space<vmem>>, vector<4x324xf32>
    %c0_59 = arith.constant 0 : index
    %c0_60 = arith.constant 0 : index
    %c0_61 = arith.constant 0 : index
    %69 = vector.load %arg5[%c0_59, %c0_60, %c0_61] : memref<9x4x4xf32, #tpu.memory_space<vmem>>, vector<1x4x4xf32>
    %70 = vector.shape_cast %69 : vector<1x4x4xf32> to vector<4x4xf32>
    %cst_62 = arith.constant dense<0.000000e+00> : vector<4x324xf32>
    %71 = tpu.matmul %70, %68, %cst_62 {dimension_numbers = #tpu.dot_dimension_numbers<[1], [0], [0], [1], [0, 0, 1, 1], [], []>, precision = #tpu.contract_precision<fp32>} : vector<4x4xf32>, vector<4x324xf32>, vector<4x324xf32> -> vector<4x324xf32>
    %72 = arith.addf %67, %71 : vector<4x324xf32>
    %c0_63 = arith.constant 0 : index
    %c1_64 = arith.constant 1 : index
    %73 = vector.load %arg8[%c0_63, %c1_64] : memref<4x362xf32, #tpu.memory_space<vmem>>, vector<4x324xf32>
    %c1_65 = arith.constant 1 : index
    %c0_66 = arith.constant 0 : index
    %c0_67 = arith.constant 0 : index
    %74 = vector.load %arg5[%c1_65, %c0_66, %c0_67] : memref<9x4x4xf32, #tpu.memory_space<vmem>>, vector<1x4x4xf32>
    %75 = vector.shape_cast %74 : vector<1x4x4xf32> to vector<4x4xf32>
    %cst_68 = arith.constant dense<0.000000e+00> : vector<4x324xf32>
    %76 = tpu.matmul %75, %73, %cst_68 {dimension_numbers = #tpu.dot_dimension_numbers<[1], [0], [0], [1], [0, 0, 1, 1], [], []>, precision = #tpu.contract_precision<fp32>} : vector<4x4xf32>, vector<4x324xf32>, vector<4x324xf32> -> vector<4x324xf32>
    %77 = arith.addf %72, %76 : vector<4x324xf32>
    %c0_69 = arith.constant 0 : index
    %c2_70 = arith.constant 2 : index
    %78 = vector.load %arg8[%c0_69, %c2_70] : memref<4x362xf32, #tpu.memory_space<vmem>>, vector<4x324xf32>
    %c2_71 = arith.constant 2 : index
    %c0_72 = arith.constant 0 : index
    %c0_73 = arith.constant 0 : index
    %79 = vector.load %arg5[%c2_71, %c0_72, %c0_73] : memref<9x4x4xf32, #tpu.memory_space<vmem>>, vector<1x4x4xf32>
    %80 = vector.shape_cast %79 : vector<1x4x4xf32> to vector<4x4xf32>
    %cst_74 = arith.constant dense<0.000000e+00> : vector<4x324xf32>
    %81 = tpu.matmul %80, %78, %cst_74 {dimension_numbers = #tpu.dot_dimension_numbers<[1], [0], [0], [1], [0, 0, 1, 1], [], []>, precision = #tpu.contract_precision<fp32>} : vector<4x4xf32>, vector<4x324xf32>, vector<4x324xf32> -> vector<4x324xf32>
    %82 = arith.addf %77, %81 : vector<4x324xf32>
    %c0_75 = arith.constant 0 : index
    %c18_76 = arith.constant 18 : index
    %83 = vector.load %arg8[%c0_75, %c18_76] : memref<4x362xf32, #tpu.memory_space<vmem>>, vector<4x324xf32>
    %c3_77 = arith.constant 3 : index
    %c0_78 = arith.constant 0 : index
    %c0_79 = arith.constant 0 : index
    %84 = vector.load %arg5[%c3_77, %c0_78, %c0_79] : memref<9x4x4xf32, #tpu.memory_space<vmem>>, vector<1x4x4xf32>
    %85 = vector.shape_cast %84 : vector<1x4x4xf32> to vector<4x4xf32>
    %cst_80 = arith.constant dense<0.000000e+00> : vector<4x324xf32>
    %86 = tpu.matmul %85, %83, %cst_80 {dimension_numbers = #tpu.dot_dimension_numbers<[1], [0], [0], [1], [0, 0, 1, 1], [], []>, precision = #tpu.contract_precision<fp32>} : vector<4x4xf32>, vector<4x324xf32>, vector<4x324xf32> -> vector<4x324xf32>
    %87 = arith.addf %82, %86 : vector<4x324xf32>
    %c0_81 = arith.constant 0 : index
    %c19_82 = arith.constant 19 : index
    %88 = vector.load %arg8[%c0_81, %c19_82] : memref<4x362xf32, #tpu.memory_space<vmem>>, vector<4x324xf32>
    %c4_83 = arith.constant 4 : index
    %c0_84 = arith.constant 0 : index
    %c0_85 = arith.constant 0 : index
    %89 = vector.load %arg5[%c4_83, %c0_84, %c0_85] : memref<9x4x4xf32, #tpu.memory_space<vmem>>, vector<1x4x4xf32>
    %90 = vector.shape_cast %89 : vector<1x4x4xf32> to vector<4x4xf32>
    %cst_86 = arith.constant dense<0.000000e+00> : vector<4x324xf32>
    %91 = tpu.matmul %90, %88, %cst_86 {dimension_numbers = #tpu.dot_dimension_numbers<[1], [0], [0], [1], [0, 0, 1, 1], [], []>, precision = #tpu.contract_precision<fp32>} : vector<4x4xf32>, vector<4x324xf32>, vector<4x324xf32> -> vector<4x324xf32>
    %92 = arith.addf %87, %91 : vector<4x324xf32>
    %c0_87 = arith.constant 0 : index
    %c20_88 = arith.constant 20 : index
    %93 = vector.load %arg8[%c0_87, %c20_88] : memref<4x362xf32, #tpu.memory_space<vmem>>, vector<4x324xf32>
    %c5_89 = arith.constant 5 : index
    %c0_90 = arith.constant 0 : index
    %c0_91 = arith.constant 0 : index
    %94 = vector.load %arg5[%c5_89, %c0_90, %c0_91] : memref<9x4x4xf32, #tpu.memory_space<vmem>>, vector<1x4x4xf32>
    %95 = vector.shape_cast %94 : vector<1x4x4xf32> to vector<4x4xf32>
    %cst_92 = arith.constant dense<0.000000e+00> : vector<4x324xf32>
    %96 = tpu.matmul %95, %93, %cst_92 {dimension_numbers = #tpu.dot_dimension_numbers<[1], [0], [0], [1], [0, 0, 1, 1], [], []>, precision = #tpu.contract_precision<fp32>} : vector<4x4xf32>, vector<4x324xf32>, vector<4x324xf32> -> vector<4x324xf32>
    %97 = arith.addf %92, %96 : vector<4x324xf32>
    %c0_93 = arith.constant 0 : index
    %c36_94 = arith.constant 36 : index
    %98 = vector.load %arg8[%c0_93, %c36_94] : memref<4x362xf32, #tpu.memory_space<vmem>>, vector<4x324xf32>
    %c6_95 = arith.constant 6 : index
    %c0_96 = arith.constant 0 : index
    %c0_97 = arith.constant 0 : index
    %99 = vector.load %arg5[%c6_95, %c0_96, %c0_97] : memref<9x4x4xf32, #tpu.memory_space<vmem>>, vector<1x4x4xf32>
    %100 = vector.shape_cast %99 : vector<1x4x4xf32> to vector<4x4xf32>
    %cst_98 = arith.constant dense<0.000000e+00> : vector<4x324xf32>
    %101 = tpu.matmul %100, %98, %cst_98 {dimension_numbers = #tpu.dot_dimension_numbers<[1], [0], [0], [1], [0, 0, 1, 1], [], []>, precision = #tpu.contract_precision<fp32>} : vector<4x4xf32>, vector<4x324xf32>, vector<4x324xf32> -> vector<4x324xf32>
    %102 = arith.addf %97, %101 : vector<4x324xf32>
    %c0_99 = arith.constant 0 : index
    %c37_100 = arith.constant 37 : index
    %103 = vector.load %arg8[%c0_99, %c37_100] : memref<4x362xf32, #tpu.memory_space<vmem>>, vector<4x324xf32>
    %c7_101 = arith.constant 7 : index
    %c0_102 = arith.constant 0 : index
    %c0_103 = arith.constant 0 : index
    %104 = vector.load %arg5[%c7_101, %c0_102, %c0_103] : memref<9x4x4xf32, #tpu.memory_space<vmem>>, vector<1x4x4xf32>
    %105 = vector.shape_cast %104 : vector<1x4x4xf32> to vector<4x4xf32>
    %cst_104 = arith.constant dense<0.000000e+00> : vector<4x324xf32>
    %106 = tpu.matmul %105, %103, %cst_104 {dimension_numbers = #tpu.dot_dimension_numbers<[1], [0], [0], [1], [0, 0, 1, 1], [], []>, precision = #tpu.contract_precision<fp32>} : vector<4x4xf32>, vector<4x324xf32>, vector<4x324xf32> -> vector<4x324xf32>
    %107 = arith.addf %102, %106 : vector<4x324xf32>
    %c0_105 = arith.constant 0 : index
    %c38_106 = arith.constant 38 : index
    %108 = vector.load %arg8[%c0_105, %c38_106] : memref<4x362xf32, #tpu.memory_space<vmem>>, vector<4x324xf32>
    %c8_107 = arith.constant 8 : index
    %c0_108 = arith.constant 0 : index
    %c0_109 = arith.constant 0 : index
    %109 = vector.load %arg5[%c8_107, %c0_108, %c0_109] : memref<9x4x4xf32, #tpu.memory_space<vmem>>, vector<1x4x4xf32>
    %110 = vector.shape_cast %109 : vector<1x4x4xf32> to vector<4x4xf32>
    %cst_110 = arith.constant dense<0.000000e+00> : vector<4x324xf32>
    %111 = tpu.matmul %110, %108, %cst_110 {dimension_numbers = #tpu.dot_dimension_numbers<[1], [0], [0], [1], [0, 0, 1, 1], [], []>, precision = #tpu.contract_precision<fp32>} : vector<4x4xf32>, vector<4x324xf32>, vector<4x324xf32> -> vector<4x324xf32>
    %112 = arith.addf %107, %111 : vector<4x324xf32>
    %c0_111 = arith.constant 0 : index
    %c0_112 = arith.constant 0 : index
    %113 = vector.load %arg6[%c0_111, %c0_112] : memref<4x1xf32, #tpu.memory_space<vmem>>, vector<4x1xf32>
    %114 = vector.broadcast %113 : vector<4x1xf32> to vector<4x324xf32>
    %115 = arith.addf %112, %114 : vector<4x324xf32>
    %c0_113 = arith.constant 0 : index
    %c0_114 = arith.constant 0 : index
    %c38_115 = arith.constant 38 : index
    %116 = vector.load %arg1[%c0_113, %c0_114, %c38_115] : memref<1x4x400xf32, #tpu.memory_space<vmem>>, vector<1x4x324xf32>
    %117 = vector.shape_cast %116 : vector<1x4x324xf32> to vector<4x324xf32>
    %118 = arith.addf %117, %115 : vector<4x324xf32>
    %cst_116 = arith.constant 0.000000e+00 : f32
    %119 = vector.broadcast %cst_116 : f32 to vector<4x324xf32>
    %120 = arith.cmpf ogt, %118, %119 : vector<4x324xf32>
    %cst_117 = arith.constant 2.000000e-01 : f32
    %121 = vector.broadcast %cst_117 : f32 to vector<4x324xf32>
    %122 = arith.mulf %121, %118 : vector<4x324xf32>
    %123 = arith.select %120, %118, %122 : vector<4x324xi1>, vector<4x324xf32>
    %c0_118 = arith.constant 0 : index
    %c0_119 = arith.constant 0 : index
    %c0_120 = arith.constant 0 : index
    %124 = vector.load %arg7[%c0_118, %c0_119, %c0_120] : memref<1x4x324xf32, #tpu.memory_space<vmem>>, vector<1x4x324xf32>
    %125 = vector.shape_cast %124 : vector<1x4x324xf32> to vector<4x324xf32>
    %126 = vector.shape_cast %123 : vector<4x324xf32> to vector<1x4x324xf32>
    tpu.vector_store %arg7[%c0_118, %c0_119, %c0_120], %126 {strides = array<i32>} : memref<1x4x324xf32, #tpu.memory_space<vmem>>, vector<1x4x324xf32>,
    return
  }
  func.func @transform_0(%arg0: i32) -> (i32, i32, i32) {
    %c0_i32 = arith.constant 0 : i32
    %c0_i32_0 = arith.constant 0 : i32
    %c0_i32_1 = arith.constant 0 : i32
    return %arg0, %c0_i32, %c0_i32_0 : i32, i32, i32
  }
  func.func @transform_1(%arg0: i32) -> (i32, i32) {
    %c0_i32 = arith.constant 0 : i32
    %c0_i32_0 = arith.constant 0 : i32
    %c0_i32_1 = arith.constant 0 : i32
    return %c0_i32, %c0_i32_0 : i32, i32
  }
  func.func @transform_2(%arg0: i32) -> (i32, i32, i32) {
    %c0_i32 = arith.constant 0 : i32
    %c0_i32_0 = arith.constant 0 : i32
    %c0_i32_1 = arith.constant 0 : i32
    %c0_i32_2 = arith.constant 0 : i32
    return %c0_i32, %c0_i32_0, %c0_i32_1 : i32, i32, i32
  }
  func.func @transform_3(%arg0: i32) -> (i32, i32) {
    %c0_i32 = arith.constant 0 : i32
    %c0_i32_0 = arith.constant 0 : i32
    %c0_i32_1 = arith.constant 0 : i32
    return %c0_i32, %c0_i32_0 : i32, i32
  }
  func.func @transform_4(%arg0: i32) -> (i32, i32, i32) {
    %c0_i32 = arith.constant 0 : i32
    %c0_i32_0 = arith.constant 0 : i32
    %c0_i32_1 = arith.constant 0 : i32
    %c0_i32_2 = arith.constant 0 : i32
    return %c0_i32, %c0_i32_0, %c0_i32_1 : i32, i32, i32
  }
  func.func @transform_5(%arg0: i32) -> (i32, i32) {
    %c0_i32 = arith.constant 0 : i32
    %c0_i32_0 = arith.constant 0 : i32
    %c0_i32_1 = arith.constant 0 : i32
    return %c0_i32, %c0_i32_0 : i32, i32
  }
  func.func @transform_6(%arg0: i32) -> (i32, i32, i32) {
    %c0_i32 = arith.constant 0 : i32
    %c0_i32_0 = arith.constant 0 : i32
    %c0_i32_1 = arith.constant 0 : i32
    return %arg0, %c0_i32, %c0_i32_0 : i32, i32, i32
  }
}

</mosaic_0001>

<bundles_post_ra>
// kernel: res_forward.1
= control target key start
LH: loop header
LB: loop body
LE: loop exit
PB: predicated region body
PF: predicated region fallthrough
CT: control target
= control target key end

     0   :  { %s18343_s21 = smov 0   ;;  %s20162_s0 = inlined_call_operand.vmem [shape: f32[2,4,400], index: 0, kind: input, shape index: {}]   ;;  %s20163_s1 = inlined_call_operand.vmem [shape: f32[1,362], index: 1, kind: input, shape index: {}]   ;;  %s20164_s2 = inlined_call_operand.vmem [shape: f32[9,4,4], index: 2, kind: input, shape index: {}]   ;;  %s20165_s3 = inlined_call_operand.vmem [shape: f32[4,1], index: 3, kind: input, shape index: {}]   ;;  %s20166_s4 = inlined_call_operand.vmem [shape: f32[9,4,4], index: 4, kind: input, shape index: {}]   ;;  %s20167_s5 = inlined_call_operand.vmem [shape: f32[4,1], index: 5, kind: input, shape index: {}]   ;;  %s20168_s6 = inlined_call_operand.vmem [shape: f32[2,4,324], index: 6, kind: output, shape index: {}]  }
   0x1 LB: > { %s17266_s22 = sadd.s32 4294967295, %s18294_s21   ;;  %p17270_p0 = scmp.ge.s32.totalorder %s18294_s21, 1  ;;  %s18294_s21 = sphi %s18343_s21, %s16_s21  }
   0x2   : > { %p212_p1 = scmp.lt.s32.totalorder %s18294_s21, 3 }
   0x4   : > { %p213_p2 = pnand %p17270_p0, %p212_p1 }
   0x5   : > { %p242_p3 = scmp.lt.s32.totalorder (!%p213_p2), %s17266_s22, 1  ;;  %v18296_v0 = vmov (!%p213_p2), 0.0   ;;  %s18297_s27 = smov (!%p213_p2), 127   ;;  %vm18298_vm0 = vmmov (!%p213_p2), 0   ;;  %v17274_v10 = vld [vmem:[%s20164_s2 + $0x4] sm:$0xf] (!%p213_p2) }
   0x6   : > { %216 = sbr.rel (%p213_p2) target bundleno = 1800 (0x708), region = 44  ;;  %17509 = vmatprep.subr.mxu1 (!%p213_p2), %v18296_v0  ;;  %346 = vmatprep.mubr.f32.mxu0 (!%p213_p2), %v18296_v0  ;;  %s18299_s28 = smov (!%p213_p2), 126   ;;  %vm269_vm1 = vcmask (!%p213_p2), 31744   ;;  %vm266_vm2 = vcmask (!%p213_p2), 1039360   ;;  %vm273_vm3 = vcmask (!%p213_p2), 1043456   ;;  %vm4002_vm4 = vcmask (!%p213_p2), 891904  }
   0x7   : > { %17511 = vmatprep.mubr.msk.f32.mxu1 (!%p213_p2), %vm18298_vm0, %v18296_v0  ;;  %s18300_s29 = smov (!%p213_p2), 110   ;;  %s18301_s30 = smov (!%p213_p2), 109   ;;  %v271_v11 = vsel (!%p213_p2), %vm269_vm1, %v17274_v10, 0  ;;  %v254_v40 = vld [vmem:[%s20164_s2] sm:$0xf] (!%p213_p2)  ;;  %vm4941_vm5 = vcmask (!%p213_p2), 883712  }
   0x8   : > { %s18302_s7 = smov (!%p213_p2), 108   ;;  %s18303_s8 = smov (!%p213_p2), 92   ;;  %v18422_v12 = vand.u32 (!%p213_p2), 4294901760, %v271_v11  ;;  %v1192_v46 = vsel (!%p213_p2), %vm269_vm1, %v254_v40, 0  ;;  %vm5883_vm6 = vcmask (!%p213_p2), 752640   ;;  %vm6826_vm7 = vcmask (!%p213_p2), 744448  }
   0x9   : > { %s18304_s9 = smov (!%p213_p2), 91   ;;  %s18305_s10 = smov (!%p213_p2), 90   ;;  %v18479_v50 = vand.u32 (!%p213_p2), 4294901760, %v1192_v46  ;;  %vm2124_vm8 = vcmask (!%p213_p2), 1031168   ;;  %vm3063_vm9 = vcmask (!%p213_p2), 900096   ;;  %vm7769_vm10 = vcmask (!%p213_p2), 736256  }
   0xa   : > { %v18425_v13 = vsub.f32 (!%p213_p2), %v271_v11, %v18422_v12  ;;  %vm8739_vm12 = vcmask (!%p213_p2), 863232   ;;  %s18307_s20 = smov (!%p213_p2), 38   ;;  %vm17183_vm15 = vcmask (!%p213_p2), 310272  }
   0xb   : > { %v18500_v56 = vsub.f32 (!%p213_p2), %v1192_v46, %v18479_v50  ;;  %v17276_v46 = vld [vmem:[%s20164_s2 + $0xc] sm:$0xf] (!%p213_p2) }
   0xc   : > { %v18428_v15 = vand.u32 (!%p213_p2), 4294901760, %v18425_v13 }
   0xd   : > { %s20170_s22 = smov (!%p242_p3, %s17266_s22), 1  ;;  %v18518_v61 = vand.u32 4294901760, %v18500_v56 }
   0xe   : > { %s17292_s23 = sshll.u32 %s20170_s22, 4  ;;  %v350_v21 = vsub.f32 %v18425_v13, %v18428_v15 }
   0xf   : > { %s18359_s26 = scalar_lea.vmem %s20162_s0, %s17292_s23  ;;  %s18261_s23 = smul.u32 12, %s20170_s22 }
  0x10   : > { %v18362_v1 = vld [vmem:[%s18359_s26] sm:$0xff]  ;;  %v18375_v3 = vld [vmem:[%s18359_s26 + $0x8] sm:$0xf]  ;;  %v351_v30 = vand.u32 4294901760, %v350_v21 }
  0x11   : > { %260 = vrot.lane.b32.xlu1 %v18362_v1, %s18297_s27  ;;  %v18368_v2 = vcombine.high %v18362_v1, %v18362_v1  ;;  %v2112_v4 = vld [vmem:[%s18359_s26 + $0x8] sm:$0xf]  ;;  %v1198_v47 = vsel %vm273_vm3, %v18375_v3, 0  ;;  %v1194_v21 = vsel %vm273_vm3, %v18362_v1, 0 }
  0x12   : > { %v3051_v5 = vld [vmem:[%s18359_s26 + $0x8] sm:$0xf]  ;;  %v18481_v52 = vand.u32 4294901760, %v1198_v47 }
  0x13   : > { %262 = vrot.lane.b32.xlu0 %v18368_v2, %s18297_s27  ;;  %v3990_v6 = vld [vmem:[%s18359_s26 + $0x8] sm:$0xf] }
  0x14   : > { %v4929_v7 = vld [vmem:[%s18359_s26 + $0x8] sm:$0xf]  ;;  %v18505_v58 = vsub.f32 %v1198_v47, %v18481_v52  ;;  %v3067_v47 = vsel %vm269_vm1, %v17276_v46, 0 }
  0x15   : > { %2120 = vrot.lane.b32.xlu1 %v18368_v2, %s18299_s28  ;;  %v6811_v8 = vld [vmem:[%s18359_s26 + $0x8] sm:$0xff] }
  0x16   : > { %v6817_v9 = vcombine.high %v6811_v8, %v6811_v8  ;;  %v1744_v63 = vand.u32 4294901760, %v18505_v58 }
  0x17   : > { %264 = vrot.lane.b32.xlu0 %v18375_v3, %s18297_s27 }
  0x19   : > { %2118 = vrot.lane.b32.xlu1 %v18362_v1, %s18299_s28 }
  0x1b   : > { %2122 = vrot.lane.b32.xlu0 %v2112_v4, %s18299_s28 }
  0x1d   : > { %3061 = vrot.lane.b32.xlu1 %v3051_v5, %s18300_s29  ;;  %v1270_v5 = vsub.f32 %v18500_v56, %v18518_v61 }
  0x1f   : > { %3059 = vrot.lane.b32.xlu0 %v18368_v2, %s18300_s29 }
  0x21   : > { %3998 = vrot.lane.b32.xlu1 %v18368_v2, %s18301_s30 }
  0x23   : > { %3057 = vrot.lane.b32.xlu0 %v18362_v1, %s18300_s29 }
  0x25   : > { %3996 = vrot.lane.b32.xlu1 %v18362_v1, %s18301_s30 }
  0x27   : > { %4000 = vrot.lane.b32.xlu0 %v3990_v6, %s18301_s30 }
  0x29   : > { %4939 = vrot.lane.b32.xlu1 %v4929_v7, %s18302_s7  ;;  %v1196_v7 = vsel %vm273_vm3, %v18368_v2, 0 }
  0x2b   : > { %4937 = vrot.lane.b32.xlu0 %v18368_v2, %s18302_s7 }
  0x2d   : > { %5877 = vrot.lane.b32.xlu1 %v18368_v2, %s18303_s8 }
  0x2f   : > { %4935 = vrot.lane.b32.xlu0 %v18362_v1, %s18302_s7 }
  0x31   : > { %5875 = vrot.lane.b32.xlu1 %v18362_v1, %s18303_s8 }
  0x33   : > { %5879 = vrot.lane.b32.xlu0 %v6811_v8, %s18303_s8 }
  0x35   : > { %6822 = vrot.lane.b32.xlu1 %v6811_v8, %s18304_s9 }
  0x37   : > { %6820 = vrot.lane.b32.xlu0 %v18368_v2, %s18304_s9  ;;  %v18551_v2 = vand.u32 4294901760, %v1196_v7 }
  0x39   : > { %5881 = vrot.lane.b32.xlu1 %v6817_v9, %s18303_s8 }
  0x3b   : > { %6818 = vrot.lane.b32.xlu0 %v18362_v1, %s18304_s9  ;;  %v18586_v1 = vand.u32 4294901760, %v1194_v21 }
  0x3f   : > { %6824 = vrot.lane.b32.xlu0 %v6817_v9, %s18304_s9 }
  0x43   : > { %7765 = vrot.lane.b32.xlu0 %v6811_v8, %s18305_s10  ;;  %v1745_v8 = vsub.f32 %v18505_v58, %v1744_v63 }
  0x47   : > { %7767 = vrot.lane.b32.xlu0 %v6817_v9, %s18305_s10 }
  0x83   : > { %v261_v14 = vpop.permute.xlu1 %260 }
  0x85   : > { %v263_v16 = vpop.permute.xlu0 %262 }
  0x86   : > { %v267_v17 = vsel %vm266_vm2, %v261_v14, %v263_v16  ;;  %v1746_v14 = vand.u32 4294901760, %v1745_v8 }
  0x87   : > { %v274_v18 = vsel %vm273_vm3, %v267_v17, 0  ;;  %v18432_v19 = vpop.permute.xlu1 %2120 }
  0x88   : > { %v18434_v20 = vand.u32 4294901760, %v274_v18 }
  0x89   : > { %v265_v22 = vpop.permute.xlu0 %264 }
  0x8a   : > { %v18439_v23 = vsub.f32 %v274_v18, %v18434_v20  ;;  %v268_v24 = vsel %vm266_vm2, %v263_v16, %v265_v22  ;;  %v278_v25 = vsel %vm273_vm3, %v265_v22, 0  ;;  %v17275_v16 = vld [vmem:[%s20164_s2 + $0x8] sm:$0xf]  ;;  %v18576_v22 = vsub.f32 %v1196_v7, %v18551_v2 }
  0x8b   : > { %v276_v26 = vsel %vm273_vm3, %v268_v24, 0  ;;  %v18444_v27 = vand.u32 4294901760, %v278_v25  ;;  %v18446_v28 = vpop.permute.xlu1 %2118 }
  0x8c   : > { %v18448_v29 = vand.u32 4294901760, %v276_v26  ;;  %v366_v31 = vand.u32 4294901760, %v18439_v23  ;;  %v2125_v7 = vsel %vm2124_vm8, %v18446_v28, %v18432_v19 }
  0x8d   : > { %v823_v32 = vsub.f32 %v278_v25, %v18444_v27  ;;  %17510 = vmatpush3.msra.mxu1 %v18444_v27  ;;  %v18453_v33 = vpop.permute.xlu0 %2122 }
  0x8e   : > { %v359_v34 = vsub.f32 %v276_v26, %v18448_v29  ;;  %281 = vmatprep.subr.mxu0 %v18448_v29  ;;  %17512 = vmatmul.mubr.f32.vlgmr.msra.gmra.mrb[0].mxu1 %v351_v30  ;;  %v367_v39 = vsub.f32 %v18439_v23, %v366_v31  ;;  %v2134_v24 = vsel %vm273_vm3, %v18453_v33, 0 }
  0x8f   : > { %v824_v35 = vand.u32 4294901760, %v823_v32  ;;  %283 = vmatpush1.msra.mxu0 %v18434_v20  ;;  %17514 = vmatprep.subr.mxu1 %v18296_v0  ;;  %v18459_v36 = vpop.permute.xlu1 %3061 }
  0x90   : > { %352 = vmatmul.mubr.f32.vlgmr.msra.gmra.mrb[0].mxu0 %v351_v30  ;;  %17516 = vmatprep.mubr.msk.f32.mxu1 %vm18298_vm0, %v18296_v0  ;;  %v360_v37 = vand.u32 4294901760, %v359_v34  ;;  %v368_v48 = vand.u32 4294901760, %v367_v39  ;;  %v18597_v30 = vand.u32 4294901760, %v2134_v24 }
  0x91   : > { %v825_v38 = vsub.f32 %v823_v32, %v824_v35  ;;  %432 = vmatprep.mubr.f32.mxu0 %v18296_v0  ;;  %v18470_v41 = vpop.permute.xlu0 %3059 }
  0x92   : > { %v361_v42 = vsub.f32 %v359_v34, %v360_v37 }
  0x93   : > { %v826_v43 = vand.u32 4294901760, %v825_v38  ;;  %v3999_v44 = vpop.permute.xlu1 %3998 }
  0x94   : > { %v362_v45 = vand.u32 4294901760, %v361_v42 }
  0x95   : > { %17515 = vmatpush3.msra.mxu1 %v826_v43  ;;  %v18475_v49 = vpop.permute.xlu0 %3057 }
  0x96   : > { %363 = vmatprep.subr.mxu0 %v362_v45  ;;  %17517 = vmatmul.mubr.f32.vlgmr.msra.gmra.mrb[2].mxu1 %v18422_v12 }
  0x97   : > { %17519 = vmatprep.subr.mxu1 %v18296_v0  ;;  %369 = vmatpush1.msra.mxu0 %v368_v48  ;;  %v3997_v51 = vpop.permute.xlu1 %3996  ;;  %v3073_v48 = vsel %vm273_vm3, %v18459_v36, 0 }
  0x98   : > { %17520 = vmatpush3.msra.mxu1 %v823_v32  ;;  %434 = vmatmul.mubr.f32.vlgmr.msra.gmra.mrb[0].mxu0 %v18422_v12  ;;  %v18485_v53 = vsel %vm4002_vm4, %v3997_v51, %v3999_v44  ;;  %v18664_v51 = vand.u32 4294901760, %v3067_v47 }
  0x99   : > { %442 = vmatprep.subr.mxu0 %v359_v34  ;;  %17521 = vmatprep.mubr.msk.f32.mxu1 %vm18298_vm0, %v18296_v0  ;;  %v18489_v54 = vpop.permute.xlu0 %4000  ;;  %v2679_v34 = vsub.f32 %v2134_v24, %v18597_v30 }
  0x9a   : > { %445 = vmatpush1.msra.mxu0 %v18439_v23  ;;  %17524 = vmatprep.subr.mxu1 %v18296_v0  ;;  %v18495_v55 = vsel %vm4002_vm4, %v3999_v44, %v18489_v54  ;;  %v2128_v23 = vsel %vm269_vm1, %v17275_v16, 0 }
  0x9b   : > { %518 = vmatprep.subr.mxu0 %v18448_v29  ;;  %17522 = vmatmul.mubr.f32.vlgmr.msra.gmra.mrb[4].mxu1 %v18425_v13  ;;  %v18502_v57 = vpop.permute.xlu1 %4939  ;;  %v2680_v39 = vand.u32 4294901760, %v2679_v34 }
  0x9c   : > { %17525 = vmatpush3.msra.mxu1 %v18444_v27  ;;  %17526 = vmatprep.mubr.msk.f32.mxu1 %vm18298_vm0, %v18296_v0 }
  0x9d   : > { %17529 = vmatprep.subr.mxu1 %v18296_v0  ;;  %508 = vmatprep.mubr.f32.mxu0 %v18296_v0  ;;  %v4938_v59 = vpop.permute.xlu0 %4937  ;;  %v2681_v42 = vsub.f32 %v2679_v34, %v2680_v39 }
  0x9e   : > { %v18514_v60 = vsel %vm4941_vm5, %v4938_v59, %v18502_v57 }
  0x9f   : > { %17527 = vmatmul.mubr.f32.vlgmr.msra.gmra.mrb[6].mxu1 %v18428_v15  ;;  %v5878_v62 = vpop.permute.xlu1 %5877  ;;  %v2682_v45 = vand.u32 4294901760, %v2681_v42  ;;  %v4951_v42 = vsel %vm273_vm3, %v18502_v57, 0 }
  0xa0   : > { %17530 = vmatpush3.msra.mxu1 %v824_v35  ;;  %511 = vmatmul.mubr.f32.vlgmr.msra.gmra.mrb[0].mxu0 %v18425_v13  ;;  %v18554_v13 = vand.u32 4294901760, %v1270_v5 }
  0xa1   : > { %520 = vmatpush1.msra.mxu0 %v18434_v20  ;;  %17531 = vmatprep.mubr.msk.f32.mxu1 %vm18298_vm0, %v18296_v0  ;;  %v4936_v3 = vpop.permute.xlu0 %4935 }
  0xa2   : > { %596 = vmatprep.subr.mxu0 %v360_v37  ;;  %17534 = vmatprep.subr.mxu1 %v18296_v0  ;;  %v18527_v4 = vsel %vm4941_vm5, %v4936_v3, %v4938_v59  ;;  %v2126_v3 = vsel %vm2124_vm8, %v18432_v19, %v18453_v33  ;;  %v2130_v19 = vsel %vm273_vm3, %v2125_v7, 0 }
  0xa3   : > { %17532 = vmatmul.mubr.f32.vlgmr.msra.gmra.mrb[8].mxu1 %v18422_v12  ;;  %583 = vmatprep.mubr.f32.mxu0 %v18296_v0  ;;  %v5876_v6 = vpop.permute.xlu1 %5875  ;;  %v2132_v5 = vsel %vm273_vm3, %v2126_v3, 0  ;;  %v18739_v16 = vand.u32 4294901760, %v2130_v19 }
  0xa4   : > { %17535 = vmatpush3.msra.mxu1 %v18444_v27  ;;  %17536 = vmatprep.mubr.msk.f32.mxu1 %vm18298_vm0, %v18296_v0  ;;  %v18542_v9 = vsel %vm5883_vm6, %v5876_v6, %v5878_v62  ;;  %v18592_v27 = vand.u32 4294901760, %v2128_v23  ;;  %v18711_v6 = vand.u32 4294901760, %v2132_v5 }
  0xa5   : > { %17539 = vmatprep.subr.mxu1 %v18296_v0  ;;  %v18545_v10 = vpop.permute.xlu0 %5879 }
  0xa6   : > { %v18549_v11 = vsel %vm5883_vm6, %v5878_v62, %v18545_v10  ;;  %v18610_v32 = vsub.f32 %v2128_v23, %v18592_v27  ;;  %v18732_v28 = vsub.f32 %v2132_v5, %v18711_v6  ;;  %v18753_v23 = vsub.f32 %v2130_v19, %v18739_v16 }
  0xa7   : > { %17537 = vmatmul.mubr.f32.vlgmr.msra.gmra.mrb[10].mxu1 %v18422_v12  ;;  %v18565_v17 = vpop.permute.xlu1 %6822 }
  0xa8   : > { %587 = vmatmul.mubr.f32.vlgmr.msra.gmra.mrb[0].mxu0 %v18428_v15  ;;  %17540 = vmatpush3.msra.mxu1 %v18481_v52  ;;  %v18623_v37 = vand.u32 4294901760, %v18610_v32 }
  0xa9   : > { %600 = vmatpush1.msra.mxu0 %v366_v31  ;;  %17541 = vmatprep.mubr.msk.f32.mxu1 %vm18298_vm0, %v18296_v0  ;;  %v6821_v18 = vpop.permute.xlu0 %6820  ;;  %v18603_v31 = vsub.f32 %v1194_v21, %v18586_v1  ;;  %v2216_v21 = vand.u32 4294901760, %v18732_v28 }
  0xaa   : > { %672 = vmatprep.subr.mxu0 %v18448_v29  ;;  %17544 = vmatprep.subr.mxu1 %v18296_v0  ;;  %v18571_v15 = vsel %vm6826_vm7, %v6821_v18, %v18565_v17  ;;  %v1280_v29 = vand.u32 4294901760, %v18576_v22 }
  0xab   : > { %17542 = vmatmul.mubr.f32.vlgmr.msra.gmra.mrb[12].mxu1 %v18554_v13  ;;  %663 = vmatprep.mubr.f32.mxu0 %v18296_v0  ;;  %v1286_v35 = vand.u32 4294901760, %v18603_v31 }
  0xac   : > { %17545 = vmatpush3.msra.mxu1 %v1746_v14  ;;  %17546 = vmatprep.mubr.msk.f32.mxu1 %vm18298_vm0, %v18296_v0  ;;  %v17277_v14 = vld [vmem:[%s20164_s2 + $0x10] sm:$0xf] }
  0xad   : > { %17549 = vmatprep.subr.mxu1 %v18296_v0  ;;  %v6819_v25 = vpop.permute.xlu0 %6818  ;;  %v1287_v40 = vsub.f32 %v18603_v31, %v1286_v35 }
  0xae   : > { %v18589_v26 = vsel %vm6826_vm7, %v6819_v25, %v6821_v18  ;;  %v4012_v18 = vsel %vm273_vm3, %v18489_v54, 0  ;;  %v2217_v54 = vsub.f32 %v18732_v28, %v2216_v21 }
  0xaf   : > { %17547 = vmatmul.mubr.f32.vlgmr.msra.gmra.mrb[14].mxu1 %v18479_v50  ;;  %v1288_v43 = vand.u32 4294901760, %v1287_v40  ;;  %v17278_v40 = vld [vmem:[%s20164_s2 + $0x14] sm:$0xf] }
  0xb0   : > { %665 = vmatmul.mubr.f32.vlgmr.msra.gmra.mrb[0].mxu0 %v18422_v12  ;;  %17550 = vmatpush3.msra.mxu1 %v18505_v58  ;;  %v18677_v58 = vsub.f32 %v3067_v47, %v18664_v51 }
  0xb1   : > { %674 = vmatpush1.msra.mxu0 %v18434_v20  ;;  %17551 = vmatprep.mubr.msk.f32.mxu1 %vm18298_vm0, %v18296_v0  ;;  %v1281_v20 = vsub.f32 %v18576_v22, %v1280_v29 }
  0xb2   : > { %17554 = vmatprep.subr.mxu1 %v18296_v0  ;;  %737 = vmatprep.mubr.f32.mxu0 %v18296_v0  ;;  %v18688_v62 = vand.u32 4294901760, %v18677_v58 }
  0xb3   : > { %17552 = vmatmul.mubr.f32.vlgmr.msra.gmra.mrb[16].mxu1 %v18500_v56  ;;  %1201 = vmatprep.subr.mxu0 %v18551_v2  ;;  %v1282_v38 = vand.u32 4294901760, %v1281_v20 }
  0xb4   : > { %17555 = vmatpush3.msra.mxu1 %v18481_v52  ;;  %17556 = vmatprep.mubr.msk.f32.mxu1 %vm18298_vm0, %v18296_v0 }
  0xb5   : > { %17559 = vmatprep.subr.mxu1 %v18296_v0 }
  0xb7   : > { %17557 = vmatmul.mubr.f32.vlgmr.msra.gmra.mrb[18].mxu1 %v18518_v61 }
  0xb8   : > { %739 = vmatmul.mubr.f32.vlgmr.msra.gmra.mrb[0].mxu0 %v18422_v12  ;;  %17560 = vmatpush3.msra.mxu1 %v1744_v63  ;;  %v2206_v12 = vsub.f32 %v18610_v32, %v18623_v37 }
  0xb9   : > { %17561 = vmatprep.mubr.msk.f32.mxu1 %vm18298_vm0, %v18296_v0  ;;  %17564 = vmatprep.subr.mxu1 %v18296_v0 }
  0xba   : > { %1203 = vmatpush1.msra.mxu0 %v18586_v1  ;;  %1266 = vmatprep.mubr.f32.mxu0 %v18296_v0  ;;  %v18644_v44 = vand.u32 4294901760, %v2206_v12  ;;  %v4945_v12 = vsel %vm269_vm1, %v17278_v40, 0 }
  0xbb   : > { %17562 = vmatmul.mubr.f32.vlgmr.msra.gmra.mrb[20].mxu1 %v18479_v50  ;;  %1283 = vmatprep.subr.mxu0 %v1282_v38 }
  0xbc   : > { %17565 = vmatpush3.msra.mxu1 %v18481_v52  ;;  %17566 = vmatprep.mubr.msk.f32.mxu1 %vm18298_vm0, %v18296_v0  ;;  %v18667_v52 = vand.u32 4294901760, %v3073_v48 }
  0xbd   : > { %17569 = vmatprep.subr.mxu1 %v18296_v0 }
  0xbe   : > { %v18683_v59 = vsub.f32 %v3073_v48, %v18667_v52  ;;  %v3065_v48 = vsel %vm3063_vm9, %v18470_v41, %v18459_v36 }
  0xbf   : > { %17567 = vmatmul.mubr.f32.vlgmr.msra.gmra.mrb[22].mxu1 %v18479_v50 }
  0xc0   : > { %1272 = vmatmul.mubr.f32.vlgmr.msra.gmra.mrb[0].mxu0 %v18554_v13  ;;  %17570 = vmatpush3.msra.mxu1 %v18597_v30  ;;  %v3619_v63 = vand.u32 4294901760, %v18683_v59 }
  0xc1   : > { %17571 = vmatprep.mubr.msk.f32.mxu1 %vm18298_vm0, %v18296_v0  ;;  %17574 = vmatprep.subr.mxu1 %v18296_v0 }
  0xc2   : > { %1289 = vmatpush1.msra.mxu0 %v1288_v43  ;;  %1352 = vmatprep.mubr.f32.mxu0 %v18296_v0  ;;  %v3620_v33 = vsub.f32 %v18683_v59, %v3619_v63  ;;  %v18815_v43 = vand.u32 4294901760, %v4945_v12 }
  0xc3   : > { %17572 = vmatmul.mubr.f32.vlgmr.msra.gmra.mrb[24].mxu1 %v18644_v44  ;;  %1362 = vmatprep.subr.mxu0 %v18576_v22 }
  0xc4   : > { %17575 = vmatpush3.msra.mxu1 %v2682_v45  ;;  %17576 = vmatprep.mubr.msk.f32.mxu1 %vm18298_vm0, %v18296_v0  ;;  %v3621_v13 = vand.u32 4294901760, %v3620_v33  ;;  %v18828_v57 = vsub.f32 %v4945_v12, %v18815_v43  ;;  %v7753_v33 = vld [vmem:[%s18359_s26] sm:$0xff] }
  0xc5   : > { %17579 = vmatprep.subr.mxu1 %v18296_v0 }
  0xc6   : > { %v18839_v46 = vand.u32 4294901760, %v18828_v57 }
  0xc7   : > { %17577 = vmatmul.mubr.f32.vlgmr.msra.gmra.mrb[26].mxu1 %v18592_v27 }
  0xc8   : > { %1354 = vmatmul.mubr.f32.vlgmr.msra.gmra.mrb[0].mxu0 %v18479_v50  ;;  %17580 = vmatpush3.msra.mxu1 %v2679_v34 }
  0xc9   : > { %17581 = vmatprep.mubr.msk.f32.mxu1 %vm18298_vm0, %v18296_v0  ;;  %17584 = vmatprep.subr.mxu1 %v18296_v0 }
  0xca   : > { %1365 = vmatpush1.msra.mxu0 %v18603_v31  ;;  %1428 = vmatprep.mubr.f32.mxu0 %v18296_v0 }
  0xcb   : > { %17582 = vmatmul.mubr.f32.vlgmr.msra.gmra.mrb[28].mxu1 %v18610_v32  ;;  %1438 = vmatprep.subr.mxu0 %v18551_v2 }
  0xcc   : > { %17585 = vmatpush3.msra.mxu1 %v18597_v30  ;;  %17586 = vmatprep.mubr.msk.f32.mxu1 %vm18298_vm0, %v18296_v0 }
  0xcd   : > { %17589 = vmatprep.subr.mxu1 %v18296_v0 }
  0xcf   : > { %17587 = vmatmul.mubr.f32.vlgmr.msra.gmra.mrb[30].mxu1 %v18623_v37 }
  0xd0   : > { %1431 = vmatmul.mubr.f32.vlgmr.msra.gmra.mrb[0].mxu0 %v18500_v56  ;;  %17590 = vmatpush3.msra.mxu1 %v2680_v39  ;;  %v3145_v56 = vsub.f32 %v18677_v58, %v18688_v62 }
  0xd1   : > { %17591 = vmatprep.mubr.msk.f32.mxu1 %vm18298_vm0, %v18296_v0  ;;  %17594 = vmatprep.subr.mxu1 %v18296_v0 }
  0xd2   : > { %1440 = vmatpush1.msra.mxu0 %v18586_v1  ;;  %1503 = vmatprep.mubr.f32.mxu0 %v18296_v0  ;;  %v18717_v8 = vand.u32 4294901760, %v3145_v56  ;;  %v5882_v56 = vpop.permute.xlu1 %5881 }
  0xd3   : > { %17592 = vmatmul.mubr.f32.vlgmr.msra.gmra.mrb[32].mxu1 %v18592_v27  ;;  %1516 = vmatprep.subr.mxu0 %v1280_v29  ;;  %v2218_v29 = vand.u32 4294901760, %v2217_v54 }
  0xd4   : > { %17595 = vmatpush3.msra.mxu1 %v18597_v30  ;;  %17596 = vmatprep.mubr.msk.f32.mxu1 %vm18298_vm0, %v18296_v0 }
  0xd5   : > { %17599 = vmatprep.subr.mxu1 %v18296_v0 }
  0xd7   : > { %17597 = vmatmul.mubr.f32.vlgmr.msra.gmra.mrb[34].mxu1 %v18592_v27 }
  0xd8   : > { %1507 = vmatmul.mubr.f32.vlgmr.msra.gmra.mrb[0].mxu0 %v18518_v61  ;;  %17600 = vmatpush3.msra.mxu1 %v18667_v52  ;;  %v4006_v61 = vsel %vm269_vm1, %v17277_v14, 0 }
  0xd9   : > { %17601 = vmatprep.mubr.msk.f32.mxu1 %vm18298_vm0, %v18296_v0  ;;  %17604 = vmatprep.subr.mxu1 %v18296_v0  ;;  %v18746_v22 = vand.u32 4294901760, %v4006_v61 }
  0xda   : > { %1520 = vmatpush1.msra.mxu0 %v1286_v35  ;;  %1583 = vmatprep.mubr.f32.mxu0 %v18296_v0 }
  0xdb   : > { %17602 = vmatmul.mubr.f32.vlgmr.msra.gmra.mrb[36].mxu1 %v18717_v8  ;;  %1592 = vmatprep.subr.mxu0 %v18551_v2  ;;  %v18750_v2 = vand.u32 4294901760, %v4012_v18  ;;  %v18766_v24 = vsub.f32 %v4006_v61, %v18746_v22 }
  0xdc   : > { %17605 = vmatpush3.msra.mxu1 %v3621_v13  ;;  %17606 = vmatprep.mubr.msk.f32.mxu1 %vm18298_vm0, %v18296_v0  ;;  %v7759_v13 = vcombine.high %v7753_v33, %v7753_v33 }
  0xdd   : > { %17609 = vmatprep.subr.mxu1 %v18296_v0  ;;  %v4557_v25 = vsub.f32 %v4012_v18, %v18750_v2  ;;  %v18776_v30 = vand.u32 4294901760, %v18766_v24 }
  0xde   : > { %7763 = vrot.lane.b32.xlu1 %v7759_v13, %s18305_s10  ;;  %v18306_v13 = vmov 0  }
  0xdf   : > { %17607 = vmatmul.mubr.f32.vlgmr.msra.gmra.mrb[38].mxu1 %v18664_v51  ;;  %v4558_v31 = vand.u32 4294901760, %v4557_v25  ;;  %18282 = vset.pattern.permute.xlu1 %v18306_v13 }
  0xe0   : > { %1585 = vmatmul.mubr.f32.vlgmr.msra.gmra.mrb[0].mxu0 %v18479_v50  ;;  %17610 = vmatpush3.msra.mxu1 %v18683_v59 }
  0xe1   : > { %17611 = vmatprep.mubr.msk.f32.mxu1 %vm18298_vm0, %v18296_v0  ;;  %17614 = vmatprep.subr.mxu1 %v18296_v0  ;;  %v4559_v34 = vsub.f32 %v4557_v25, %v4558_v31 }
  0xe2   : > { %1594 = vmatpush1.msra.mxu0 %v18586_v1  ;;  %1657 = vmatprep.mubr.f32.mxu0 %v18296_v0  ;;  %v2222_v1 = vand.u32 4294901760, %v18753_v23 }
  0xe3   : > { %17612 = vmatmul.mubr.f32.vlgmr.msra.gmra.mrb[40].mxu1 %v18677_v58  ;;  %2137 = vmatprep.subr.mxu0 %v18711_v6  ;;  %v4560_v39 = vand.u32 4294901760, %v4559_v34  ;;  %v6825_v34 = vpop.permute.xlu0 %6824 }
  0xe4   : > { %17615 = vmatpush3.msra.mxu1 %v18667_v52  ;;  %17616 = vmatprep.mubr.msk.f32.mxu1 %vm18298_vm0, %v18296_v0  ;;  %v2223_v20 = vsub.f32 %v18753_v23, %v2222_v1  ;;  %v6829_v40 = vsel %vm6826_vm7, %v18565_v17, %v6825_v34 }
  0xe5   : > { %17619 = vmatprep.subr.mxu1 %v18296_v0  ;;  %7761 = vrot.lane.b32.xlu1 %v7753_v33, %s18305_s10  ;;  %v6837_v12 = vsel %vm273_vm3, %v6829_v40, 0  ;;  %v8696_v33 = vld [vmem:[%s20165_s3] sm:$0xf] }
  0xe6   : > { %v2224_v35 = vand.u32 4294901760, %v2223_v20  ;;  %v18978_v17 = vand.u32 4294901760, %v6837_v12  ;;  %18283 = vset.pattern.permute.xlu0 %v18306_v13 }
  0xe7   : > { %17617 = vmatmul.mubr.f32.vlgmr.msra.gmra.mrb[42].mxu1 %v18688_v62 }
  0xe8   : > { %1659 = vmatmul.mubr.f32.vlgmr.msra.gmra.mrb[0].mxu0 %v18479_v50  ;;  %17620 = vmatpush3.msra.mxu1 %v3619_v63  ;;  %v4084_v50 = vsub.f32 %v18766_v24, %v18776_v30  ;;  %v3064_v63 = vsel %vm3063_vm9, %v18475_v49, %v18470_v41  ;;  %v17279_v41 = vld [vmem:[%s20164_s2 + $0x18] sm:$0xf] }
  0xe9   : > { %17621 = vmatprep.mubr.msk.f32.mxu1 %vm18298_vm0, %v18296_v0  ;;  %2139 = vmatpush1.msra.mxu0 %v18739_v16  ;;  %v3069_v49 = vsel %vm273_vm3, %v3064_v63, 0 }
  0xea   : > { %17624 = vmatprep.subr.mxu1 %v18296_v0  ;;  %2202 = vmatprep.mubr.f32.mxu0 %v18296_v0  ;;  %v18795_v38 = vand.u32 4294901760, %v4084_v50  ;;  %v18895_v14 = vand.u32 4294901760, %v3069_v49 }
  0xeb   : > { %17622 = vmatmul.mubr.f32.vlgmr.msra.gmra.mrb[44].mxu1 %v18664_v51  ;;  %2219 = vmatprep.subr.mxu0 %v2218_v29 }
  0xec   : > { %17625 = vmatpush3.msra.mxu1 %v18667_v52  ;;  %17626 = vmatprep.mubr.msk.f32.mxu1 %vm18298_vm0, %v18296_v0  ;;  %v3071_v52 = vsel %vm273_vm3, %v3065_v48, 0  ;;  %v18909_v18 = vsub.f32 %v3069_v49, %v18895_v14  ;;  %v4008_v49 = vsel %vm273_vm3, %v18485_v53, 0 }
  0xed   : > { %17629 = vmatprep.subr.mxu1 %v18296_v0  ;;  %v18864_v59 = vand.u32 4294901760, %v3071_v52  ;;  %8699 = vperm.xlu1 %18282, %v8696_v33  }
  0xef   : > { %17627 = vmatmul.mubr.f32.vlgmr.msra.gmra.mrb[46].mxu1 %v18664_v51  ;;  %v18888_v7 = vsub.f32 %v3071_v52, %v18864_v59  ;;  %v4010_v52 = vsel %vm273_vm3, %v18495_v55, 0 }
  0xf0   : > { %2208 = vmatmul.mubr.f32.vlgmr.msra.gmra.mrb[0].mxu0 %v18644_v44  ;;  %17630 = vmatpush3.msra.mxu1 %v18750_v2  ;;  %v18818_v44 = vand.u32 4294901760, %v4951_v42  ;;  %v19024_v63 = vand.u32 4294901760, %v4010_v52 }
  0xf1   : > { %2225 = vmatpush1.msra.mxu0 %v2224_v35  ;;  %17631 = vmatprep.mubr.msk.f32.mxu1 %vm18298_vm0, %v18296_v0  ;;  %v3155_v19 = vand.u32 4294901760, %v18888_v7 }
  0xf2   : > { %2298 = vmatprep.subr.mxu0 %v18732_v28  ;;  %17634 = vmatprep.subr.mxu1 %v18296_v0  ;;  %v18834_v45 = vsub.f32 %v4951_v42, %v18818_v44 }
  0xf3   : > { %17632 = vmatmul.mubr.f32.vlgmr.msra.gmra.mrb[48].mxu1 %v18795_v38  ;;  %2288 = vmatprep.mubr.f32.mxu0 %v18296_v0 }
  0xf4   : > { %17635 = vmatpush3.msra.mxu1 %v4560_v39  ;;  %17636 = vmatprep.mubr.msk.f32.mxu1 %vm18298_vm0, %v18296_v0  ;;  %v5497_v47 = vand.u32 4294901760, %v18834_v45  ;;  %v17280_v39 = vld [vmem:[%s20164_s2 + $0x1c] sm:$0xf] }
  0xf5   : > { %17639 = vmatprep.subr.mxu1 %v18296_v0 }
  0xf6   : > { %v5498_v36 = vsub.f32 %v18834_v45, %v5497_v47 }
  0xf7   : > { %17637 = vmatmul.mubr.f32.vlgmr.msra.gmra.mrb[50].mxu1 %v18746_v22 }
  0xf8   : > { %2290 = vmatmul.mubr.f32.vlgmr.msra.gmra.mrb[0].mxu0 %v18592_v27  ;;  %17640 = vmatpush3.msra.mxu1 %v4557_v25  ;;  %v5499_v5 = vand.u32 4294901760, %v5498_v36 }
  0xf9   : > { %2301 = vmatpush1.msra.mxu0 %v18753_v23  ;;  %17641 = vmatprep.mubr.msk.f32.mxu1 %vm18298_vm0, %v18296_v0  ;;  %v3161_v23 = vand.u32 4294901760, %v18909_v18 }
  0xfa   : > { %2374 = vmatprep.subr.mxu0 %v18711_v6  ;;  %17644 = vmatprep.subr.mxu1 %v18296_v0 }
  0xfb   : > { %17642 = vmatmul.mubr.f32.vlgmr.msra.gmra.mrb[52].mxu1 %v18766_v24  ;;  %2364 = vmatprep.mubr.f32.mxu0 %v18296_v0  ;;  %v3162_v29 = vsub.f32 %v18909_v18, %v3161_v23 }
  0xfc   : > { %17645 = vmatpush3.msra.mxu1 %v18750_v2  ;;  %17646 = vmatprep.mubr.msk.f32.mxu1 %vm18298_vm0, %v18296_v0 }
  0xfd   : > { %17649 = vmatprep.subr.mxu1 %v18296_v0  ;;  %v3163_v20 = vand.u32 4294901760, %v3162_v29 }
  0xff   : > { %17647 = vmatmul.mubr.f32.vlgmr.msra.gmra.mrb[54].mxu1 %v18776_v30 }
 0x100   : > { %2367 = vmatmul.mubr.f32.vlgmr.msra.gmra.mrb[0].mxu0 %v18610_v32  ;;  %17650 = vmatpush3.msra.mxu1 %v4558_v31  ;;  %v5023_v32 = vsub.f32 %v18828_v57, %v18839_v46 }
 0x101   : > { %2376 = vmatpush1.msra.mxu0 %v18739_v16  ;;  %17651 = vmatprep.mubr.msk.f32.mxu1 %vm18298_vm0, %v18296_v0 }
 0x102   : > { %2452 = vmatprep.subr.mxu0 %v2216_v21  ;;  %17654 = vmatprep.subr.mxu1 %v18296_v0  ;;  %v18870_v3 = vand.u32 4294901760, %v5023_v32  ;;  %v3156_v21 = vsub.f32 %v18888_v7, %v3155_v19  ;;  %v19006_v32 = vpop.permute.xlu0 %7765 }
 0x103   : > { %17652 = vmatmul.mubr.f32.vlgmr.msra.gmra.mrb[56].mxu1 %v18746_v22  ;;  %2439 = vmatprep.mubr.f32.mxu0 %v18296_v0 }
 0x104   : > { %17655 = vmatpush3.msra.mxu1 %v18750_v2  ;;  %17656 = vmatprep.mubr.msk.f32.mxu1 %vm18298_vm0, %v18296_v0  ;;  %v3157_v54 = vand.u32 4294901760, %v3156_v21 }
 0x105   : > { %17659 = vmatprep.subr.mxu1 %v18296_v0 }
 0x107   : > { %17657 = vmatmul.mubr.f32.vlgmr.msra.gmra.mrb[58].mxu1 %v18746_v22 }
 0x108   : > { %2443 = vmatmul.mubr.f32.vlgmr.msra.gmra.mrb[0].mxu0 %v18623_v37  ;;  %17660 = vmatpush3.msra.mxu1 %v18818_v44  ;;  %v5886_v37 = vsel %vm5883_vm6, %v18545_v10, %v5882_v56 }
 0x109   : > { %2456 = vmatpush1.msra.mxu0 %v2222_v1  ;;  %17661 = vmatprep.mubr.msk.f32.mxu1 %vm18298_vm0, %v18296_v0  ;;  %v5894_v10 = vsel %vm273_vm3, %v5886_v37, 0  ;;  %v19045_v37 = vsub.f32 %v4010_v52, %v19024_v63 }
 0x10a   : > { %2528 = vmatprep.subr.mxu0 %v18711_v6  ;;  %17664 = vmatprep.subr.mxu1 %v18296_v0  ;;  %v5888_v6 = vsel %vm269_vm1, %v17279_v41, 0  ;;  %v18906_v61 = vand.u32 4294901760, %v5894_v10  ;;  %v17281_v41 = vld [vmem:[%s20164_s2 + $0x20] sm:$0xf] }
 0x10b   : > { %17662 = vmatmul.mubr.f32.vlgmr.msra.gmra.mrb[60].mxu1 %v18870_v3  ;;  %2519 = vmatprep.mubr.f32.mxu0 %v18296_v0  ;;  %v18902_v28 = vand.u32 4294901760, %v5888_v6  ;;  %v7774_v53 = vsel %vm269_vm1, %v17281_v41, 0 }
 0x10c   : > { %17665 = vmatpush3.msra.mxu1 %v5499_v5  ;;  %17666 = vmatprep.mubr.msk.f32.mxu1 %vm18298_vm0, %v18296_v0  ;;  %v7768_v5 = vpop.permute.xlu0 %7767 }
 0x10d   : > { %17669 = vmatprep.subr.mxu1 %v18296_v0  ;;  %v18922_v2 = vsub.f32 %v5888_v6, %v18902_v28  ;;  %v4094_v6 = vand.u32 4294901760, %v19045_v37 }
 0x10f   : > { %17667 = vmatmul.mubr.f32.vlgmr.msra.gmra.mrb[62].mxu1 %v18815_v43  ;;  %v18933_v25 = vand.u32 4294901760, %v18922_v2 }
 0x110   : > { %2521 = vmatmul.mubr.f32.vlgmr.msra.gmra.mrb[0].mxu0 %v18592_v27  ;;  %17670 = vmatpush3.msra.mxu1 %v18834_v45  ;;  %v18994_v45 = vsub.f32 %v6837_v12, %v18978_v17 }
 0x111   : > { %2530 = vmatpush1.msra.mxu0 %v18739_v16  ;;  %17671 = vmatprep.mubr.msk.f32.mxu1 %vm18298_vm0, %v18296_v0  ;;  %v6439_v16 = vsub.f32 %v5894_v10, %v18906_v61  ;;  %v19061_v10 = vand.u32 4294901760, %v7774_v53 }
 0x112   : > { %17674 = vmatprep.subr.mxu1 %v18296_v0  ;;  %2593 = vmatprep.mubr.f32.mxu0 %v18296_v0  ;;  %v7383_v48 = vand.u32 4294901760, %v18994_v45 }
 0x113   : > { %17672 = vmatmul.mubr.f32.vlgmr.msra.gmra.mrb[64].mxu1 %v18828_v57  ;;  %3076 = vmatprep.subr.mxu0 %v18864_v59  ;;  %v6440_v1 = vand.u32 4294901760, %v6439_v16  ;;  %v19081_v21 = vsub.f32 %v7774_v53, %v19061_v10 }
 0x114   : > { %17675 = vmatpush3.msra.mxu1 %v18818_v44  ;;  %17676 = vmatprep.mubr.msk.f32.mxu1 %vm18298_vm0, %v18296_v0  ;;  %v7384_v36 = vsub.f32 %v18994_v45, %v7383_v48 }
 0x115   : > { %17679 = vmatprep.subr.mxu1 %v18296_v0  ;;  %v6441_v31 = vsub.f32 %v6439_v16, %v6440_v1 }
 0x116   : > { %v7385_v55 = vand.u32 4294901760, %v7384_v36 }
 0x117   : > { %17677 = vmatmul.mubr.f32.vlgmr.msra.gmra.mrb[66].mxu1 %v18839_v46  ;;  %v6442_v35 = vand.u32 4294901760, %v6441_v31 }
 0x118   : > { %2595 = vmatmul.mubr.f32.vlgmr.msra.gmra.mrb[0].mxu0 %v18592_v27  ;;  %17680 = vmatpush3.msra.mxu1 %v5497_v47  ;;  %v5966_v27 = vsub.f32 %v18922_v2, %v18933_v25 }
 0x119   : > { %17681 = vmatprep.mubr.msk.f32.mxu1 %vm18298_vm0, %v18296_v0  ;;  %3078 = vmatpush1.msra.mxu0 %v18895_v14 }
 0x11a   : > { %17684 = vmatprep.subr.mxu1 %v18296_v0  ;;  %3141 = vmatprep.mubr.f32.mxu0 %v18296_v0  ;;  %v18954_v50 = vand.u32 4294901760, %v5966_v27 }
 0x11b   : > { %17682 = vmatmul.mubr.f32.vlgmr.msra.gmra.mrb[68].mxu1 %v18815_v43  ;;  %3158 = vmatprep.subr.mxu0 %v3157_v54  ;;  %v19091_v54 = vand.u32 4294901760, %v19081_v21 }
 0x11c   : > { %17685 = vmatpush3.msra.mxu1 %v18818_v44  ;;  %17686 = vmatprep.mubr.msk.f32.mxu1 %vm18298_vm0, %v18296_v0 }
 0x11d   : > { %17689 = vmatprep.subr.mxu1 %v18296_v0 }
 0x11f   : > { %17687 = vmatmul.mubr.f32.vlgmr.msra.gmra.mrb[70].mxu1 %v18815_v43 }
 0x120   : > { %3147 = vmatmul.mubr.f32.vlgmr.msra.gmra.mrb[0].mxu0 %v18717_v8  ;;  %17690 = vmatpush3.msra.mxu1 %v18906_v61  ;;  %v6831_v8 = vsel %vm269_vm1, %v17280_v39, 0  ;;  %v4949_v39 = vsel %vm273_vm3, %v18514_v60, 0 }
 0x121   : > { %3164 = vmatpush1.msra.mxu0 %v3163_v20  ;;  %17691 = vmatprep.mubr.msk.f32.mxu1 %vm18298_vm0, %v18296_v0  ;;  %v18975_v42 = vand.u32 4294901760, %v6831_v8 }
 0x122   : > { %3237 = vmatprep.subr.mxu0 %v18888_v7  ;;  %17694 = vmatprep.subr.mxu1 %v18296_v0 }
 0x123   : > { %17692 = vmatmul.mubr.f32.vlgmr.msra.gmra.mrb[72].mxu1 %v18954_v50  ;;  %3227 = vmatprep.mubr.f32.mxu0 %v18296_v0  ;;  %v18988_v44 = vsub.f32 %v6831_v8, %v18975_v42  ;;  %v4947_v8 = vsel %vm273_vm3, %v18527_v4, 0 }
 0x124   : > { %17695 = vmatpush3.msra.mxu1 %v6442_v35  ;;  %17696 = vmatprep.mubr.msk.f32.mxu1 %vm18298_vm0, %v18296_v0 }
 0x125   : > { %17699 = vmatprep.subr.mxu1 %v18296_v0  ;;  %v18999_v47 = vand.u32 4294901760, %v18988_v44 }
 0x127   : > { %17697 = vmatmul.mubr.f32.vlgmr.msra.gmra.mrb[74].mxu1 %v18902_v28 }
 0x128   : > { %3229 = vmatmul.mubr.f32.vlgmr.msra.gmra.mrb[0].mxu0 %v18664_v51  ;;  %17700 = vmatpush3.msra.mxu1 %v6439_v16 }
 0x129   : > { %3240 = vmatpush1.msra.mxu0 %v18909_v18  ;;  %17701 = vmatprep.mubr.msk.f32.mxu1 %vm18298_vm0, %v18296_v0  ;;  %v4095_v18 = vsub.f32 %v19045_v37, %v4094_v6 }
 0x12a   : > { %3313 = vmatprep.subr.mxu0 %v18864_v59  ;;  %17704 = vmatprep.subr.mxu1 %v18296_v0 }
 0x12b   : > { %17702 = vmatmul.mubr.f32.vlgmr.msra.gmra.mrb[76].mxu1 %v18922_v2  ;;  %3303 = vmatprep.mubr.f32.mxu0 %v18296_v0 }
 0x12c   : > { %17705 = vmatpush3.msra.mxu1 %v18906_v61  ;;  %17706 = vmatprep.mubr.msk.f32.mxu1 %vm18298_vm0, %v18296_v0 }
 0x12d   : > { %17709 = vmatprep.subr.mxu1 %v18296_v0 }
 0x12f   : > { %17707 = vmatmul.mubr.f32.vlgmr.msra.gmra.mrb[78].mxu1 %v18933_v25 }
 0x130   : > { %3306 = vmatmul.mubr.f32.vlgmr.msra.gmra.mrb[0].mxu0 %v18677_v58  ;;  %17710 = vmatpush3.msra.mxu1 %v6440_v1  ;;  %v6909_v58 = vsub.f32 %v18988_v44, %v18999_v47 }
 0x131   : > { %3315 = vmatpush1.msra.mxu0 %v18895_v14  ;;  %17711 = vmatprep.mubr.msk.f32.mxu1 %vm18298_vm0, %v18296_v0 }
 0x132   : > { %3391 = vmatprep.subr.mxu0 %v3155_v19  ;;  %17714 = vmatprep.subr.mxu1 %v18296_v0  ;;  %v19027_v56 = vand.u32 4294901760, %v6909_v58 }
 0x133   : > { %17712 = vmatmul.mubr.f32.vlgmr.msra.gmra.mrb[80].mxu1 %v18902_v28  ;;  %3378 = vmatprep.mubr.f32.mxu0 %v18296_v0 }
 0x134   : > { %17715 = vmatpush3.msra.mxu1 %v18906_v61  ;;  %17716 = vmatprep.mubr.msk.f32.mxu1 %vm18298_vm0, %v18296_v0 }
 0x135   : > { %17719 = vmatprep.subr.mxu1 %v18296_v0 }
 0x137   : > { %17717 = vmatmul.mubr.f32.vlgmr.msra.gmra.mrb[82].mxu1 %v18902_v28 }
 0x138   : > { %3382 = vmatmul.mubr.f32.vlgmr.msra.gmra.mrb[0].mxu0 %v18688_v62  ;;  %17720 = vmatpush3.msra.mxu1 %v18978_v17  ;;  %v7772_v62 = vsel %vm7769_vm10, %v19006_v32, %v7768_v5 }
 0x139   : > { %3395 = vmatpush1.msra.mxu0 %v3161_v23  ;;  %17721 = vmatprep.mubr.msk.f32.mxu1 %vm18298_vm0, %v18296_v0  ;;  %v7780_v7 = vsel %vm273_vm3, %v7772_v62, 0  ;;  %v4096_v23 = vand.u32 4294901760, %v4095_v18 }
 0x13a   : > { %3467 = vmatprep.subr.mxu0 %v18864_v59  ;;  %17724 = vmatprep.subr.mxu1 %v18296_v0  ;;  %v19055_v59 = vand.u32 4294901760, %v4008_v49  ;;  %v19065_v19 = vand.u32 4294901760, %v7780_v7 }
 0x13b   : > { %17722 = vmatmul.mubr.f32.vlgmr.msra.gmra.mrb[84].mxu1 %v19027_v56  ;;  %3458 = vmatprep.mubr.f32.mxu0 %v18296_v0 }
 0x13c   : > { %17725 = vmatpush3.msra.mxu1 %v7385_v55  ;;  %17726 = vmatprep.mubr.msk.f32.mxu1 %vm18298_vm0, %v18296_v0  ;;  %v19068_v61 = vsub.f32 %v4008_v49, %v19055_v59 }
 0x13d   : > { %17729 = vmatprep.subr.mxu1 %v18296_v0 }
 0x13e   : > { %v4100_v16 = vand.u32 4294901760, %v19068_v61 }
 0x13f   : > { %17727 = vmatmul.mubr.f32.vlgmr.msra.gmra.mrb[86].mxu1 %v18975_v42 }
 0x140   : > { %3460 = vmatmul.mubr.f32.vlgmr.msra.gmra.mrb[0].mxu0 %v18664_v51  ;;  %17730 = vmatpush3.msra.mxu1 %v18994_v45  ;;  %v4101_v29 = vsub.f32 %v19068_v61, %v4100_v16  ;;  %v19167_v45 = vand.u32 4294901760, %v4947_v8 }
 0x141   : > { %3469 = vmatpush1.msra.mxu0 %v18895_v14  ;;  %17731 = vmatprep.mubr.msk.f32.mxu1 %vm18298_vm0, %v18296_v0  ;;  %v8325_v14 = vsub.f32 %v7780_v7, %v19065_v19 }
 0x142   : > { %17734 = vmatprep.subr.mxu1 %v18296_v0  ;;  %3532 = vmatprep.mubr.f32.mxu0 %v18296_v0  ;;  %v4102_v31 = vand.u32 4294901760, %v4101_v29  ;;  %v5038_v36 = vsub.f32 %v4947_v8, %v19167_v45 }
 0x143   : > { %17732 = vmatmul.mubr.f32.vlgmr.msra.gmra.mrb[88].mxu1 %v18988_v44  ;;  %4015 = vmatprep.subr.mxu0 %v19024_v63  ;;  %v8326_v1 = vand.u32 4294901760, %v8325_v14 }
 0x144   : > { %17735 = vmatpush3.msra.mxu1 %v18978_v17  ;;  %17736 = vmatprep.mubr.msk.f32.mxu1 %vm18298_vm0, %v18296_v0  ;;  %v5039_v41 = vand.u32 4294901760, %v5038_v36 }
 0x145   : > { %17739 = vmatprep.subr.mxu1 %v18296_v0  ;;  %v8327_v27 = vsub.f32 %v8325_v14, %v8326_v1 }
 0x146   : > { %v5040_v53 = vsub.f32 %v5038_v36, %v5039_v41 }
 0x147   : > { %17737 = vmatmul.mubr.f32.vlgmr.msra.gmra.mrb[90].mxu1 %v18999_v47  ;;  %v8328_v34 = vand.u32 4294901760, %v8327_v27 }
 0x148   : > { %3534 = vmatmul.mubr.f32.vlgmr.msra.gmra.mrb[0].mxu0 %v18664_v51  ;;  %17740 = vmatpush3.msra.mxu1 %v7383_v48  ;;  %v7852_v51 = vsub.f32 %v19081_v21, %v19091_v54 }
 0x149   : > { %17741 = vmatprep.mubr.msk.f32.mxu1 %vm18298_vm0, %v18296_v0  ;;  %4017 = vmatpush1.msra.mxu0 %v19055_v59 }
 0x14a   : > { %17744 = vmatprep.subr.mxu1 %v18296_v0  ;;  %4080 = vmatprep.mubr.f32.mxu0 %v18296_v0  ;;  %v19112_v20 = vand.u32 4294901760, %v7852_v51 }
 0x14b   : > { %17742 = vmatmul.mubr.f32.vlgmr.msra.gmra.mrb[92].mxu1 %v18975_v42  ;;  %4097 = vmatprep.subr.mxu0 %v4096_v23 }
 0x14c   : > { %17745 = vmatpush3.msra.mxu1 %v18978_v17  ;;  %17746 = vmatprep.mubr.msk.f32.mxu1 %vm18298_vm0, %v18296_v0 }
 0x14d   : > { %17749 = vmatprep.subr.mxu1 %v18296_v0 }
 0x14f   : > { %17747 = vmatmul.mubr.f32.vlgmr.msra.gmra.mrb[94].mxu1 %v18975_v42 }
 0x150   : > { %4086 = vmatmul.mubr.f32.vlgmr.msra.gmra.mrb[0].mxu0 %v18795_v38  ;;  %17750 = vmatpush3.msra.mxu1 %v19065_v19 }
 0x151   : > { %4103 = vmatpush1.msra.mxu0 %v4102_v31  ;;  %17751 = vmatprep.mubr.msk.f32.mxu1 %vm18298_vm0, %v18296_v0 }
 0x152   : > { %4176 = vmatprep.subr.mxu0 %v19045_v37  ;;  %17754 = vmatprep.subr.mxu1 %v18296_v0 }
 0x153   : > { %17752 = vmatmul.mubr.f32.vlgmr.msra.gmra.mrb[96].mxu1 %v19112_v20  ;;  %4166 = vmatprep.mubr.f32.mxu0 %v18296_v0 }
 0x154   : > { %17755 = vmatpush3.msra.mxu1 %v8328_v34  ;;  %17756 = vmatprep.mubr.msk.f32.mxu1 %vm18298_vm0, %v18296_v0 }
 0x155   : > { %17759 = vmatprep.subr.mxu1 %v18296_v0 }
 0x157   : > { %17757 = vmatmul.mubr.f32.vlgmr.msra.gmra.mrb[98].mxu1 %v19061_v10 }
 0x158   : > { %4168 = vmatmul.mubr.f32.vlgmr.msra.gmra.mrb[0].mxu0 %v18746_v22  ;;  %17760 = vmatpush3.msra.mxu1 %v8325_v14 }
 0x159   : > { %4179 = vmatpush1.msra.mxu0 %v19068_v61  ;;  %17761 = vmatprep.mubr.msk.f32.mxu1 %vm18298_vm0, %v18296_v0 }
 0x15a   : > { %4252 = vmatprep.subr.mxu0 %v19024_v63  ;;  %17764 = vmatprep.subr.mxu1 %v18296_v0 }
 0x15b   : > { %17762 = vmatmul.mubr.f32.vlgmr.msra.gmra.mrb[100].mxu1 %v19081_v21  ;;  %4242 = vmatprep.mubr.f32.mxu0 %v18296_v0 }
 0x15c   : > { %17765 = vmatpush3.msra.mxu1 %v19065_v19  ;;  %17766 = vmatprep.mubr.msk.f32.mxu1 %vm18298_vm0, %v18296_v0 }
 0x15d   : > { %17769 = vmatprep.subr.mxu1 %v18296_v0 }
 0x15f   : > { %17767 = vmatmul.mubr.f32.vlgmr.msra.gmra.mrb[102].mxu1 %v19091_v54 }
 0x160   : > { %4245 = vmatmul.mubr.f32.vlgmr.msra.gmra.mrb[0].mxu0 %v18766_v24  ;;  %17770 = vmatpush3.msra.mxu1 %v8326_v1  ;;  %v19154_v24 = vand.u32 4294901760, %v4949_v39 }
 0x161   : > { %4254 = vmatpush1.msra.mxu0 %v19055_v59  ;;  %17771 = vmatprep.mubr.msk.f32.mxu1 %vm18298_vm0, %v18296_v0  ;;  %v817_v38 = vpop.f32.mrb[0].mxu1 }
 0x162   : > { %4330 = vmatprep.subr.mxu0 %v4094_v6  ;;  %17774 = vmatprep.subr.mxu1 %v18296_v0  ;;  %v17513_v35 = vpop.f32.mrb[1].mxu1  ;;  %v5032_v40 = vsub.f32 %v4949_v39, %v19154_v24  ;;  %v5041_v6 = vand.u32 4294901760, %v5040_v53  ;;  %v5892_v39 = vsel %vm273_vm3, %v18549_v11, 0 }
 0x163   : > { %17772 = vmatmul.mubr.f32.vlgmr.msra.gmra.mrb[104].mxu1 %v19061_v10  ;;  %4317 = vmatprep.mubr.f32.mxu0 %v18296_v0  ;;  %v19187_v8 = vand.u32 4294901760, %v5892_v39 }
 0x164   : > { %17775 = vmatpush3.msra.mxu1 %v19065_v19  ;;  %17776 = vmatprep.mubr.msk.f32.mxu1 %vm18298_vm0, %v18296_v0 }
 0x165   : > { %17779 = vmatprep.subr.mxu1 %v18296_v0 }
 0x167   : > { %17777 = vmatmul.mubr.f32.vlgmr.msra.gmra.mrb[106].mxu1 %v19061_v10 }
 0x168   : > { %4321 = vmatmul.mubr.f32.vlgmr.msra.gmra.mrb[0].mxu0 %v18776_v30  ;;  %17781 = vmatprep.mubr.msk.f32.mxu1 %vm18298_vm0, %v18296_v0  ;;  %v5033_v30 = vand.u32 4294901760, %v5032_v40 }
 0x169   : > { %4334 = vmatpush1.msra.mxu0 %v4100_v16  ;;  %4397 = vmatprep.mubr.f32.mxu0 %v18296_v0  ;;  %v893_v60 = vpop.f32.mrb[2].mxu1 }
 0x16a   : > { %4406 = vmatprep.subr.mxu0 %v19024_v63  ;;  %v894_v12 = vadd.f32 %v893_v60, %v817_v38  ;;  %v17518_v17 = vpop.f32.mrb[3].mxu1  ;;  %v5034_v4 = vsub.f32 %v5032_v40, %v5033_v30 }
 0x16c   : > { %v5035_v49 = vand.u32 4294901760, %v5034_v4 }
 0x16e   : > { %v967_v48 = vpop.f32.mrb[4].mxu1 }
 0x16f   : > { %v968_v58 = vadd.f32 %v967_v48, %v894_v12  ;;  %v17523_v52 = vpop.f32.mrb[5].mxu1 }
 0x170   : > { %4399 = vmatmul.mubr.f32.vlgmr.msra.gmra.mrb[0].mxu0 %v18746_v22 }
 0x171   : > { %4408 = vmatpush1.msra.mxu0 %v19055_v59  ;;  %4471 = vmatprep.mubr.f32.mxu0 %v18296_v0 }
 0x172   : > { %4954 = vmatprep.subr.mxu0 %v19154_v24  ;;  %v1041_v63 = vpop.f32.mrb[6].mxu1 }
 0x173   : > { %v1042_v5 = vadd.f32 %v1041_v63, %v968_v58  ;;  %v17528_v55 = vpop.f32.mrb[7].mxu1 }
 0x176   : > { %v1115_v62 = vpop.f32.mrb[8].mxu1 }
 0x177   : > { %v1116_v37 = vadd.f32 %v1115_v62, %v1042_v5  ;;  %v17533_v33 = vpop.f32.mrb[9].mxu1 }
 0x178   : > { %4473 = vmatmul.mubr.f32.vlgmr.msra.gmra.mrb[0].mxu0 %v18746_v22 }
 0x179   : > { %4956 = vmatpush1.msra.mxu0 %v19167_v45  ;;  %5019 = vmatprep.mubr.f32.mxu0 %v18296_v0 }
 0x17a   : > { %5036 = vmatprep.subr.mxu0 %v5035_v49  ;;  %v1187_v59 = vpop.f32.mrb[10].mxu1 }
 0x17b   : > { %v1188_v7 = vadd.f32 %v1187_v59, %v1116_v37  ;;  %v17538_v13 = vpop.f32.mrb[11].mxu1 }
 0x17e   : > { %v1737_v19 = vpop.f32.mrb[12].mxu1 }
 0x17f   : > { %v1738_v61 = vadd.f32 %v1737_v19, %v1188_v7  ;;  %v17543_v18 = vpop.f32.mrb[13].mxu1 }
 0x180   : > { %5025 = vmatmul.mubr.f32.vlgmr.msra.gmra.mrb[0].mxu0 %v18870_v3 }
 0x181   : > { %5042 = vmatpush1.msra.mxu0 %v5041_v6  ;;  %5105 = vmatprep.mubr.f32.mxu0 %v18296_v0 }
 0x182   : > { %5115 = vmatprep.subr.mxu0 %v5032_v40  ;;  %v1813_v22 = vpop.f32.mrb[14].mxu1 }
 0x183   : > { %v1814_v14 = vadd.f32 %v1813_v22, %v1738_v61  ;;  %v17548_v16 = vpop.f32.mrb[15].mxu1 }
 0x186   : > { %v1887_v23 = vpop.f32.mrb[16].mxu1 }
 0x187   : > { %v1888_v1 = vadd.f32 %v1887_v23, %v1814_v14  ;;  %v17553_v29 = vpop.f32.mrb[17].mxu1 }
 0x188   : > { %5107 = vmatmul.mubr.f32.vlgmr.msra.gmra.mrb[0].mxu0 %v18815_v43 }
 0x189   : > { %5118 = vmatpush1.msra.mxu0 %v5038_v36  ;;  %5181 = vmatprep.mubr.f32.mxu0 %v18296_v0 }
 0x18a   : > { %5191 = vmatprep.subr.mxu0 %v19154_v24  ;;  %v1961_v51 = vpop.f32.mrb[18].mxu1 }
 0x18b   : > { %v1962_v27 = vadd.f32 %v1961_v51, %v1888_v1  ;;  %v17558_v3 = vpop.f32.mrb[19].mxu1 }
 0x18e   : > { %v2035_v31 = vpop.f32.mrb[20].mxu1 }
 0x18f   : > { %v2036_v34 = vadd.f32 %v2035_v31, %v1962_v27  ;;  %v17563_v38 = vpop.f32.mrb[21].mxu1 }
 0x190   : > { %5184 = vmatmul.mubr.f32.vlgmr.msra.gmra.mrb[0].mxu0 %v18828_v57  ;;  %v5890_v57 = vsel %vm273_vm3, %v18542_v9, 0  ;;  %v6835_v38 = vsel %vm273_vm3, %v18571_v15, 0 }
 0x191   : > { %5193 = vmatpush1.msra.mxu0 %v19167_v45  ;;  %5256 = vmatprep.mubr.f32.mxu0 %v18296_v0  ;;  %v19195_v52 = vand.u32 4294901760, %v5890_v57 }
 0x192   : > { %5269 = vmatprep.subr.mxu0 %v5033_v30  ;;  %v2107_v35 = vpop.f32.mrb[22].mxu1  ;;  %v5975_v30 = vsub.f32 %v5892_v39, %v19187_v8 }
 0x193   : > { %v2108_v60 = vadd.f32 %v2107_v35, %v2036_v34  ;;  %v17568_v40 = vpop.f32.mrb[23].mxu1 }
 0x194   : > { %v5976_v36 = vand.u32 4294901760, %v5975_v30  ;;  %v19215_v40 = vand.u32 4294901760, %v6835_v38 }
 0x196   : > { %v2673_v12 = vpop.f32.mrb[24].mxu1  ;;  %v5977_v9 = vsub.f32 %v5975_v30, %v5976_v36 }
 0x197   : > { %v17573_v17 = vpop.f32.mrb[25].mxu1 }
 0x198   : > { %5260 = vmatmul.mubr.f32.vlgmr.msra.gmra.mrb[0].mxu0 %v18839_v46  ;;  %v5981_v46 = vsub.f32 %v5890_v57, %v19195_v52  ;;  %v5978_v62 = vand.u32 4294901760, %v5977_v9  ;;  %v6833_v57 = vsel %vm273_vm3, %v18589_v26, 0 }
 0x199   : > { %5273 = vmatpush1.msra.mxu0 %v5039_v41  ;;  %5336 = vmatprep.mubr.f32.mxu0 %v18296_v0 }
 0x19a   : > { %5345 = vmatprep.subr.mxu0 %v19154_v24  ;;  %v2749_v48 = vpop.f32.mrb[26].mxu1  ;;  %v5982_v49 = vand.u32 4294901760, %v5981_v46 }
 0x19b   : > { %v2750_v11 = vadd.f32 %v2749_v48, %v2673_v12  ;;  %v17578_v58 = vpop.f32.mrb[27].mxu1 }
 0x19e   : > { %v2823_v4 = vpop.f32.mrb[28].mxu1 }
 0x19f   : > { %v2824_v63 = vadd.f32 %v2823_v4, %v2750_v11  ;;  %v17583_v5 = vpop.f32.mrb[29].mxu1  ;;  %v19223_v11 = vand.u32 4294901760, %v6833_v57 }
 0x1a0   : > { %5338 = vmatmul.mubr.f32.vlgmr.msra.gmra.mrb[0].mxu0 %v18815_v43 }
 0x1a1   : > { %5347 = vmatpush1.msra.mxu0 %v19167_v45  ;;  %5410 = vmatprep.mubr.f32.mxu0 %v18296_v0  ;;  %v5983_v45 = vsub.f32 %v5981_v46, %v5982_v49 }
 0x1a2   : > { %5897 = vmatprep.subr.mxu0 %v19187_v8  ;;  %v2897_v24 = vpop.f32.mrb[30].mxu1 }
 0x1a3   : > { %v2898_v55 = vadd.f32 %v2897_v24, %v2824_v63  ;;  %v17588_v41 = vpop.f32.mrb[31].mxu1  ;;  %v5984_v6 = vand.u32 4294901760, %v5983_v45 }
 0x1a6   : > { %v2971_v37 = vpop.f32.mrb[32].mxu1 }
 0x1a7   : > { %v2972_v33 = vadd.f32 %v2971_v37, %v2898_v55  ;;  %v17593_v53 = vpop.f32.mrb[33].mxu1 }
 0x1a8   : > { %5412 = vmatmul.mubr.f32.vlgmr.msra.gmra.mrb[0].mxu0 %v18815_v43 }
 0x1a9   : > { %5899 = vmatpush1.msra.mxu0 %v19195_v52  ;;  %5962 = vmatprep.mubr.f32.mxu0 %v18296_v0 }
 0x1aa   : > { %5979 = vmatprep.subr.mxu0 %v5978_v62  ;;  %v3043_v59 = vpop.f32.mrb[34].mxu1 }
 0x1ab   : > { %v3044_v7 = vadd.f32 %v3043_v59, %v2972_v33  ;;  %v17598_v13 = vpop.f32.mrb[35].mxu1 }
 0x1ad   : > { %v3049_v19 = vadd.f32 %v3044_v7, %v2108_v60 }
 0x1ae   : > { %v3612_v61 = vpop.f32.mrb[36].mxu1 }
 0x1af   : > { %v17603_v18 = vpop.f32.mrb[37].mxu1 }
 0x1b0   : > { %5968 = vmatmul.mubr.f32.vlgmr.msra.gmra.mrb[0].mxu0 %v18954_v50 }
 0x1b1   : > { %5985 = vmatpush1.msra.mxu0 %v5984_v6  ;;  %6048 = vmatprep.mubr.f32.mxu0 %v18296_v0 }
 0x1b2   : > { %6058 = vmatprep.subr.mxu0 %v5975_v30  ;;  %v3688_v43 = vpop.f32.mrb[38].mxu1 }
 0x1b3   : > { %v3689_v22 = vadd.f32 %v3688_v43, %v3612_v61  ;;  %v17608_v14 = vpop.f32.mrb[39].mxu1 }
 0x1b4   : > { %v7764_v14 = vpop.permute.xlu1 %7763 }
 0x1b6   : > { %v3762_v16 = vpop.f32.mrb[40].mxu1 }
 0x1b7   : > { %v3763_v23 = vadd.f32 %v3762_v16, %v3689_v22  ;;  %v17613_v1 = vpop.f32.mrb[41].mxu1 }
 0x1b8   : > { %6050 = vmatmul.mubr.f32.vlgmr.msra.gmra.mrb[0].mxu0 %v18902_v28 }
 0x1b9   : > { %6061 = vmatpush1.msra.mxu0 %v5981_v46  ;;  %6124 = vmatprep.mubr.f32.mxu0 %v18296_v0 }
 0x1ba   : > { %6134 = vmatprep.subr.mxu0 %v19187_v8  ;;  %v3836_v29 = vpop.f32.mrb[42].mxu1 }
 0x1bb   : > { %v3837_v51 = vadd.f32 %v3836_v29, %v3763_v23  ;;  %v17618_v50 = vpop.f32.mrb[43].mxu1  ;;  %v7771_v29 = vsel %vm7769_vm10, %v7764_v14, %v19006_v32 }
 0x1bc   : > { %v7778_v50 = vsel %vm273_vm3, %v7771_v29, 0 }
 0x1be   : > { %v3910_v27 = vpop.f32.mrb[44].mxu1 }
 0x1bf   : > { %v3911_v3 = vadd.f32 %v3910_v27, %v3837_v51  ;;  %v17623_v31 = vpop.f32.mrb[45].mxu1 }
 0x1c0   : > { %6127 = vmatmul.mubr.f32.vlgmr.msra.gmra.mrb[0].mxu0 %v18922_v2  ;;  %v6918_v2 = vsub.f32 %v6835_v38, %v19215_v40  ;;  %v7762_v31 = vpop.permute.xlu1 %7761  ;;  %v19244_v38 = vand.u32 4294901760, %v7778_v50 }
 0x1c1   : > { %6136 = vmatpush1.msra.mxu0 %v19195_v52  ;;  %6199 = vmatprep.mubr.f32.mxu0 %v18296_v0 }
 0x1c2   : > { %6212 = vmatprep.subr.mxu0 %v5976_v36  ;;  %v3982_v34 = vpop.f32.mrb[46].mxu1  ;;  %v6919_v58 = vand.u32 4294901760, %v6918_v2  ;;  %v7861_v32 = vsub.f32 %v7778_v50, %v19244_v38 }
 0x1c3   : > { %v3983_v35 = vadd.f32 %v3982_v34, %v3911_v3  ;;  %v17628_v39 = vpop.f32.mrb[47].mxu1 }
 0x1c4   : > { %v6920_v26 = vsub.f32 %v6918_v2, %v6919_v58 }
 0x1c5   : > { %v3988_v60 = vadd.f32 %v3983_v35, %v3049_v19 }
 0x1c6   : > { %v4551_v12 = vpop.f32.mrb[48].mxu1  ;;  %v6921_v24 = vand.u32 4294901760, %v6920_v26 }
 0x1c7   : > { %v17633_v17 = vpop.f32.mrb[49].mxu1 }
 0x1c8   : > { %6203 = vmatmul.mubr.f32.vlgmr.msra.gmra.mrb[0].mxu0 %v18933_v25  ;;  %v6924_v25 = vsub.f32 %v6833_v57, %v19223_v11 }
 0x1c9   : > { %6216 = vmatpush1.msra.mxu0 %v5982_v49  ;;  %6279 = vmatprep.mubr.f32.mxu0 %v18296_v0 }
 0x1ca   : > { %6288 = vmatprep.subr.mxu0 %v19187_v8  ;;  %v4627_v15 = vpop.f32.mrb[50].mxu1  ;;  %v6925_v9 = vand.u32 4294901760, %v6924_v25 }
 0x1cb   : > { %v4628_v30 = vadd.f32 %v4627_v15, %v4551_v12  ;;  %v17638_v48 = vpop.f32.mrb[51].mxu1  ;;  %v7862_v15 = vand.u32 4294901760, %v7861_v32 }
 0x1ce   : > { %v4701_v36 = vpop.f32.mrb[52].mxu1 }
 0x1cf   : > { %v4702_v4 = vadd.f32 %v4701_v36, %v4628_v30  ;;  %v17643_v63 = vpop.f32.mrb[53].mxu1 }
 0x1d0   : > { %6281 = vmatmul.mubr.f32.vlgmr.msra.gmra.mrb[0].mxu0 %v18902_v28 }
 0x1d1   : > { %6290 = vmatpush1.msra.mxu0 %v19195_v52  ;;  %6353 = vmatprep.mubr.f32.mxu0 %v18296_v0  ;;  %v6926_v52 = vsub.f32 %v6924_v25, %v6925_v9 }
 0x1d2   : > { %6840 = vmatprep.subr.mxu0 %v19215_v40  ;;  %v4775_v8 = vpop.f32.mrb[54].mxu1 }
 0x1d3   : > { %v4776_v5 = vadd.f32 %v4775_v8, %v4702_v4  ;;  %v17648_v46 = vpop.f32.mrb[55].mxu1  ;;  %v6927_v53 = vand.u32 4294901760, %v6926_v52 }
 0x1d6   : > { %v4849_v55 = vpop.f32.mrb[56].mxu1 }
 0x1d7   : > { %v4850_v41 = vadd.f32 %v4849_v55, %v4776_v5  ;;  %v17653_v49 = vpop.f32.mrb[57].mxu1 }
 0x1d8   : > { %6355 = vmatmul.mubr.f32.vlgmr.msra.gmra.mrb[0].mxu0 %v18902_v28 }
 0x1d9   : > { %6842 = vmatpush1.msra.mxu0 %v19223_v11  ;;  %6905 = vmatprep.mubr.f32.mxu0 %v18296_v0 }
 0x1da   : > { %6922 = vmatprep.subr.mxu0 %v6921_v24  ;;  %v4921_v62 = vpop.f32.mrb[58].mxu1 }
 0x1db   : > { %v4922_v37 = vadd.f32 %v4921_v62, %v4850_v41  ;;  %v17658_v33 = vpop.f32.mrb[59].mxu1 }
 0x1dd   : > { %v4927_v45 = vadd.f32 %v4922_v37, %v3988_v60 }
 0x1de   : > { %v5490_v59 = vpop.f32.mrb[60].mxu1 }
 0x1df   : > { %v17663_v7 = vpop.f32.mrb[61].mxu1 }
 0x1e0   : > { %6911 = vmatmul.mubr.f32.vlgmr.msra.gmra.mrb[0].mxu0 %v19027_v56 }
 0x1e1   : > { %6928 = vmatpush1.msra.mxu0 %v6927_v53  ;;  %6991 = vmatprep.mubr.f32.mxu0 %v18296_v0 }
 0x1e2   : > { %7001 = vmatprep.subr.mxu0 %v6918_v2  ;;  %v5566_v28 = vpop.f32.mrb[62].mxu1 }
 0x1e3   : > { %v5567_v13 = vadd.f32 %v5566_v28, %v5490_v59  ;;  %v17668_v6 = vpop.f32.mrb[63].mxu1 }
 0x1e6   : > { %v5640_v19 = vpop.f32.mrb[64].mxu1 }
 0x1e7   : > { %v5641_v61 = vadd.f32 %v5640_v19, %v5567_v13  ;;  %v17673_v18 = vpop.f32.mrb[65].mxu1 }
 0x1e8   : > { %6993 = vmatmul.mubr.f32.vlgmr.msra.gmra.mrb[0].mxu0 %v18975_v42 }
 0x1e9   : > { %7004 = vmatpush1.msra.mxu0 %v6924_v25  ;;  %7067 = vmatprep.mubr.f32.mxu0 %v18296_v0 }
 0x1ea   : > { %7077 = vmatprep.subr.mxu0 %v19215_v40  ;;  %v5714_v43 = vpop.f32.mrb[66].mxu1 }
 0x1eb   : > { %v5715_v22 = vadd.f32 %v5714_v43, %v5641_v61  ;;  %v17678_v56 = vpop.f32.mrb[67].mxu1 }
 0x1ee   : > { %v5788_v16 = vpop.f32.mrb[68].mxu1 }
 0x1ef   : > { %v5789_v23 = vadd.f32 %v5788_v16, %v5715_v22  ;;  %v17683_v1 = vpop.f32.mrb[69].mxu1 }
 0x1f0   : > { %7070 = vmatmul.mubr.f32.vlgmr.msra.gmra.mrb[0].mxu0 %v18988_v44  ;;  %v7770_v44 = vsel %vm7769_vm10, %v7762_v31, %v7764_v14 }
 0x1f1   : > { %7079 = vmatpush1.msra.mxu0 %v19223_v11  ;;  %7142 = vmatprep.mubr.f32.mxu0 %v18296_v0  ;;  %v7776_v60 = vsel %vm273_vm3, %v7770_v44, 0 }
 0x1f2   : > { %7155 = vmatprep.subr.mxu0 %v6919_v58  ;;  %v5860_v51 = vpop.f32.mrb[70].mxu1  ;;  %v19252_v57 = vand.u32 4294901760, %v7776_v60 }
 0x1f3   : > { %v5861_v27 = vadd.f32 %v5860_v51, %v5789_v23  ;;  %v17688_v3 = vpop.f32.mrb[71].mxu1 }
 0x1f4   : > { %v8716_v3 = vlaneseq }
 0x1f5   : > { %v5866_v34 = vadd.f32 %v5861_v27, %v4927_v45 }
 0x1f6   : > { %v6433_v35 = vpop.f32.mrb[72].mxu1 }
 0x1f7   : > { %v17693_v39 = vpop.f32.mrb[73].mxu1 }
 0x1f8   : > { %7146 = vmatmul.mubr.f32.vlgmr.msra.gmra.mrb[0].mxu0 %v18999_v47  ;;  %v7867_v47 = vsub.f32 %v7776_v60, %v19252_v57 }
 0x1f9   : > { %7159 = vmatpush1.msra.mxu0 %v6925_v9  ;;  %7222 = vmatprep.mubr.f32.mxu0 %v18296_v0 }
 0x1fa   : > { %7231 = vmatprep.subr.mxu0 %v19215_v40  ;;  %v6509_v12 = vpop.f32.mrb[74].mxu1  ;;  %v7863_v40 = vsub.f32 %v7861_v32, %v7862_v15  ;;  %v7868_v25 = vand.u32 4294901760, %v7867_v47 }
 0x1fb   : > { %v6510_v17 = vadd.f32 %v6509_v12, %v6433_v35  ;;  %v17698_v2 = vpop.f32.mrb[75].mxu1  ;;  %v19281_v12 = vpop.permute.xlu1 %8699 }
 0x1fc   : > { %v7864_v26 = vand.u32 4294901760, %v7863_v40  ;;  %v19286_v2 = vld [vmem:[%s20163_s1] sm:$0x7] }
 0x1fe   : > { %v6583_v30 = vpop.f32.mrb[76].mxu1 }
 0x1ff   : > { %v6584_v48 = vadd.f32 %v6583_v30, %v6510_v17  ;;  %v17703_v58 = vpop.f32.mrb[77].mxu1 }
 0x200   : > { %7224 = vmatmul.mubr.f32.vlgmr.msra.gmra.mrb[0].mxu0 %v18975_v42 }
 0x201   : > { %7233 = vmatpush1.msra.mxu0 %v19223_v11  ;;  %7296 = vmatprep.mubr.f32.mxu0 %v18296_v0  ;;  %v7869_v11 = vsub.f32 %v7867_v47, %v7868_v25 }
 0x202   : > { %7783 = vmatprep.subr.mxu0 %v19244_v38  ;;  %v6657_v36 = vpop.f32.mrb[78].mxu1 }
 0x203   : > { %v6658_v4 = vadd.f32 %v6657_v36, %v6584_v48  ;;  %v17708_v63 = vpop.f32.mrb[79].mxu1  ;;  %v7870_v41 = vand.u32 4294901760, %v7869_v11 }
 0x206   : > { %v6731_v8 = vpop.f32.mrb[80].mxu1 }
 0x207   : > { %v6732_v5 = vadd.f32 %v6731_v8, %v6658_v4  ;;  %v17713_v46 = vpop.f32.mrb[81].mxu1 }
 0x208   : > { %7298 = vmatmul.mubr.f32.vlgmr.msra.gmra.mrb[0].mxu0 %v18975_v42 }
 0x209   : > { %7785 = vmatpush1.msra.mxu0 %v19252_v57  ;;  %7848 = vmatprep.mubr.f32.mxu0 %v18296_v0 }
 0x20a   : > { %7865 = vmatprep.subr.mxu0 %v7864_v26  ;;  %v6803_v9 = vpop.f32.mrb[82].mxu1 }
 0x20b   : > { %v6804_v24 = vadd.f32 %v6803_v9, %v6732_v5  ;;  %v17718_v55 = vpop.f32.mrb[83].mxu1 }
 0x20d   : > { %v6809_v49 = vadd.f32 %v6804_v24, %v5866_v34  ;;  %v8743_v24 = vld [vmem:[%s20166_s4] sm:$0xf] }
 0x20e   : > { %v7376_v52 = vpop.f32.mrb[84].mxu1 }
 0x20f   : > { %v17723_v62 = vpop.f32.mrb[85].mxu1 }
 0x210   : > { %7854 = vmatmul.mubr.f32.vlgmr.msra.gmra.mrb[0].mxu0 %v19112_v20 }
 0x211   : > { %7871 = vmatpush1.msra.mxu0 %v7870_v41  ;;  %7934 = vmatprep.mubr.f32.mxu0 %v18296_v0 }
 0x212   : > { %7944 = vmatprep.subr.mxu0 %v7861_v32  ;;  %v7452_v42 = vpop.f32.mrb[86].mxu1 }
 0x213   : > { %v7453_v37 = vadd.f32 %v7452_v42, %v7376_v52  ;;  %v17728_v33 = vpop.f32.mrb[87].mxu1 }
 0x216   : > { %v7526_v53 = vpop.f32.mrb[88].mxu1 }
 0x217   : > { %v7527_v45 = vadd.f32 %v7526_v53, %v7453_v37  ;;  %v17733_v59 = vpop.f32.mrb[89].mxu1 }
 0x218   : > { %7936 = vmatmul.mubr.f32.vlgmr.msra.gmra.mrb[0].mxu0 %v19061_v10 }
 0x219   : > { %7947 = vmatpush1.msra.mxu0 %v7867_v47  ;;  %8010 = vmatprep.mubr.f32.mxu0 %v18296_v0  ;;  %v17282_v47 = vld [vmem:[%s20166_s4 + $0x4] sm:$0xf] }
 0x21a   : > { %8020 = vmatprep.subr.mxu0 %v19244_v38  ;;  %v7600_v7 = vpop.f32.mrb[90].mxu1  ;;  %v8758_v40 = vsel %vm269_vm1, %v17282_v47, 0 }
 0x21b   : > { %v7601_v28 = vadd.f32 %v7600_v7, %v7527_v45  ;;  %v17738_v20 = vpop.f32.mrb[91].mxu1  ;;  %v19295_v36 = vand.u32 4294901760, %v8758_v40 }
 0x21d   : > { %v19298_v4 = vsub.f32 %v8758_v40, %v19295_v36 }
 0x21e   : > { %v7674_v13 = vpop.f32.mrb[92].mxu1 }
 0x21f   : > { %v7675_v6 = vadd.f32 %v7674_v13, %v7601_v28  ;;  %v17743_v19 = vpop.f32.mrb[93].mxu1  ;;  %v19301_v63 = vand.u32 4294901760, %v19298_v4 }
 0x220   : > { %8013 = vmatmul.mubr.f32.vlgmr.msra.gmra.mrb[0].mxu0 %v19081_v21 }
 0x221   : > { %8022 = vmatpush1.msra.mxu0 %v19252_v57  ;;  %8085 = vmatprep.mubr.f32.mxu0 %v18296_v0 }
 0x222   : > { %8098 = vmatprep.subr.mxu0 %v7862_v15  ;;  %v7746_v61 = vpop.f32.mrb[94].mxu1 }
 0x223   : > { %v7747_v18 = vadd.f32 %v7746_v61, %v7675_v6  ;;  %v17748_v43 = vpop.f32.mrb[95].mxu1 }
 0x225   : > { %v7752_v22 = vadd.f32 %v7747_v18, %v6809_v49  ;;  %v9678_v49 = vsel %vm269_vm1, %v8743_v24, 0 }
 0x226   : > { %v8319_v56 = vpop.f32.mrb[96].mxu1  ;;  %v19322_v62 = vand.u32 4294901760, %v9678_v49 }
 0x227   : > { %v17753_v14 = vpop.f32.mrb[97].mxu1 }
 0x228   : > { %8089 = vmatmul.mubr.f32.vlgmr.msra.gmra.mrb[0].mxu0 %v19091_v54  ;;  %v19329_v37 = vsub.f32 %v9678_v49, %v19322_v62 }
 0x229   : > { %8102 = vmatpush1.msra.mxu0 %v7868_v25  ;;  %8165 = vmatprep.mubr.f32.mxu0 %v18296_v0  ;;  %v8836_v25 = vsub.f32 %v19298_v4, %v19301_v63 }
 0x22a   : > { %8174 = vmatprep.subr.mxu0 %v19244_v38  ;;  %v8395_v16 = vpop.f32.mrb[98].mxu1  ;;  %v19277_v38 = vshrl.u32 %v8716_v3, 7  ;;  %v19336_v53 = vand.u32 4294901760, %v19329_v37 }
 0x22b   : > { %v8396_v21 = vadd.f32 %v8395_v16, %v8319_v56  ;;  %v17758_v23 = vpop.f32.mrb[99].mxu1  ;;  %v19309_v5 = vand.u32 4294901760, %v8836_v25 }
 0x22c   : > { %v8726_v60 = vsub.s32 2, %v19277_v38  ;;  %v9756_v59 = vsub.f32 %v19329_v37, %v19336_v53  ;;  %v8718_v13 = vsub.s32 0, %v19277_v38  ;;  %v8722_v6 = vsub.s32 1, %v19277_v38 }
 0x22e   : > { %v8469_v1 = vpop.f32.mrb[100].mxu1  ;;  %v19348_v28 = vand.u32 4294901760, %v9756_v59  ;;  %v8719_v43 = vrot.slane %v19286_v2, %v8718_v13  ;;  %v8723_v14 = vrot.slane %v19286_v2, %v8722_v6 }
 0x22f   : > { %v8470_v29 = vadd.f32 %v8469_v1, %v8396_v21  ;;  %v17763_v51 = vpop.f32.mrb[101].mxu1 }
 0x230   : > { %8167 = vmatmul.mubr.f32.vlgmr.msra.gmra.mrb[0].mxu0 %v19061_v10 }
 0x231   : > { %8176 = vmatpush1.msra.mxu0 %v19252_v57  ;;  %8239 = vmatprep.mubr.f32.mxu0 %v18296_v0 }
 0x232   : > { %v8543_v50 = vpop.f32.mrb[102].mxu1 }
 0x233   : > { %v8544_v27 = vadd.f32 %v8543_v50, %v8470_v29  ;;  %v17768_v54 = vpop.f32.mrb[103].mxu1 }
 0x236   : > { %v8617_v31 = vpop.f32.mrb[104].mxu1 }
 0x237   : > { %v8618_v34 = vadd.f32 %v8617_v31, %v8544_v27  ;;  %v17773_v35 = vpop.f32.mrb[105].mxu1 }
 0x238   : > { %8241 = vmatmul.mubr.f32.vlgmr.msra.gmra.mrb[0].mxu0 %v19061_v10  ;;  %v8727_v10 = vrot.slane %v19286_v2, %v8726_v60 }
 0x239   : > { %8832 = vmatprep.mubr.f32.mxu0 %v18296_v0 }
 0x23a   : > { %v8689_v44 = vpop.f32.mrb[106].mxu1 }
 0x23b   : > { %v8690_v39 = vadd.f32 %v8689_v44, %v8618_v34  ;;  %v17778_v32 = vpop.f32.mrb[107].mxu1  ;;  %v17283_v44 = vld [vmem:[%s20166_s4 + $0x8] sm:$0xf] }
 0x23d   : > { %v8695_v17 = vadd.f32 %v8690_v39, %v7752_v22  ;;  %v10613_v39 = vsel %vm269_vm1, %v17283_v44, 0 }
 0x23e   : > { %v19429_v32 = vand.u32 4294901760, %v10613_v39 }
 0x23f   : > { %v8704_v57 = vadd.f32 %v19281_v12, %v8695_v17 }
 0x240   : > { %v19432_v60 = vsub.f32 %v10613_v39, %v19429_v32 }
 0x241   : > { %vm8707_vm11 = vcmp.gt.f32.partialorder %v8704_v57, 0.0  ;;  %v8710_v15 = vmul.f32 0.2, %v8704_v57 }
 0x243   : > { %v8713_v30 = vsel %vm8707_vm11, %v8704_v57, %v8710_v15 }
 0x244   : > { %v8733_v48 = vmul.f32 %v8727_v10, %v8713_v30  ;;  %v19438_v10 = vand.u32 4294901760, %v19432_v60 }
 0x246   : > { %8740 = vst.msk [vmem:[#allocation2 + $0x8] sm:$0xf] %vm8739_vm12, %v8733_v48 }
 0x24d   : > { %v8742_v58 = vld [vmem:[#allocation2 + $0x8] sm:$0xf] }
 0x24e   : > { %8753 = vrot.lane.b32.xlu1 %v8742_v58, %s18297_s27  ;;  %v9684_v52 = vsel %vm273_vm3, %v8742_v58, 0  ;;  %v11536_v27 = vld [vmem:[#allocation2 + $0x8] sm:$0xf] }
 0x24f   : > { %v10152_v42 = vand.u32 4294901760, %v9684_v52  ;;  %v10598_v54 = vld [vmem:[#allocation2 + $0x8] sm:$0xf] }
 0x250   : > { %v13412_v3 = vld [vmem:[#allocation2 + $0x8] sm:$0xf] }
 0x251   : > { %v10229_v33 = vsub.f32 %v9684_v52, %v10152_v42  ;;  %v12474_v31 = vld [vmem:[#allocation2 + $0x8] sm:$0xf] }
 0x252   : > { %v15288_v34 = vld [vmem:[#allocation2 + $0x8] sm:$0xf] }
 0x253   : > { %v10230_v45 = vand.u32 4294901760, %v10229_v33  ;;  %v14350_v35 = vld [vmem:[#allocation2 + $0x8] sm:$0xf] }
 0x254   : > { %v16226_v38 = vld [vmem:[#allocation2 + $0x8] sm:$0xf] }
 0x255   : > { %v10231_v7 = vsub.f32 %v10229_v33, %v10230_v45 }
 0x257   : > { %v10232_v20 = vand.u32 4294901760, %v10231_v7 }
 0x2c0   : > { %v19305_v26 = vpop.permute.xlu1 %8753 }
 0x2c1   : > { %v8764_v8 = vsel %vm273_vm3, %v19305_v26, 0 }
 0x2c2   : > { %v9232_v46 = vand.u32 4294901760, %v8764_v8 }
 0x2c4   : > { %v9309_v11 = vsub.f32 %v8764_v8, %v9232_v46  ;;  %17780 = vmatpush3.msra.mxu1 %v9232_v46 }
 0x2c5   : > { %17782 = vmatmul.mubr.f32.vlgmr.msra.gmra.mrb[108].mxu1 %v19309_v5  ;;  %17784 = vmatprep.subr.mxu1 %v18296_v0 }
 0x2c6   : > { %v9310_v9 = vand.u32 4294901760, %v9309_v11  ;;  %17786 = vmatprep.mubr.msk.f32.mxu1 %vm18298_vm0, %v18296_v0 }
 0x2c8   : > { %v9311_v55 = vsub.f32 %v9309_v11, %v9310_v9 }
 0x2ca   : > { %v9312_v41 = vand.u32 4294901760, %v9311_v55 }
 0x2cc   : > { %17785 = vmatpush3.msra.mxu1 %v9312_v41 }
 0x2cd   : > { %17787 = vmatmul.mubr.f32.vlgmr.msra.gmra.mrb[110].mxu1 %v19295_v36  ;;  %17789 = vmatprep.subr.mxu1 %v18296_v0 }
 0x2ce   : > { %17790 = vmatpush3.msra.mxu1 %v9309_v11  ;;  %17791 = vmatprep.mubr.msk.f32.mxu1 %vm18298_vm0, %v18296_v0 }
 0x2cf   : > { %17794 = vmatprep.subr.mxu1 %v18296_v0 }
 0x2d1   : > { %17792 = vmatmul.mubr.f32.vlgmr.msra.gmra.mrb[112].mxu1 %v19298_v4 }
 0x2d2   : > { %17795 = vmatpush3.msra.mxu1 %v9232_v46  ;;  %17796 = vmatprep.mubr.msk.f32.mxu1 %vm18298_vm0, %v18296_v0 }
 0x2d3   : > { %17799 = vmatprep.subr.mxu1 %v18296_v0 }
 0x2d5   : > { %17797 = vmatmul.mubr.f32.vlgmr.msra.gmra.mrb[114].mxu1 %v19301_v63 }
 0x2d6   : > { %17800 = vmatpush3.msra.mxu1 %v9310_v9  ;;  %17801 = vmatprep.mubr.msk.f32.mxu1 %vm18298_vm0, %v18296_v0 }
 0x2d7   : > { %17804 = vmatprep.subr.mxu1 %v18296_v0 }
 0x2d9   : > { %17802 = vmatmul.mubr.f32.vlgmr.msra.gmra.mrb[116].mxu1 %v19295_v36 }
 0x2da   : > { %17805 = vmatpush3.msra.mxu1 %v9232_v46  ;;  %17806 = vmatprep.mubr.msk.f32.mxu1 %vm18298_vm0, %v18296_v0 }
 0x2db   : > { %17809 = vmatprep.subr.mxu1 %v18296_v0 }
 0x2dd   : > { %17807 = vmatmul.mubr.f32.vlgmr.msra.gmra.mrb[118].mxu1 %v19295_v36 }
 0x2de   : > { %17810 = vmatpush3.msra.mxu1 %v10152_v42  ;;  %17811 = vmatprep.mubr.msk.f32.mxu1 %vm18298_vm0, %v18296_v0 }
 0x2df   : > { %17814 = vmatprep.subr.mxu1 %v18296_v0 }
 0x2e1   : > { %17812 = vmatmul.mubr.f32.vlgmr.msra.gmra.mrb[120].mxu1 %v19348_v28 }
 0x2e2   : > { %17815 = vmatpush3.msra.mxu1 %v10232_v20  ;;  %17816 = vmatprep.mubr.msk.f32.mxu1 %vm18298_vm0, %v18296_v0 }
 0x2e3   : > { %17819 = vmatprep.subr.mxu1 %v18296_v0 }
 0x2e5   : > { %17817 = vmatmul.mubr.f32.vlgmr.msra.gmra.mrb[122].mxu1 %v19322_v62 }
 0x2e6   : > { %17820 = vmatpush3.msra.mxu1 %v10229_v33  ;;  %17821 = vmatprep.mubr.msk.f32.mxu1 %vm18298_vm0, %v18296_v0 }
 0x2e7   : > { %17824 = vmatprep.subr.mxu1 %v18296_v0 }
 0x2e9   : > { %17822 = vmatmul.mubr.f32.vlgmr.msra.gmra.mrb[124].mxu1 %v19329_v37 }
 0x2ea   : > { %17825 = vmatpush3.msra.mxu1 %v10152_v42  ;;  %17826 = vmatprep.mubr.msk.f32.mxu1 %vm18298_vm0, %v18296_v0 }
 0x2eb   : > { %17829 = vmatprep.subr.mxu1 %v18296_v0 }
 0x2ed   : > { %17827 = vmatmul.mubr.f32.vlgmr.msra.gmra.mrb[126].mxu1 %v19336_v53 }
 0x2ee   : > { %17830 = vmatpush3.msra.mxu1 %v10230_v45  ;;  %17831 = vmatprep.mubr.msk.f32.mxu1 %vm18298_vm0, %v18296_v0 }
 0x2ef   : > { %17834 = vmatprep.subr.mxu1 %v18296_v0 }
 0x2f1   : > { %17832 = vmatmul.mubr.f32.vlgmr.msra.gmra.mrb[128].mxu1 %v19322_v62 }
 0x2f2   : > { %17835 = vmatpush3.msra.mxu1 %v10152_v42  ;;  %17836 = vmatprep.mubr.msk.f32.mxu1 %vm18298_vm0, %v18296_v0 }
 0x2f3   : > { %17839 = vmatprep.subr.mxu1 %v18296_v0 }
 0x2f5   : > { %17837 = vmatmul.mubr.f32.vlgmr.msra.gmra.mrb[130].mxu1 %v19322_v62 }
 0x2f6   : > { %17841 = vmatprep.mubr.msk.f32.mxu1 %vm18298_vm0, %v18296_v0 }
 0x30b   : > { %v8242_v19 = vpop.f32.mrb[0].mxu0 }
 0x30c   : > { %v8702_v61 = vadd.f32 %v19281_v12, %v8242_v19  ;;  %v8244_v18 = vpop.f32.mrb[1].mxu0 }
 0x30d   : > { %v8703_v22 = vadd.f32 %v19281_v12, %v8244_v18 }
 0x30e   : > { %vm8705_vm13 = vcmp.gt.f32.partialorder %v8702_v61, 0.0  ;;  %v8708_v56 = vmul.f32 0.2, %v8702_v61 }
 0x30f   : > { %vm8706_vm14 = vcmp.gt.f32.partialorder %v8703_v22, 0.0  ;;  %v8709_v16 = vmul.f32 0.2, %v8703_v22 }
 0x310   : > { %v8711_v21 = vsel %vm8705_vm13, %v8702_v61, %v8708_v56 }
 0x311   : > { %v8731_v23 = vmul.f32 %v8719_v43, %v8711_v21  ;;  %v8712_v1 = vsel %vm8706_vm14, %v8703_v22, %v8709_v16  ;;  %v17284_v43 = vld [vmem:[%s20166_s4 + $0xc] sm:$0xf] }
 0x312   : > { %v8732_v29 = vmul.f32 %v8723_v14, %v8712_v1  ;;  %v11551_v21 = vsel %vm269_vm1, %v17284_v43, 0 }
 0x314   : > { %v19382_v51 = vcombine.low %v8731_v23, %v8732_v29  ;;  %v19384_v50 = vcombine.low %v8732_v29, %v8732_v29 }
 0x316   : > { %10606 = vrot.lane.b32.xlu1 %v19384_v50, %s18299_s28  ;;  %8751 = vrot.lane.b32.xlu0 %v19384_v50, %s18297_s27 }
 0x31a   : > { %10604 = vrot.lane.b32.xlu1 %v19382_v51, %s18299_s28  ;;  %8749 = vrot.lane.b32.xlu0 %v19382_v51, %s18297_s27 }
 0x31e   : > { %11546 = vrot.lane.b32.xlu1 %v11536_v27, %s18300_s29  ;;  %10608 = vrot.lane.b32.xlu0 %v10598_v54, %s18299_s28  ;;  %v19510_v54 = vand.u32 4294901760, %v11551_v21 }
 0x322   : > { %12482 = vrot.lane.b32.xlu1 %v19384_v50, %s18301_s30  ;;  %11544 = vrot.lane.b32.xlu0 %v19384_v50, %s18300_s29 }
 0x326   : > { %12480 = vrot.lane.b32.xlu1 %v19382_v51, %s18301_s30  ;;  %11542 = vrot.lane.b32.xlu0 %v19382_v51, %s18300_s29 }
 0x32a   : > { %13422 = vrot.lane.b32.xlu1 %v13412_v3, %s18302_s7  ;;  %12484 = vrot.lane.b32.xlu0 %v12474_v31, %s18301_s30 }
 0x32e   : > { %14358 = vrot.lane.b32.xlu1 %v19384_v50, %s18303_s8  ;;  %13420 = vrot.lane.b32.xlu0 %v19384_v50, %s18302_s7 }
 0x332   : > { %14356 = vrot.lane.b32.xlu1 %v19382_v51, %s18303_s8  ;;  %13418 = vrot.lane.b32.xlu0 %v19382_v51, %s18302_s7 }
 0x336   : > { %15298 = vrot.lane.b32.xlu1 %v15288_v34, %s18304_s9  ;;  %14360 = vrot.lane.b32.xlu0 %v14350_v35, %s18303_s8 }
 0x33a   : > { %16234 = vrot.lane.b32.xlu1 %v19384_v50, %s18305_s10  ;;  %15296 = vrot.lane.b32.xlu0 %v19384_v50, %s18304_s9 }
 0x33e   : > { %16232 = vrot.lane.b32.xlu1 %v19382_v51, %s18305_s10  ;;  %15294 = vrot.lane.b32.xlu0 %v19382_v51, %s18304_s9 }
 0x342   : > { %16236 = vrot.lane.b32.xlu0 %v16226_v38, %s18305_s10  ;;  %v19524_v38 = vsub.f32 %v11551_v21, %v19510_v54 }
 0x388   : > { %v10607_v12 = vpop.permute.xlu1 %10606  ;;  %v8752_v17 = vpop.permute.xlu0 %8751 }
 0x389   : > { %v8756_v2 = vsel %vm266_vm2, %v8752_v17, %v19305_v26  ;;  %v10691_v26 = vsub.f32 %v19432_v60, %v19438_v10 }
 0x38a   : > { %v8762_v57 = vsel %vm273_vm3, %v8756_v2, 0  ;;  %v19543_v2 = vand.u32 4294901760, %v19524_v38 }
 0x38b   : > { %v19440_v15 = vand.u32 4294901760, %v8762_v57  ;;  %v19466_v52 = vand.u32 4294901760, %v10691_v26 }
 0x38c   : > { %v10605_v30 = vpop.permute.xlu1 %10604  ;;  %v8750_v48 = vpop.permute.xlu0 %8749 }
 0x38d   : > { %v19443_v58 = vsub.f32 %v8762_v57, %v19440_v15  ;;  %v19446_v47 = vsel %vm2124_vm8, %v10605_v30, %v10607_v12  ;;  %v8755_v40 = vsel %vm266_vm2, %v8750_v48, %v8752_v17  ;;  %8767 = vmatprep.subr.mxu0 %v19440_v15  ;;  %v9682_v57 = vsel %vm273_vm3, %v19384_v50, 0 }
 0x38e   : > { %v8760_v25 = vsel %vm273_vm3, %v8755_v40, 0  ;;  %v19557_v40 = vand.u32 4294901760, %v9682_v57  ;;  %v11629_v50 = vsub.f32 %v19524_v38, %v19543_v2  ;;  %vm17209_vm2 = vcmask 551936  }
 0x38f   : > { %v19453_v8 = vand.u32 4294901760, %v8760_v25  ;;  %v8846_v46 = vand.u32 4294901760, %v19443_v58 }
 0x390   : > { %v11547_v11 = vpop.permute.xlu1 %11546  ;;  %v10609_v9 = vpop.permute.xlu0 %10608 }
 0x391   : > { %v19457_v24 = vsub.f32 %v8760_v25, %v19453_v8  ;;  %v19460_v55 = vsel %vm2124_vm8, %v10607_v12, %v10609_v9  ;;  %8769 = vmatpush1.msra.mxu0 %v19453_v8  ;;  %v10619_v41 = vsel %vm273_vm3, %v10609_v9, 0  ;;  %v8847_v49 = vsub.f32 %v19443_v58, %v8846_v46 }
 0x392   : > { %8838 = vmatmul.mubr.f32.vlgmr.msra.gmra.mrb[2].mxu0 %v19309_v5  ;;  %v19469_v33 = vand.u32 4294901760, %v10619_v41  ;;  %v11557_v27 = vsel %vm273_vm3, %v11547_v11, 0  ;;  %v9680_v9 = vsel %vm273_vm3, %v19382_v51, 0 }
 0x393   : > { %v8852_v42 = vand.u32 4294901760, %v19457_v24  ;;  %8918 = vmatprep.mubr.f32.mxu0 %v18296_v0  ;;  %v8848_v7 = vand.u32 4294901760, %v8847_v49  ;;  %v19515_v34 = vand.u32 4294901760, %v11557_v27 }
 0x394   : > { %v12483_v45 = vpop.permute.xlu1 %12482  ;;  %v11545_v59 = vpop.permute.xlu0 %11544  ;;  %v11164_v20 = vsub.f32 %v10619_v41, %v19469_v33  ;;  %17840 = vmatpush3.msra.mxu1 %v19469_v33  ;;  %v17285_v41 = vld [vmem:[%s20166_s4 + $0x10] sm:$0xf] }
 0x395   : > { %v19475_v13 = vsel %vm3063_vm9, %v11545_v59, %v11547_v11  ;;  %v8853_v5 = vsub.f32 %v19457_v24, %v8852_v42  ;;  %8849 = vmatprep.subr.mxu0 %v8848_v7  ;;  %17842 = vmatmul.mubr.f32.vlgmr.msra.gmra.mrb[132].mxu1 %v19466_v52  ;;  %v19531_v12 = vsub.f32 %v11557_v27, %v19515_v34 }
 0x396   : > { %v11165_v6 = vand.u32 4294901760, %v11164_v20  ;;  %17844 = vmatprep.subr.mxu1 %v18296_v0  ;;  %17846 = vmatprep.mubr.msk.f32.mxu1 %vm18298_vm0, %v18296_v0  ;;  %v19579_v11 = vsub.f32 %v9682_v57, %v19557_v40  ;;  %v10617_v57 = vsel %vm273_vm3, %v19460_v55, 0 }
 0x397   : > { %v8854_v19 = vand.u32 4294901760, %v8853_v5  ;;  %v12103_v48 = vand.u32 4294901760, %v19531_v12 }
 0x398   : > { %v12481_v61 = vpop.permute.xlu1 %12480  ;;  %v11543_v18 = vpop.permute.xlu0 %11542  ;;  %v11166_v22 = vsub.f32 %v11164_v20, %v11165_v6  ;;  %v9766_v51 = vand.u32 4294901760, %v19579_v11 }
 0x399   : > { %v19488_v56 = vsel %vm4002_vm4, %v12481_v61, %v12483_v45  ;;  %v19491_v14 = vsel %vm3063_vm9, %v11543_v18, %v11545_v59  ;;  %8855 = vmatpush1.msra.mxu0 %v8854_v19 }
 0x39a   : > { %8920 = vmatmul.mubr.f32.vlgmr.msra.gmra.mrb[2].mxu0 %v19295_v36  ;;  %8928 = vmatprep.subr.mxu0 %v19443_v58  ;;  %v11167_v16 = vand.u32 4294901760, %v11166_v22 }
 0x39b   : > { %8931 = vmatpush1.msra.mxu0 %v19457_v24  ;;  %8994 = vmatprep.mubr.f32.mxu0 %v18296_v0 }
 0x39c   : > { %v19498_v23 = vpop.permute.xlu1 %13422  ;;  %9004 = vmatprep.subr.mxu0 %v19440_v15  ;;  %v19501_v1 = vpop.permute.xlu0 %12484  ;;  %17845 = vmatpush3.msra.mxu1 %v11167_v16 }
 0x39d   : > { %v19505_v29 = vsel %vm4002_vm4, %v12483_v45, %v19501_v1  ;;  %17847 = vmatmul.mubr.f32.vlgmr.msra.gmra.mrb[134].mxu1 %v19429_v32  ;;  %17849 = vmatprep.subr.mxu1 %v18296_v0  ;;  %v12489_v45 = vsel %vm269_vm1, %v17285_v41, 0  ;;  %v12495_v7 = vsel %vm273_vm3, %v19501_v1, 0 }
 0x39e   : > { %17850 = vmatpush3.msra.mxu1 %v11164_v20  ;;  %17851 = vmatprep.mubr.msk.f32.mxu1 %vm18298_vm0, %v18296_v0  ;;  %v19617_v20 = vand.u32 4294901760, %v12489_v45  ;;  %v19623_v5 = vand.u32 4294901760, %v12495_v7 }
 0x39f   : > { %17854 = vmatprep.subr.mxu1 %v18296_v0 }
 0x3a0   : > { %v14359_v3 = vpop.permute.xlu1 %14358  ;;  %v13421_v31 = vpop.permute.xlu0 %13420  ;;  %v19629_v61 = vsub.f32 %v12489_v45, %v19617_v20  ;;  %v13040_v18 = vsub.f32 %v12495_v7, %v19623_v5 }
 0x3a1   : > { %v19519_v35 = vsel %vm4941_vm5, %v13421_v31, %v19498_v23  ;;  %17852 = vmatmul.mubr.f32.vlgmr.msra.gmra.mrb[136].mxu1 %v19432_v60 }
 0x3a2   : > { %8997 = vmatmul.mubr.f32.vlgmr.msra.gmra.mrb[2].mxu0 %v19298_v4  ;;  %17855 = vmatpush3.msra.mxu1 %v19469_v33  ;;  %v19643_v43 = vand.u32 4294901760, %v19629_v61  ;;  %v13041_v22 = vand.u32 4294901760, %v13040_v18 }
 0x3a3   : > { %9006 = vmatpush1.msra.mxu0 %v19453_v8  ;;  %17856 = vmatprep.mubr.msk.f32.mxu1 %vm18298_vm0, %v18296_v0 }
 0x3a4   : > { %9082 = vmatprep.subr.mxu0 %v8846_v46  ;;  %v14357_v44 = vpop.permute.xlu1 %14356  ;;  %v13419_v39 = vpop.permute.xlu0 %13418  ;;  %17859 = vmatprep.subr.mxu1 %v18296_v0  ;;  %v12104_v46 = vsub.f32 %v19531_v12, %v12103_v48  ;;  %v12567_v21 = vsub.f32 %v19629_v61, %v19643_v43  ;;  %v13042_v1 = vsub.f32 %v13040_v18, %v13041_v22 }
 0x3a5   : > { %v19534_v17 = vsel %vm5883_vm6, %v14357_v44, %v14359_v3  ;;  %v19538_v4 = vsel %vm4941_vm5, %v13419_v39, %v13421_v31  ;;  %17857 = vmatmul.mubr.f32.vlgmr.msra.gmra.mrb[138].mxu1 %v19438_v10  ;;  %9069 = vmatprep.mubr.f32.mxu0 %v18296_v0 }
 0x3a6   : > { %17860 = vmatpush3.msra.mxu1 %v11165_v6  ;;  %17861 = vmatprep.mubr.msk.f32.mxu1 %vm18298_vm0, %v18296_v0  ;;  %v19659_v27 = vand.u32 4294901760, %v12567_v21 }
 0x3a7   : > { %17864 = vmatprep.subr.mxu1 %v18296_v0 }
 0x3a8   : > { %v19550_v30 = vpop.permute.xlu0 %14360  ;;  %v19566_v25 = vpop.permute.xlu1 %15298 }
 0x3a9   : > { %v19555_v58 = vsel %vm5883_vm6, %v14359_v3, %v19550_v30  ;;  %17862 = vmatmul.mubr.f32.vlgmr.msra.gmra.mrb[140].mxu1 %v19429_v32  ;;  %v13043_v3 = vand.u32 4294901760, %v13042_v1 }
 0x3aa   : > { %9073 = vmatmul.mubr.f32.vlgmr.msra.gmra.mrb[2].mxu0 %v19301_v63  ;;  %17865 = vmatpush3.msra.mxu1 %v19469_v33  ;;  %v19596_v33 = vand.u32 4294901760, %v9680_v9 }
 0x3ab   : > { %9086 = vmatpush1.msra.mxu0 %v8852_v42  ;;  %17866 = vmatprep.mubr.msk.f32.mxu1 %vm18298_vm0, %v18296_v0  ;;  %v12105_v42 = vand.u32 4294901760, %v12104_v46 }
 0x3ac   : > { %9158 = vmatprep.subr.mxu0 %v19440_v15  ;;  %v15297_v26 = vpop.permute.xlu0 %15296  ;;  %17869 = vmatprep.subr.mxu1 %v18296_v0  ;;  %v19582_v15 = vand.u32 4294901760, %v11629_v50  ;;  %v19609_v59 = vsub.f32 %v9680_v9, %v19596_v33  ;;  %v19713_v50 = vand.u32 4294901760, %v10617_v57 }
 0x3ad   : > { %v19575_v63 = vsel %vm6826_vm7, %v15297_v26, %v19566_v25  ;;  %9149 = vmatprep.mubr.f32.mxu0 %v18296_v0  ;;  %17867 = vmatmul.mubr.f32.vlgmr.msra.gmra.mrb[142].mxu1 %v19429_v32 }
 0x3ae   : > { %17870 = vmatpush3.msra.mxu1 %v19515_v34  ;;  %17871 = vmatprep.mubr.msk.f32.mxu1 %vm18298_vm0, %v18296_v0  ;;  %v9772_v6 = vand.u32 4294901760, %v19609_v59  ;;  %v19731_v46 = vsub.f32 %v10617_v57, %v19713_v50 }
 0x3af   : > { %17874 = vmatprep.subr.mxu1 %v18296_v0 }
 0x3b0   : > { %v15295_v24 = vpop.permute.xlu0 %15294 }
 0x3b1   : > { %v19594_v49 = vsel %vm6826_vm7, %v15295_v24, %v15297_v26  ;;  %17872 = vmatmul.mubr.f32.vlgmr.msra.gmra.mrb[144].mxu1 %v19582_v15  ;;  %v10701_v24 = vand.u32 4294901760, %v19731_v46 }
 0x3b2   : > { %9151 = vmatmul.mubr.f32.vlgmr.msra.gmra.mrb[2].mxu0 %v19295_v36  ;;  %17875 = vmatpush3.msra.mxu1 %v12105_v42 }
 0x3b3   : > { %9160 = vmatpush1.msra.mxu0 %v19453_v8  ;;  %17876 = vmatprep.mubr.msk.f32.mxu1 %vm18298_vm0, %v18296_v0  ;;  %v9767_v8 = vsub.f32 %v19579_v11, %v9766_v51 }
 0x3b4   : > { %9687 = vmatprep.subr.mxu0 %v19557_v40  ;;  %17879 = vmatprep.subr.mxu1 %v18296_v0 }
 0x3b5   : > { %9223 = vmatprep.mubr.f32.mxu0 %v18296_v0  ;;  %17877 = vmatmul.mubr.f32.vlgmr.msra.gmra.mrb[146].mxu1 %v19510_v54  ;;  %v9768_v19 = vand.u32 4294901760, %v9767_v8 }
 0x3b6   : > { %17880 = vmatpush3.msra.mxu1 %v19531_v12  ;;  %17881 = vmatprep.mubr.msk.f32.mxu1 %vm18298_vm0, %v18296_v0 }
 0x3b7   : > { %17884 = vmatprep.subr.mxu1 %v18296_v0 }
 0x3b9   : > { %17882 = vmatmul.mubr.f32.vlgmr.msra.gmra.mrb[148].mxu1 %v19524_v38 }
 0x3ba   : > { %9225 = vmatmul.mubr.f32.vlgmr.msra.gmra.mrb[2].mxu0 %v19295_v36  ;;  %17885 = vmatpush3.msra.mxu1 %v19515_v34  ;;  %v9773_v36 = vsub.f32 %v19609_v59, %v9772_v6 }
 0x3bb   : > { %9689 = vmatpush1.msra.mxu0 %v19596_v33  ;;  %17886 = vmatprep.mubr.msk.f32.mxu1 %vm18298_vm0, %v18296_v0 }
 0x3bc   : > { %9769 = vmatprep.subr.mxu0 %v9768_v19  ;;  %17889 = vmatprep.subr.mxu1 %v18296_v0  ;;  %v9774_v16 = vand.u32 4294901760, %v9773_v36 }
 0x3bd   : > { %9752 = vmatprep.mubr.f32.mxu0 %v18296_v0  ;;  %17887 = vmatmul.mubr.f32.vlgmr.msra.gmra.mrb[150].mxu1 %v19543_v2 }
 0x3be   : > { %17890 = vmatpush3.msra.mxu1 %v12103_v48  ;;  %17891 = vmatprep.mubr.msk.f32.mxu1 %vm18298_vm0, %v18296_v0 }
 0x3bf   : > { %17894 = vmatprep.subr.mxu1 %v18296_v0 }
 0x3c1   : > { %17892 = vmatmul.mubr.f32.vlgmr.msra.gmra.mrb[152].mxu1 %v19510_v54 }
 0x3c2   : > { %9758 = vmatmul.mubr.f32.vlgmr.msra.gmra.mrb[2].mxu0 %v19348_v28  ;;  %17895 = vmatpush3.msra.mxu1 %v19515_v34  ;;  %v17286_v28 = vld [vmem:[%s20166_s4 + $0x14] sm:$0xf]  ;;  %v13433_v34 = vsel %vm273_vm3, %v19498_v23, 0 }
 0x3c3   : > { %9775 = vmatpush1.msra.mxu0 %v9774_v16  ;;  %17896 = vmatprep.mubr.msk.f32.mxu1 %vm18298_vm0, %v18296_v0  ;;  %v13427_v31 = vsel %vm269_vm1, %v17286_v28, 0  ;;  %v19685_v39 = vand.u32 4294901760, %v13433_v34  ;;  %v15309_v28 = vsel %vm273_vm3, %v19566_v25, 0 }
 0x3c4   : > { %9848 = vmatprep.subr.mxu0 %v19579_v11  ;;  %17899 = vmatprep.subr.mxu1 %v18296_v0  ;;  %v19680_v44 = vand.u32 4294901760, %v13427_v31 }
 0x3c5   : > { %9838 = vmatprep.mubr.f32.mxu0 %v18296_v0  ;;  %17897 = vmatmul.mubr.f32.vlgmr.msra.gmra.mrb[154].mxu1 %v19510_v54  ;;  %v19699_v23 = vsub.f32 %v13433_v34, %v19685_v39 }
 0x3c6   : > { %17900 = vmatpush3.msra.mxu1 %v19623_v5  ;;  %17901 = vmatprep.mubr.msk.f32.mxu1 %vm18298_vm0, %v18296_v0  ;;  %v19690_v12 = vsub.f32 %v13427_v31, %v19680_v44  ;;  %v19832_v31 = vand.u32 4294901760, %v15309_v28 }
 0x3c7   : > { %17904 = vmatprep.subr.mxu1 %v18296_v0  ;;  %v13979_v48 = vand.u32 4294901760, %v19699_v23 }
 0x3c8   : > { %v19846_v25 = vsub.f32 %v15309_v28, %v19832_v31 }
 0x3c9   : > { %17902 = vmatmul.mubr.f32.vlgmr.msra.gmra.mrb[156].mxu1 %v19659_v27  ;;  %v13980_v55 = vsub.f32 %v19699_v23, %v13979_v48 }
 0x3ca   : > { %9840 = vmatmul.mubr.f32.vlgmr.msra.gmra.mrb[2].mxu0 %v19322_v62  ;;  %17905 = vmatpush3.msra.mxu1 %v13043_v3 }
 0x3cb   : > { %9851 = vmatpush1.msra.mxu0 %v19609_v59  ;;  %17906 = vmatprep.mubr.msk.f32.mxu1 %vm18298_vm0, %v18296_v0 }
 0x3cc   : > { %9924 = vmatprep.subr.mxu0 %v19557_v40  ;;  %17909 = vmatprep.subr.mxu1 %v18296_v0 }
 0x3cd   : > { %9914 = vmatprep.mubr.f32.mxu0 %v18296_v0  ;;  %17907 = vmatmul.mubr.f32.vlgmr.msra.gmra.mrb[158].mxu1 %v19617_v20 }
 0x3ce   : > { %17910 = vmatpush3.msra.mxu1 %v13040_v18  ;;  %17911 = vmatprep.mubr.msk.f32.mxu1 %vm18298_vm0, %v18296_v0 }
 0x3cf   : > { %17914 = vmatprep.subr.mxu1 %v18296_v0 }
 0x3d1   : > { %17912 = vmatmul.mubr.f32.vlgmr.msra.gmra.mrb[160].mxu1 %v19629_v61 }
 0x3d2   : > { %9917 = vmatmul.mubr.f32.vlgmr.msra.gmra.mrb[2].mxu0 %v19329_v37  ;;  %17915 = vmatpush3.msra.mxu1 %v19623_v5  ;;  %v19705_v37 = vand.u32 4294901760, %v19690_v12 }
 0x3d3   : > { %9926 = vmatpush1.msra.mxu0 %v19596_v33  ;;  %17916 = vmatprep.mubr.msk.f32.mxu1 %vm18298_vm0, %v18296_v0 }
 0x3d4   : > { %10002 = vmatprep.subr.mxu0 %v9766_v51  ;;  %17919 = vmatprep.subr.mxu1 %v18296_v0  ;;  %v13505_v26 = vsub.f32 %v19690_v12, %v19705_v37  ;;  %v14371_v51 = vsel %vm273_vm3, %v19550_v30, 0 }
 0x3d5   : > { %9989 = vmatprep.mubr.f32.mxu0 %v18296_v0  ;;  %17917 = vmatmul.mubr.f32.vlgmr.msra.gmra.mrb[162].mxu1 %v19643_v43  ;;  %v19771_v7 = vand.u32 4294901760, %v14371_v51 }
 0x3d6   : > { %17920 = vmatpush3.msra.mxu1 %v13041_v22  ;;  %17921 = vmatprep.mubr.msk.f32.mxu1 %vm18298_vm0, %v18296_v0  ;;  %v19734_v11 = vand.u32 4294901760, %v13505_v26  ;;  %v11553_v26 = vsel %vm273_vm3, %v19491_v14, 0 }
 0x3d7   : > { %17924 = vmatprep.subr.mxu1 %v18296_v0 }
 0x3d9   : > { %17922 = vmatmul.mubr.f32.vlgmr.msra.gmra.mrb[164].mxu1 %v19617_v20 }
 0x3da   : > { %9993 = vmatmul.mubr.f32.vlgmr.msra.gmra.mrb[2].mxu0 %v19336_v53  ;;  %17925 = vmatpush3.msra.mxu1 %v19623_v5  ;;  %v10615_v53 = vsel %vm273_vm3, %v19446_v47, 0  ;;  %v13981_v47 = vand.u32 4294901760, %v13980_v55  ;;  %v14916_v5 = vsub.f32 %v14371_v51, %v19771_v7 }
 0x3db   : > { %10006 = vmatpush1.msra.mxu0 %v9772_v6  ;;  %17926 = vmatprep.mubr.msk.f32.mxu1 %vm18298_vm0, %v18296_v0  ;;  %v19743_v9 = vand.u32 4294901760, %v10615_v53 }
 0x3dc   : > { %10078 = vmatprep.subr.mxu0 %v19557_v40  ;;  %17929 = vmatprep.subr.mxu1 %v18296_v0  ;;  %v17287_v40 = vld [vmem:[%s20166_s4 + $0x18] sm:$0xf]  ;;  %v14917_v19 = vand.u32 4294901760, %v14916_v5 }
 0x3dd   : > { %10069 = vmatprep.mubr.f32.mxu0 %v18296_v0  ;;  %17927 = vmatmul.mubr.f32.vlgmr.msra.gmra.mrb[166].mxu1 %v19617_v20  ;;  %v14365_v41 = vsel %vm269_vm1, %v17287_v40, 0  ;;  %v19754_v42 = vsub.f32 %v10615_v53, %v19743_v9  ;;  %v19890_v53 = vand.u32 4294901760, %v11553_v26  ;;  %v19895_v40 = vpop.permute.xlu0 %16236 }
 0x3de   : > { %17930 = vmatpush3.msra.mxu1 %v19685_v39  ;;  %17931 = vmatprep.mubr.msk.f32.mxu1 %vm18298_vm0, %v18296_v0  ;;  %v19764_v45 = vand.u32 4294901760, %v14365_v41  ;;  %v14918_v22 = vsub.f32 %v14916_v5, %v14917_v19 }
 0x3df   : > { %17934 = vmatprep.subr.mxu1 %v18296_v0  ;;  %v10707_v59 = vand.u32 4294901760, %v19754_v42 }
 0x3e0   : > { %v19776_v8 = vsub.f32 %v14365_v41, %v19764_v45  ;;  %v14919_v21 = vand.u32 4294901760, %v14918_v22  ;;  %v16247_v41 = vsel %vm273_vm3, %v19895_v40, 0 }
 0x3e1   : > { %17932 = vmatmul.mubr.f32.vlgmr.msra.gmra.mrb[168].mxu1 %v19734_v11 }
 0x3e2   : > { %10071 = vmatmul.mubr.f32.vlgmr.msra.gmra.mrb[2].mxu0 %v19322_v62  ;;  %17935 = vmatpush3.msra.mxu1 %v13981_v47  ;;  %v19790_v6 = vand.u32 4294901760, %v19776_v8 }
 0x3e3   : > { %10080 = vmatpush1.msra.mxu0 %v19596_v33  ;;  %17936 = vmatprep.mubr.msk.f32.mxu1 %vm18298_vm0, %v18296_v0  ;;  %v10702_v33 = vsub.f32 %v19731_v46, %v10701_v24 }
 0x3e4   : > { %10622 = vmatprep.subr.mxu0 %v19713_v50  ;;  %17939 = vmatprep.subr.mxu1 %v18296_v0  ;;  %v14443_v36 = vsub.f32 %v19776_v8, %v19790_v6 }
 0x3e5   : > { %10143 = vmatprep.mubr.f32.mxu0 %v18296_v0  ;;  %17937 = vmatmul.mubr.f32.vlgmr.msra.gmra.mrb[170].mxu1 %v19680_v44  ;;  %v10703_v30 = vand.u32 4294901760, %v10702_v33  ;;  %v19920_v33 = vand.u32 4294901760, %v16247_v41 }
 0x3e6   : > { %17940 = vmatpush3.msra.mxu1 %v19699_v23  ;;  %17941 = vmatprep.mubr.msk.f32.mxu1 %vm18298_vm0, %v18296_v0  ;;  %v19806_v16 = vand.u32 4294901760, %v14443_v36  ;;  %v15855_v23 = vand.u32 4294901760, %v19846_v25 }
 0x3e7   : > { %17944 = vmatprep.subr.mxu1 %v18296_v0 }
 0x3e9   : > { %17942 = vmatmul.mubr.f32.vlgmr.msra.gmra.mrb[172].mxu1 %v19690_v12 }
 0x3ea   : > { %10145 = vmatmul.mubr.f32.vlgmr.msra.gmra.mrb[2].mxu0 %v19322_v62  ;;  %17945 = vmatpush3.msra.mxu1 %v19685_v39  ;;  %v10708_v62 = vsub.f32 %v19754_v42, %v10707_v59 }
 0x3eb   : > { %10624 = vmatpush1.msra.mxu0 %v19743_v9  ;;  %17946 = vmatprep.mubr.msk.f32.mxu1 %vm18298_vm0, %v18296_v0 }
 0x3ec   : > { %10704 = vmatprep.subr.mxu0 %v10703_v30  ;;  %17949 = vmatprep.subr.mxu1 %v18296_v0  ;;  %v10709_v18 = vand.u32 4294901760, %v10708_v62  ;;  %v16792_v30 = vsub.f32 %v16247_v41, %v19920_v33 }
 0x3ed   : > { %10687 = vmatprep.mubr.f32.mxu0 %v18296_v0  ;;  %17947 = vmatmul.mubr.f32.vlgmr.msra.gmra.mrb[174].mxu1 %v19705_v37 }
 0x3ee   : > { %17950 = vmatpush3.msra.mxu1 %v13979_v48  ;;  %17951 = vmatprep.mubr.msk.f32.mxu1 %vm18298_vm0, %v18296_v0  ;;  %v16793_v62 = vand.u32 4294901760, %v16792_v30 }
 0x3ef   : > { %17954 = vmatprep.subr.mxu1 %v18296_v0 }
 0x3f0   : > { %v16794_v36 = vsub.f32 %v16792_v30, %v16793_v62 }
 0x3f1   : > { %17952 = vmatmul.mubr.f32.vlgmr.msra.gmra.mrb[176].mxu1 %v19680_v44 }
 0x3f2   : > { %10693 = vmatmul.mubr.f32.vlgmr.msra.gmra.mrb[2].mxu0 %v19466_v52  ;;  %17955 = vmatpush3.msra.mxu1 %v19685_v39  ;;  %v17288_v52 = vld [vmem:[%s20166_s4 + $0x1c] sm:$0xf]  ;;  %v11555_v39 = vsel %vm273_vm3, %v19475_v13, 0  ;;  %v15856_v13 = vsub.f32 %v19846_v25, %v15855_v23 }
 0x3f3   : > { %10710 = vmatpush1.msra.mxu0 %v10709_v18  ;;  %17956 = vmatprep.mubr.msk.f32.mxu1 %vm18298_vm0, %v18296_v0  ;;  %v15303_v1 = vsel %vm269_vm1, %v17288_v52, 0  ;;  %v19860_v57 = vand.u32 4294901760, %v11555_v39  ;;  %v12493_v52 = vsel %vm273_vm3, %v19505_v29, 0  ;;  %v12491_v29 = vsel %vm273_vm3, %v19488_v56, 0 }
 0x3f4   : > { %10783 = vmatprep.subr.mxu0 %v19731_v46  ;;  %17959 = vmatprep.subr.mxu1 %v18296_v0  ;;  %v19827_v3 = vand.u32 4294901760, %v15303_v1  ;;  %v15857_v46 = vand.u32 4294901760, %v15856_v13 }
 0x3f5   : > { %10773 = vmatprep.mubr.f32.mxu0 %v18296_v0  ;;  %17957 = vmatmul.mubr.f32.vlgmr.msra.gmra.mrb[178].mxu1 %v19680_v44 }
 0x3f6   : > { %17960 = vmatpush3.msra.mxu1 %v19771_v7  ;;  %17961 = vmatprep.mubr.msk.f32.mxu1 %vm18298_vm0, %v18296_v0  ;;  %v19837_v34 = vsub.f32 %v15303_v1, %v19827_v3  ;;  %v12499_v1 = vand.u32 4294901760, %v12491_v29 }
 0x3f7   : > { %17964 = vmatprep.subr.mxu1 %v18296_v0 }
 0x3f8   : > { %v12582_v28 = vsub.f32 %v12491_v29, %v12499_v1 }
 0x3f9   : > { %17962 = vmatmul.mubr.f32.vlgmr.msra.gmra.mrb[180].mxu1 %v19806_v16 }
 0x3fa   : > { %10775 = vmatmul.mubr.f32.vlgmr.msra.gmra.mrb[2].mxu0 %v19429_v32  ;;  %17965 = vmatpush3.msra.mxu1 %v14919_v21 }
 0x3fb   : > { %10786 = vmatpush1.msra.mxu0 %v19754_v42  ;;  %17966 = vmatprep.mubr.msk.f32.mxu1 %vm18298_vm0, %v18296_v0 }
 0x3fc   : > { %10859 = vmatprep.subr.mxu0 %v19713_v50  ;;  %17969 = vmatprep.subr.mxu1 %v18296_v0 }
 0x3fd   : > { %10849 = vmatprep.mubr.f32.mxu0 %v18296_v0  ;;  %17967 = vmatmul.mubr.f32.vlgmr.msra.gmra.mrb[182].mxu1 %v19764_v45 }
 0x3fe   : > { %17970 = vmatpush3.msra.mxu1 %v14916_v5  ;;  %17971 = vmatprep.mubr.msk.f32.mxu1 %vm18298_vm0, %v18296_v0 }
 0x3ff   : > { %17974 = vmatprep.subr.mxu1 %v18296_v0 }
 0x401   : > { %17972 = vmatmul.mubr.f32.vlgmr.msra.gmra.mrb[184].mxu1 %v19776_v8 }
 0x402   : > { %10852 = vmatmul.mubr.f32.vlgmr.msra.gmra.mrb[2].mxu0 %v19432_v60  ;;  %17975 = vmatpush3.msra.mxu1 %v19771_v7  ;;  %v19852_v60 = vand.u32 4294901760, %v19837_v34 }
 0x403   : > { %10861 = vmatpush1.msra.mxu0 %v19743_v9  ;;  %17976 = vmatprep.mubr.msk.f32.mxu1 %vm18298_vm0, %v18296_v0 }
 0x404   : > { %10937 = vmatprep.subr.mxu0 %v10701_v24  ;;  %17979 = vmatprep.subr.mxu1 %v18296_v0  ;;  %v15381_v48 = vsub.f32 %v19837_v34, %v19852_v60  ;;  %v19903_v24 = vsub.f32 %v11553_v26, %v19890_v53 }
 0x405   : > { %10924 = vmatprep.mubr.f32.mxu0 %v18296_v0  ;;  %17977 = vmatmul.mubr.f32.vlgmr.msra.gmra.mrb[186].mxu1 %v19790_v6 }
 0x406   : > { %17980 = vmatpush3.msra.mxu1 %v14917_v19  ;;  %17981 = vmatprep.mubr.msk.f32.mxu1 %vm18298_vm0, %v18296_v0  ;;  %v19881_v55 = vand.u32 4294901760, %v15381_v48  ;;  %v11645_v51 = vand.u32 4294901760, %v19903_v24  ;;  %v13429_v48 = vsel %vm273_vm3, %v19538_v4, 0 }
 0x407   : > { %17984 = vmatprep.subr.mxu1 %v18296_v0  ;;  %v20026_v13 = vand.u32 4294901760, %v13429_v48 }
 0x409   : > { %17982 = vmatmul.mubr.f32.vlgmr.msra.gmra.mrb[188].mxu1 %v19764_v45 }
 0x40a   : > { %10928 = vmatmul.mubr.f32.vlgmr.msra.gmra.mrb[2].mxu0 %v19438_v10  ;;  %17985 = vmatpush3.msra.mxu1 %v19771_v7  ;;  %v19876_v10 = vsub.f32 %v11555_v39, %v19860_v57 }
 0x40b   : > { %10941 = vmatpush1.msra.mxu0 %v10707_v59  ;;  %17986 = vmatprep.mubr.msk.f32.mxu1 %vm18298_vm0, %v18296_v0 }
 0x40c   : > { %11013 = vmatprep.subr.mxu0 %v19713_v50  ;;  %17989 = vmatprep.subr.mxu1 %v18296_v0  ;;  %v17289_v50 = vld [vmem:[%s20166_s4 + $0x20] sm:$0xf]  ;;  %v11639_v14 = vand.u32 4294901760, %v19876_v10 }
 0x40d   : > { %11004 = vmatprep.mubr.f32.mxu0 %v18296_v0  ;;  %17987 = vmatmul.mubr.f32.vlgmr.msra.gmra.mrb[190].mxu1 %v19764_v45  ;;  %v16241_v47 = vsel %vm269_vm1, %v17289_v50, 0 }
 0x40e   : > { %17990 = vmatpush3.msra.mxu1 %v19832_v31  ;;  %17991 = vmatprep.mubr.msk.f32.mxu1 %vm18298_vm0, %v18296_v0  ;;  %v19913_v42 = vand.u32 4294901760, %v16241_v47 }
 0x40f   : > { %17994 = vmatprep.subr.mxu1 %v18296_v0 }
 0x410   : > { %v19925_v7 = vsub.f32 %v16241_v47, %v19913_v42 }
 0x411   : > { %17992 = vmatmul.mubr.f32.vlgmr.msra.gmra.mrb[192].mxu1 %v19881_v55 }
 0x412   : > { %11006 = vmatmul.mubr.f32.vlgmr.msra.gmra.mrb[2].mxu0 %v19429_v32  ;;  %17995 = vmatpush3.msra.mxu1 %v15857_v46  ;;  %v19939_v5 = vand.u32 4294901760, %v19925_v7 }
 0x413   : > { %11015 = vmatpush1.msra.mxu0 %v19743_v9  ;;  %17996 = vmatprep.mubr.msk.f32.mxu1 %vm18298_vm0, %v18296_v0  ;;  %v11640_v9 = vsub.f32 %v19876_v10, %v11639_v14 }
 0x414   : > { %11560 = vmatprep.subr.mxu0 %v19860_v57  ;;  %17999 = vmatprep.subr.mxu1 %v18296_v0  ;;  %v16319_v18 = vsub.f32 %v19925_v7, %v19939_v5 }
 0x415   : > { %11078 = vmatprep.mubr.f32.mxu0 %v18296_v0  ;;  %17997 = vmatmul.mubr.f32.vlgmr.msra.gmra.mrb[194].mxu1 %v19827_v3  ;;  %v11641_v59 = vand.u32 4294901760, %v11640_v9 }
 0x416   : > { %18000 = vmatpush3.msra.mxu1 %v19846_v25  ;;  %18001 = vmatprep.mubr.msk.f32.mxu1 %vm18298_vm0, %v18296_v0  ;;  %v19955_v22 = vand.u32 4294901760, %v16319_v18  ;;  %v12583_v25 = vand.u32 4294901760, %v12582_v28 }
 0x417   : > { %18004 = vmatprep.subr.mxu1 %v18296_v0 }
 0x418   : > { %v12584_v56 = vsub.f32 %v12582_v28, %v12583_v25 }
 0x419   : > { %18002 = vmatmul.mubr.f32.vlgmr.msra.gmra.mrb[196].mxu1 %v19837_v34 }
 0x41a   : > { %11080 = vmatmul.mubr.f32.vlgmr.msra.gmra.mrb[2].mxu0 %v19429_v32  ;;  %18005 = vmatpush3.msra.mxu1 %v19832_v31  ;;  %v11646_v32 = vsub.f32 %v19903_v24, %v11645_v51 }
 0x41b   : > { %11562 = vmatpush1.msra.mxu0 %v19890_v53  ;;  %18006 = vmatprep.mubr.msk.f32.mxu1 %vm18298_vm0, %v18296_v0 }
 0x41c   : > { %11642 = vmatprep.subr.mxu0 %v11641_v59  ;;  %18009 = vmatprep.subr.mxu1 %v18296_v0  ;;  %v11647_v19 = vand.u32 4294901760, %v11646_v32 }
 0x41d   : > { %11625 = vmatprep.mubr.f32.mxu0 %v18296_v0  ;;  %18007 = vmatmul.mubr.f32.vlgmr.msra.gmra.mrb[198].mxu1 %v19852_v60 }
 0x41e   : > { %18010 = vmatpush3.msra.mxu1 %v15855_v23  ;;  %18011 = vmatprep.mubr.msk.f32.mxu1 %vm18298_vm0, %v18296_v0  ;;  %v12585_v23 = vand.u32 4294901760, %v12584_v56 }
 0x41f   : > { %18014 = vmatprep.subr.mxu1 %v18296_v0 }
 0x421   : > { %18012 = vmatmul.mubr.f32.vlgmr.msra.gmra.mrb[200].mxu1 %v19827_v3 }
 0x422   : > { %11631 = vmatmul.mubr.f32.vlgmr.msra.gmra.mrb[2].mxu0 %v19582_v15  ;;  %18015 = vmatpush3.msra.mxu1 %v19832_v31  ;;  %v16795_v15 = vand.u32 4294901760, %v16794_v36 }
 0x423   : > { %11648 = vmatpush1.msra.mxu0 %v11647_v19  ;;  %18016 = vmatprep.mubr.msk.f32.mxu1 %vm18298_vm0, %v18296_v0 }
 0x424   : > { %11721 = vmatprep.subr.mxu0 %v19876_v10  ;;  %18019 = vmatprep.subr.mxu1 %v18296_v0  ;;  %v20033_v10 = vsub.f32 %v13429_v48, %v20026_v13 }
 0x425   : > { %11711 = vmatprep.mubr.f32.mxu0 %v18296_v0  ;;  %18017 = vmatmul.mubr.f32.vlgmr.msra.gmra.mrb[202].mxu1 %v19827_v3 }
 0x426   : > { %18020 = vmatpush3.msra.mxu1 %v19920_v33  ;;  %18021 = vmatprep.mubr.msk.f32.mxu1 %vm18298_vm0, %v18296_v0  ;;  %v13521_v50 = vand.u32 4294901760, %v20033_v10 }
 0x427   : > { %18024 = vmatprep.subr.mxu1 %v18296_v0 }
 0x428   : > { %v13522_v9 = vsub.f32 %v20033_v10, %v13521_v50 }
 0x429   : > { %18022 = vmatmul.mubr.f32.vlgmr.msra.gmra.mrb[204].mxu1 %v19955_v22 }
 0x42a   : > { %11713 = vmatmul.mubr.f32.vlgmr.msra.gmra.mrb[2].mxu0 %v19510_v54  ;;  %18025 = vmatpush3.msra.mxu1 %v16795_v15 }
 0x42b   : > { %11724 = vmatpush1.msra.mxu0 %v19903_v24  ;;  %18026 = vmatprep.mubr.msk.f32.mxu1 %vm18298_vm0, %v18296_v0 }
 0x42c   : > { %11797 = vmatprep.subr.mxu0 %v19860_v57  ;;  %18029 = vmatprep.subr.mxu1 %v18296_v0 }
 0x42d   : > { %11787 = vmatprep.mubr.f32.mxu0 %v18296_v0  ;;  %18027 = vmatmul.mubr.f32.vlgmr.msra.gmra.mrb[206].mxu1 %v19913_v42 }
 0x42e   : > { %18030 = vmatpush3.msra.mxu1 %v16792_v30  ;;  %18031 = vmatprep.mubr.msk.f32.mxu1 %vm18298_vm0, %v18296_v0 }
 0x42f   : > { %18034 = vmatprep.subr.mxu1 %v18296_v0 }
 0x431   : > { %18032 = vmatmul.mubr.f32.vlgmr.msra.gmra.mrb[208].mxu1 %v19925_v7 }
 0x432   : > { %11790 = vmatmul.mubr.f32.vlgmr.msra.gmra.mrb[2].mxu0 %v19524_v38  ;;  %18035 = vmatpush3.msra.mxu1 %v19920_v33  ;;  %v12497_v38 = vand.u32 4294901760, %v12493_v52 }
 0x433   : > { %11799 = vmatpush1.msra.mxu0 %v19890_v53  ;;  %18036 = vmatprep.mubr.msk.f32.mxu1 %vm18298_vm0, %v18296_v0 }
 0x434   : > { %11875 = vmatprep.subr.mxu0 %v11639_v14  ;;  %18039 = vmatprep.subr.mxu1 %v18296_v0  ;;  %v12576_v21 = vsub.f32 %v12493_v52, %v12497_v38 }
 0x435   : > { %11862 = vmatprep.mubr.f32.mxu0 %v18296_v0  ;;  %18037 = vmatmul.mubr.f32.vlgmr.msra.gmra.mrb[210].mxu1 %v19939_v5 }
 0x436   : > { %18040 = vmatpush3.msra.mxu1 %v16793_v62  ;;  %18041 = vmatprep.mubr.msk.f32.mxu1 %vm18298_vm0, %v18296_v0  ;;  %v13523_v62 = vand.u32 4294901760, %v13522_v9 }
 0x437   : > { %18044 = vmatprep.subr.mxu1 %v18296_v0 }
 0x439   : > { %18042 = vmatmul.mubr.f32.vlgmr.msra.gmra.mrb[212].mxu1 %v19913_v42 }
 0x43a   : > { %11866 = vmatmul.mubr.f32.vlgmr.msra.gmra.mrb[2].mxu0 %v19543_v2  ;;  %18045 = vmatpush3.msra.mxu1 %v19920_v33  ;;  %v12577_v2 = vand.u32 4294901760, %v12576_v21 }
 0x43b   : > { %11879 = vmatpush1.msra.mxu0 %v11645_v51  ;;  %11942 = vmatprep.mubr.f32.mxu0 %v18296_v0 }
 0x43c   : > { %11951 = vmatprep.subr.mxu0 %v19860_v57  ;;  %18046 = vmatprep.mubr.msk.f32.mxu1 %vm18298_vm0, %v18296_v0  ;;  %v12578_v31 = vsub.f32 %v12576_v21, %v12577_v2 }
 0x43d   : > { %18047 = vmatmul.mubr.f32.vlgmr.msra.gmra.mrb[214].mxu1 %v19913_v42 }
 0x43e   : > { %v12579_v39 = vand.u32 4294901760, %v12578_v31 }
 0x442   : > { %11944 = vmatmul.mubr.f32.vlgmr.msra.gmra.mrb[2].mxu0 %v19510_v54 }
 0x443   : > { %11953 = vmatpush1.msra.mxu0 %v19890_v53  ;;  %12016 = vmatprep.mubr.f32.mxu0 %v18296_v0 }
 0x444   : > { %12498 = vmatprep.subr.mxu0 %v12497_v38 }
 0x44a   : > { %12018 = vmatmul.mubr.f32.vlgmr.msra.gmra.mrb[2].mxu0 %v19510_v54  ;;  %v17163_v54 = vld [vmem:[%s20167_s5] sm:$0xf] }
 0x44b   : > { %12500 = vmatpush1.msra.mxu0 %v12499_v1  ;;  %12563 = vmatprep.mubr.f32.mxu0 %v18296_v0 }
 0x44c   : > { %12580 = vmatprep.subr.mxu0 %v12579_v39  ;;  %17166 = vperm.xlu0 %18283, %v17163_v54  }
 0x452   : > { %12569 = vmatmul.mubr.f32.vlgmr.msra.gmra.mrb[2].mxu0 %v19659_v27  ;;  %v13431_v27 = vsel %vm273_vm3, %v19519_v35, 0 }
 0x453   : > { %12586 = vmatpush1.msra.mxu0 %v12585_v23  ;;  %12649 = vmatprep.mubr.f32.mxu0 %v18296_v0  ;;  %v20017_v57 = vand.u32 4294901760, %v13431_v27 }
 0x454   : > { %12659 = vmatprep.subr.mxu0 %v12576_v21 }
 0x45a   : > { %12651 = vmatmul.mubr.f32.vlgmr.msra.gmra.mrb[2].mxu0 %v19617_v20 }
 0x45b   : > { %12662 = vmatpush1.msra.mxu0 %v12582_v28  ;;  %12725 = vmatprep.mubr.f32.mxu0 %v18296_v0 }
 0x45c   : > { %12735 = vmatprep.subr.mxu0 %v12497_v38 }
 0x462   : > { %12728 = vmatmul.mubr.f32.vlgmr.msra.gmra.mrb[2].mxu0 %v19629_v61  ;;  %v20022_v61 = vsub.f32 %v13431_v27, %v20017_v57 }
 0x463   : > { %12737 = vmatpush1.msra.mxu0 %v12499_v1  ;;  %12800 = vmatprep.mubr.f32.mxu0 %v18296_v0 }
 0x464   : > { %12813 = vmatprep.subr.mxu0 %v12577_v2  ;;  %v13515_v35 = vand.u32 4294901760, %v20022_v61 }
 0x466   : > { %v13516_v4 = vsub.f32 %v20022_v61, %v13515_v35 }
 0x468   : > { %v13517_v46 = vand.u32 4294901760, %v13516_v4 }
 0x46a   : > { %12804 = vmatmul.mubr.f32.vlgmr.msra.gmra.mrb[2].mxu0 %v19643_v43  ;;  %v9303_v43 = vpop.f32.mrb[108].mxu1 }
 0x46b   : > { %12817 = vmatpush1.msra.mxu0 %v12583_v25  ;;  %12880 = vmatprep.mubr.f32.mxu0 %v18296_v0  ;;  %v17783_v26 = vpop.f32.mrb[109].mxu1 }
 0x46c   : > { %12889 = vmatprep.subr.mxu0 %v12497_v38  ;;  %v9379_v53 = vpop.f32.mrb[110].mxu1 }
 0x46d   : > { %v17788_v14 = vpop.f32.mrb[111].mxu1  ;;  %v9380_v47 = vadd.f32 %v9379_v53, %v9303_v43 }
 0x46e   : > { %v9453_v24 = vpop.f32.mrb[112].mxu1 }
 0x46f   : > { %v17793_v41 = vpop.f32.mrb[113].mxu1  ;;  %v9454_v51 = vadd.f32 %v9453_v24, %v9380_v47 }
 0x470   : > { %v9527_v33 = vpop.f32.mrb[114].mxu1 }
 0x471   : > { %v17798_v59 = vpop.f32.mrb[115].mxu1  ;;  %v9528_v30 = vadd.f32 %v9527_v33, %v9454_v51 }
 0x472   : > { %12882 = vmatmul.mubr.f32.vlgmr.msra.gmra.mrb[2].mxu0 %v19617_v20  ;;  %v9601_v32 = vpop.f32.mrb[116].mxu1  ;;  %v14369_v59 = vsel %vm273_vm3, %v19555_v58, 0 }
 0x473   : > { %12891 = vmatpush1.msra.mxu0 %v12499_v1  ;;  %12954 = vmatprep.mubr.f32.mxu0 %v18296_v0  ;;  %v9602_v19 = vadd.f32 %v9601_v32, %v9528_v30 }
 0x474   : > { %13436 = vmatprep.subr.mxu0 %v20017_v57 }
 0x47a   : > { %12956 = vmatmul.mubr.f32.vlgmr.msra.gmra.mrb[2].mxu0 %v19617_v20  ;;  %v17803_v20 = vpop.f32.mrb[117].mxu1 }
 0x47b   : > { %13438 = vmatpush1.msra.mxu0 %v20026_v13  ;;  %13501 = vmatprep.mubr.f32.mxu0 %v18296_v0  ;;  %v9673_v18 = vpop.f32.mrb[118].mxu1 }
 0x47c   : > { %13518 = vmatprep.subr.mxu0 %v13517_v46  ;;  %v17808_v36 = vpop.f32.mrb[119].mxu1  ;;  %v9674_v15 = vadd.f32 %v9673_v18, %v9602_v19  ;;  %v20059_v19 = vand.u32 4294901760, %v14369_v59 }
 0x47d   : > { %v10223_v52 = vpop.f32.mrb[120].mxu1 }
 0x47e   : > { %v17813_v38 = vpop.f32.mrb[121].mxu1  ;;  %v10224_v29 = vadd.f32 %v10223_v52, %v9674_v15  ;;  %v14367_v52 = vsel %vm273_vm3, %v19534_v17, 0 }
 0x47f   : > { %v10299_v21 = vpop.f32.mrb[122].mxu1  ;;  %v20069_v38 = vsub.f32 %v14369_v59, %v20059_v19 }
 0x480   : > { %v17818_v1 = vpop.f32.mrb[123].mxu1  ;;  %v10300_v2 = vadd.f32 %v10299_v21, %v10224_v29 }
 0x481   : > { %v10373_v28 = vpop.f32.mrb[124].mxu1  ;;  %v20071_v1 = vand.u32 4294901760, %v14367_v52 }
 0x482   : > { %13507 = vmatmul.mubr.f32.vlgmr.msra.gmra.mrb[2].mxu0 %v19734_v11  ;;  %v17823_v31 = vpop.f32.mrb[125].mxu1  ;;  %v10374_v25 = vadd.f32 %v10373_v28, %v10300_v2 }
 0x483   : > { %13524 = vmatpush1.msra.mxu0 %v13523_v62  ;;  %13587 = vmatprep.mubr.f32.mxu0 %v18296_v0  ;;  %v10447_v39 = vpop.f32.mrb[126].mxu1 }
 0x484   : > { %13597 = vmatprep.subr.mxu0 %v20022_v61  ;;  %v17828_v11 = vpop.f32.mrb[127].mxu1  ;;  %v10448_v56 = vadd.f32 %v10447_v39, %v10374_v25  ;;  %v20079_v39 = vsub.f32 %v14367_v52, %v20071_v1 }
 0x485   : > { %v10521_v23 = vpop.f32.mrb[128].mxu1 }
 0x486   : > { %v17833_v54 = vpop.f32.mrb[129].mxu1  ;;  %v10522_v27 = vadd.f32 %v10521_v23, %v10448_v56 }
 0x487   : > { %v10593_v48 = vpop.f32.mrb[130].mxu1 }
 0x488   : > { %v17838_v43 = vpop.f32.mrb[131].mxu1  ;;  %v10594_v26 = vadd.f32 %v10593_v48, %v10522_v27 }
 0x489   : > { %v11158_v4 = vpop.f32.mrb[132].mxu1 }
 0x48a   : > { %13589 = vmatmul.mubr.f32.vlgmr.msra.gmra.mrb[2].mxu0 %v19680_v44  ;;  %v17843_v53 = vpop.f32.mrb[133].mxu1 }
 0x48b   : > { %13600 = vmatpush1.msra.mxu0 %v20033_v10  ;;  %13663 = vmatprep.mubr.f32.mxu0 %v18296_v0  ;;  %v11234_v46 = vpop.f32.mrb[134].mxu1 }
 0x48c   : > { %13673 = vmatprep.subr.mxu0 %v20017_v57  ;;  %v17848_v14 = vpop.f32.mrb[135].mxu1  ;;  %v11235_v47 = vadd.f32 %v11234_v46, %v11158_v4 }
 0x48d   : > { %v11308_v24 = vpop.f32.mrb[136].mxu1 }
 0x48e   : > { %v17853_v41 = vpop.f32.mrb[137].mxu1  ;;  %v11309_v9 = vadd.f32 %v11308_v24, %v11235_v47 }
 0x48f   : > { %v11382_v51 = vpop.f32.mrb[138].mxu1 }
 0x490   : > { %v17858_v33 = vpop.f32.mrb[139].mxu1  ;;  %v11383_v30 = vadd.f32 %v11382_v51, %v11309_v9 }
 0x491   : > { %v11456_v32 = vpop.f32.mrb[140].mxu1 }
 0x492   : > { %13666 = vmatmul.mubr.f32.vlgmr.msra.gmra.mrb[2].mxu0 %v19690_v12  ;;  %v17863_v12 = vpop.f32.mrb[141].mxu1  ;;  %v11457_v20 = vadd.f32 %v11456_v32, %v11383_v30 }
 0x493   : > { %13675 = vmatpush1.msra.mxu0 %v20026_v13  ;;  %13738 = vmatprep.mubr.f32.mxu0 %v18296_v0  ;;  %v11528_v62 = vpop.f32.mrb[142].mxu1 }
 0x494   : > { %13751 = vmatprep.subr.mxu0 %v13515_v35  ;;  %v17868_v18 = vpop.f32.mrb[143].mxu1  ;;  %v11529_v61 = vadd.f32 %v11528_v62, %v11457_v20 }
 0x495   : > { %v12096_v35 = vpop.f32.mrb[144].mxu1 }
 0x496   : > { %v17873_v58 = vpop.f32.mrb[145].mxu1  ;;  %v11534_v36 = vadd.f32 %v11529_v61, %v10594_v26 }
 0x497   : > { %v12172_v15 = vpop.f32.mrb[146].mxu1 }
 0x498   : > { %v17878_v29 = vpop.f32.mrb[147].mxu1 }
 0x499   : > { %v12246_v21 = vpop.f32.mrb[148].mxu1 }
 0x49a   : > { %13742 = vmatmul.mubr.f32.vlgmr.msra.gmra.mrb[2].mxu0 %v19705_v37  ;;  %v12173_v37 = vadd.f32 %v12172_v15, %v12096_v35 }
 0x49b   : > { %13755 = vmatpush1.msra.mxu0 %v13521_v50  ;;  %13818 = vmatprep.mubr.f32.mxu0 %v18296_v0  ;;  %v17883_v50 = vpop.f32.mrb[149].mxu1 }
 0x49c   : > { %13827 = vmatprep.subr.mxu0 %v20017_v57  ;;  %v12247_v10 = vadd.f32 %v12246_v21, %v12173_v37  ;;  %v12320_v2 = vpop.f32.mrb[150].mxu1  ;;  %v14453_v57 = vand.u32 4294901760, %v20069_v38 }
 0x49d   : > { %v17888_v28 = vpop.f32.mrb[151].mxu1 }
 0x49e   : > { %v12321_v17 = vadd.f32 %v12320_v2, %v12247_v10  ;;  %v12394_v31 = vpop.f32.mrb[152].mxu1  ;;  %v14454_v23 = vsub.f32 %v20069_v38, %v14453_v57 }
 0x49f   : > { %v17893_v25 = vpop.f32.mrb[153].mxu1 }
 0x4a0   : > { %v12395_v11 = vadd.f32 %v12394_v31, %v12321_v17  ;;  %v12466_v56 = vpop.f32.mrb[154].mxu1  ;;  %v14455_v53 = vand.u32 4294901760, %v14454_v23  ;;  %v15307_v17 = vsel %vm273_vm3, %v19575_v63, 0  ;;  %v15305_v23 = vsel %vm273_vm3, %v19594_v49, 0 }
 0x4a1   : > { %v17898_v54 = vpop.f32.mrb[155].mxu1  ;;  %v20099_v25 = vand.u32 4294901760, %v15307_v17 }
 0x4a2   : > { %13820 = vmatmul.mubr.f32.vlgmr.msra.gmra.mrb[2].mxu0 %v19680_v44  ;;  %v12467_v27 = vadd.f32 %v12466_v56, %v12395_v11  ;;  %v13034_v48 = vpop.f32.mrb[156].mxu1  ;;  %v20107_v54 = vand.u32 4294901760, %v15305_v23 }
 0x4a3   : > { %13829 = vmatpush1.msra.mxu0 %v20026_v13  ;;  %13892 = vmatprep.mubr.f32.mxu0 %v18296_v0  ;;  %v17903_v43 = vpop.f32.mrb[157].mxu1  ;;  %v14459_v13 = vand.u32 4294901760, %v20079_v39  ;;  %v15390_v56 = vsub.f32 %v15307_v17, %v20099_v25 }
 0x4a4   : > { %14374 = vmatprep.subr.mxu0 %v20059_v19  ;;  %v12472_v26 = vadd.f32 %v12467_v27, %v11534_v36  ;;  %v13110_v4 = vpop.f32.mrb[158].mxu1 }
 0x4a5   : > { %v17908_v46 = vpop.f32.mrb[159].mxu1  ;;  %v13111_v14 = vadd.f32 %v13110_v4, %v13034_v48  ;;  %v14460_v41 = vsub.f32 %v20079_v39, %v14459_v13 }
 0x4a6   : > { %v13184_v47 = vpop.f32.mrb[160].mxu1 }
 0x4a7   : > { %v17913_v24 = vpop.f32.mrb[161].mxu1  ;;  %v13185_v9 = vadd.f32 %v13184_v47, %v13111_v14  ;;  %v14461_v12 = vand.u32 4294901760, %v14460_v41 }
 0x4a8   : > { %v13258_v51 = vpop.f32.mrb[162].mxu1 }
 0x4a9   : > { %v17918_v33 = vpop.f32.mrb[163].mxu1  ;;  %v13259_v59 = vadd.f32 %v13258_v51, %v13185_v9 }
 0x4aa   : > { %13894 = vmatmul.mubr.f32.vlgmr.msra.gmra.mrb[2].mxu0 %v19680_v44 }
 0x4ab   : > { %14376 = vmatpush1.msra.mxu0 %v20071_v1  ;;  %14439 = vmatprep.mubr.f32.mxu0 %v18296_v0 }
 0x4ac   : > { %14456 = vmatprep.subr.mxu0 %v14455_v53  ;;  %v13332_v30 = vpop.f32.mrb[164].mxu1 }
 0x4ad   : > { %v17923_v32 = vpop.f32.mrb[165].mxu1  ;;  %v13333_v44 = vadd.f32 %v13332_v30, %v13259_v59 }
 0x4b0   : > { %v13404_v20 = vpop.f32.mrb[166].mxu1 }
 0x4b1   : > { %v17928_v62 = vpop.f32.mrb[167].mxu1  ;;  %v13405_v18 = vadd.f32 %v13404_v20, %v13333_v44 }
 0x4b2   : > { %14445 = vmatmul.mubr.f32.vlgmr.msra.gmra.mrb[2].mxu0 %v19806_v16 }
 0x4b3   : > { %14462 = vmatpush1.msra.mxu0 %v14461_v12  ;;  %14525 = vmatprep.mubr.f32.mxu0 %v18296_v0  ;;  %v13410_v61 = vadd.f32 %v13405_v18, %v12472_v26 }
 0x4b4   : > { %14535 = vmatprep.subr.mxu0 %v20069_v38  ;;  %v13972_v35 = vpop.f32.mrb[168].mxu1 }
 0x4b5   : > { %v17933_v58 = vpop.f32.mrb[169].mxu1 }
 0x4b8   : > { %v14048_v36 = vpop.f32.mrb[170].mxu1 }
 0x4b9   : > { %v14049_v15 = vadd.f32 %v14048_v36, %v13972_v35  ;;  %v17938_v52 = vpop.f32.mrb[171].mxu1  ;;  %v16235_v36 = vpop.permute.xlu1 %16234 }
 0x4ba   : > { %14527 = vmatmul.mubr.f32.vlgmr.msra.gmra.mrb[2].mxu0 %v19764_v45 }
 0x4bb   : > { %14538 = vmatpush1.msra.mxu0 %v20079_v39  ;;  %14601 = vmatprep.mubr.f32.mxu0 %v18296_v0 }
 0x4bc   : > { %14611 = vmatprep.subr.mxu0 %v20059_v19  ;;  %v14122_v16 = vpop.f32.mrb[172].mxu1 }
 0x4bd   : > { %v14123_v37 = vadd.f32 %v14122_v16, %v14049_v15  ;;  %v17943_v29 = vpop.f32.mrb[173].mxu1  ;;  %v16239_v16 = vsel %vm7769_vm10, %v16235_v36, %v19895_v40 }
 0x4c0   : > { %v14196_v21 = vpop.f32.mrb[174].mxu1 }
 0x4c1   : > { %v14197_v38 = vadd.f32 %v14196_v21, %v14123_v37  ;;  %v17948_v10 = vpop.f32.mrb[175].mxu1 }
 0x4c2   : > { %14604 = vmatmul.mubr.f32.vlgmr.msra.gmra.mrb[2].mxu0 %v19776_v8  ;;  %v16233_v10 = vpop.permute.xlu1 %16232 }
 0x4c3   : > { %14613 = vmatpush1.msra.mxu0 %v20071_v1  ;;  %14676 = vmatprep.mubr.f32.mxu0 %v18296_v0  ;;  %v16238_v17 = vsel %vm7769_vm10, %v16233_v10, %v16235_v36 }
 0x4c4   : > { %14689 = vmatprep.subr.mxu0 %v14453_v57  ;;  %v14270_v50 = vpop.f32.mrb[176].mxu1 }
 0x4c5   : > { %v14271_v2 = vadd.f32 %v14270_v50, %v14197_v38  ;;  %v17953_v28 = vpop.f32.mrb[177].mxu1  ;;  %v16245_v38 = vsel %vm273_vm3, %v16239_v16, 0 }
 0x4c8   : > { %v14342_v31 = vpop.f32.mrb[178].mxu1 }
 0x4c9   : > { %v14343_v39 = vadd.f32 %v14342_v31, %v14271_v2  ;;  %v17958_v8 = vpop.f32.mrb[179].mxu1  ;;  %v16249_v2 = vand.u32 4294901760, %v16245_v38 }
 0x4ca   : > { %14680 = vmatmul.mubr.f32.vlgmr.msra.gmra.mrb[2].mxu0 %v19790_v6  ;;  %v15391_v6 = vand.u32 4294901760, %v15390_v56 }
 0x4cb   : > { %14693 = vmatpush1.msra.mxu0 %v14459_v13  ;;  %14756 = vmatprep.mubr.f32.mxu0 %v18296_v0  ;;  %v14348_v11 = vadd.f32 %v14343_v39, %v13410_v61  ;;  %v16243_v39 = vsel %vm273_vm3, %v16238_v17, 0  ;;  %v16328_v8 = vsub.f32 %v16245_v38, %v16249_v2 }
 0x4cc   : > { %14765 = vmatprep.subr.mxu0 %v20059_v19  ;;  %v14910_v57 = vpop.f32.mrb[180].mxu1  ;;  %v15396_v19 = vsub.f32 %v15305_v23, %v20107_v54  ;;  %v15392_v26 = vsub.f32 %v15390_v56, %v15391_v6 }
 0x4cd   : > { %v17963_v63 = vpop.f32.mrb[181].mxu1 }
 0x4ce   : > { %v15397_v53 = vand.u32 4294901760, %v15396_v19  ;;  %v15393_v14 = vand.u32 4294901760, %v15392_v26 }
 0x4d0   : > { %v14986_v27 = vpop.f32.mrb[182].mxu1 }
 0x4d1   : > { %v14987_v48 = vadd.f32 %v14986_v27, %v14910_v57  ;;  %v17968_v43 = vpop.f32.mrb[183].mxu1  ;;  %v16251_v57 = vand.u32 4294901760, %v16243_v39 }
 0x4d2   : > { %14758 = vmatmul.mubr.f32.vlgmr.msra.gmra.mrb[2].mxu0 %v19764_v45 }
 0x4d3   : > { %14767 = vmatpush1.msra.mxu0 %v20071_v1  ;;  %14830 = vmatprep.mubr.f32.mxu0 %v18296_v0  ;;  %v15398_v1 = vsub.f32 %v15396_v19, %v15397_v53  ;;  %v16334_v27 = vsub.f32 %v16243_v39, %v16251_v57 }
 0x4d4   : > { %15312 = vmatprep.subr.mxu0 %v20099_v25  ;;  %v15060_v13 = vpop.f32.mrb[184].mxu1 }
 0x4d5   : > { %v15061_v49 = vadd.f32 %v15060_v13, %v14987_v48  ;;  %v17973_v4 = vpop.f32.mrb[185].mxu1  ;;  %v15399_v33 = vand.u32 4294901760, %v15398_v1 }
 0x4d8   : > { %v15134_v46 = vpop.f32.mrb[186].mxu1 }
 0x4d9   : > { %v15135_v47 = vadd.f32 %v15134_v46, %v15061_v49  ;;  %v17978_v24 = vpop.f32.mrb[187].mxu1 }
 0x4da   : > { %14832 = vmatmul.mubr.f32.vlgmr.msra.gmra.mrb[2].mxu0 %v19764_v45 }
 0x4db   : > { %15314 = vmatpush1.msra.mxu0 %v20107_v54  ;;  %15377 = vmatprep.mubr.f32.mxu0 %v18296_v0 }
 0x4dc   : > { %15394 = vmatprep.subr.mxu0 %v15393_v14  ;;  %v15208_v41 = vpop.f32.mrb[188].mxu1 }
 0x4dd   : > { %v15209_v9 = vadd.f32 %v15208_v41, %v15135_v47  ;;  %v17983_v51 = vpop.f32.mrb[189].mxu1 }
 0x4e0   : > { %v15280_v59 = vpop.f32.mrb[190].mxu1 }
 0x4e1   : > { %v15281_v30 = vadd.f32 %v15280_v59, %v15209_v9  ;;  %v17988_v32 = vpop.f32.mrb[191].mxu1 }
 0x4e2   : > { %15383 = vmatmul.mubr.f32.vlgmr.msra.gmra.mrb[2].mxu0 %v19881_v55  ;;  %v17172_v32 = vld [vmem:[%s18359_s26] sm:$0xff] }
 0x4e3   : > { %15400 = vmatpush1.msra.mxu0 %v15399_v33  ;;  %15463 = vmatprep.mubr.f32.mxu0 %v18296_v0  ;;  %v15286_v45 = vadd.f32 %v15281_v30, %v14348_v11 }
 0x4e4   : > { %15473 = vmatprep.subr.mxu0 %v15390_v56  ;;  %v15848_v12 = vpop.f32.mrb[192].mxu1 }
 0x4e5   : > { %v17993_v44 = vpop.f32.mrb[193].mxu1 }
 0x4e8   : > { %v15924_v20 = vpop.f32.mrb[194].mxu1 }
 0x4e9   : > { %v15925_v62 = vadd.f32 %v15924_v20, %v15848_v12  ;;  %v17998_v18 = vpop.f32.mrb[195].mxu1 }
 0x4ea   : > { %15465 = vmatmul.mubr.f32.vlgmr.msra.gmra.mrb[2].mxu0 %v19827_v3 }
 0x4eb   : > { %15476 = vmatpush1.msra.mxu0 %v15396_v19  ;;  %15539 = vmatprep.mubr.f32.mxu0 %v18296_v0  ;;  %v16335_v19 = vand.u32 4294901760, %v16334_v27 }
 0x4ec   : > { %15549 = vmatprep.subr.mxu0 %v20099_v25  ;;  %v15998_v55 = vpop.f32.mrb[196].mxu1 }
 0x4ed   : > { %v15999_v61 = vadd.f32 %v15998_v55, %v15925_v62  ;;  %v18003_v35 = vpop.f32.mrb[197].mxu1 }
 0x4f0   : > { %v16072_v58 = vpop.f32.mrb[198].mxu1 }
 0x4f1   : > { %v16073_v15 = vadd.f32 %v16072_v58, %v15999_v61  ;;  %v18008_v52 = vpop.f32.mrb[199].mxu1 }
 0x4f2   : > { %15542 = vmatmul.mubr.f32.vlgmr.msra.gmra.mrb[2].mxu0 %v19837_v34 }
 0x4f3   : > { %15551 = vmatpush1.msra.mxu0 %v20107_v54  ;;  %15614 = vmatprep.mubr.f32.mxu0 %v18296_v0 }
 0x4f4   : > { %15627 = vmatprep.subr.mxu0 %v15391_v6  ;;  %v16146_v37 = vpop.f32.mrb[200].mxu1 }
 0x4f5   : > { %v16147_v29 = vadd.f32 %v16146_v37, %v16073_v15  ;;  %v18013_v21 = vpop.f32.mrb[201].mxu1 }
 0x4f8   : > { %v16218_v50 = vpop.f32.mrb[202].mxu1 }
 0x4f9   : > { %v16219_v34 = vadd.f32 %v16218_v50, %v16147_v29  ;;  %v18018_v28 = vpop.f32.mrb[203].mxu1 }
 0x4fa   : > { %15618 = vmatmul.mubr.f32.vlgmr.msra.gmra.mrb[2].mxu0 %v19852_v60  ;;  %v16329_v60 = vand.u32 4294901760, %v16328_v8 }
 0x4fb   : > { %15631 = vmatpush1.msra.mxu0 %v15397_v53  ;;  %15694 = vmatprep.mubr.f32.mxu0 %v18296_v0  ;;  %v16224_v40 = vadd.f32 %v16219_v34, %v15286_v45 }
 0x4fc   : > { %15703 = vmatprep.subr.mxu0 %v20099_v25  ;;  %v16786_v31 = vpop.f32.mrb[204].mxu1  ;;  %v16330_v6 = vsub.f32 %v16328_v8, %v16329_v60 }
 0x4fd   : > { %v18023_v11 = vpop.f32.mrb[205].mxu1 }
 0x4fe   : > { %v16331_v26 = vand.u32 4294901760, %v16330_v6 }
 0x500   : > { %v16862_v56 = vpop.f32.mrb[206].mxu1 }
 0x501   : > { %v16863_v23 = vadd.f32 %v16862_v56, %v16786_v31  ;;  %v18028_v63 = vpop.f32.mrb[207].mxu1 }
 0x502   : > { %15696 = vmatmul.mubr.f32.vlgmr.msra.gmra.mrb[2].mxu0 %v19827_v3 }
 0x503   : > { %15705 = vmatpush1.msra.mxu0 %v20107_v54  ;;  %15768 = vmatprep.mubr.f32.mxu0 %v18296_v0  ;;  %v16336_v54 = vsub.f32 %v16334_v27, %v16335_v19 }
 0x504   : > { %16250 = vmatprep.subr.mxu0 %v16249_v2  ;;  %v16936_v25 = vpop.f32.mrb[208].mxu1 }
 0x505   : > { %v16937_v48 = vadd.f32 %v16936_v25, %v16863_v23  ;;  %v18033_v43 = vpop.f32.mrb[209].mxu1  ;;  %v16337_v47 = vand.u32 4294901760, %v16336_v54 }
 0x508   : > { %v17010_v13 = vpop.f32.mrb[210].mxu1 }
 0x509   : > { %v17011_v49 = vadd.f32 %v17010_v13, %v16937_v48  ;;  %v18038_v4 = vpop.f32.mrb[211].mxu1 }
 0x50a   : > { %15770 = vmatmul.mubr.f32.vlgmr.msra.gmra.mrb[2].mxu0 %v19827_v3 }
 0x50b   : > { %16252 = vmatpush1.msra.mxu0 %v16251_v57  ;;  %16315 = vmatprep.mubr.f32.mxu0 %v18296_v0 }
 0x50c   : > { %16332 = vmatprep.subr.mxu0 %v16331_v26  ;;  %v17084_v53 = vpop.f32.mrb[212].mxu1 }
 0x50d   : > { %v17085_v46 = vadd.f32 %v17084_v53, %v17011_v49  ;;  %v18043_v14 = vpop.f32.mrb[213].mxu1 }
 0x510   : > { %v17156_v24 = vpop.f32.mrb[214].mxu1 }
 0x511   : > { %v17157_v1 = vadd.f32 %v17156_v24, %v17085_v46  ;;  %v18048_v41 = vpop.f32.mrb[215].mxu1 }
 0x512   : > { %16321 = vmatmul.mubr.f32.vlgmr.msra.gmra.mrb[2].mxu0 %v19955_v22 }
 0x513   : > { %16338 = vmatpush1.msra.mxu0 %v16337_v47  ;;  %16401 = vmatprep.mubr.f32.mxu0 %v18296_v0  ;;  %v17162_v3 = vadd.f32 %v17157_v1, %v16224_v40 }
 0x514   : > { %16411 = vmatprep.subr.mxu0 %v16328_v8 }
 0x51a   : > { %16403 = vmatmul.mubr.f32.vlgmr.msra.gmra.mrb[2].mxu0 %v19913_v42 }
 0x51b   : > { %16414 = vmatpush1.msra.mxu0 %v16334_v27  ;;  %16477 = vmatprep.mubr.f32.mxu0 %v18296_v0 }
 0x51c   : > { %16487 = vmatprep.subr.mxu0 %v16249_v2 }
 0x522   : > { %16480 = vmatmul.mubr.f32.vlgmr.msra.gmra.mrb[2].mxu0 %v19925_v7  ;;  %v17167_v7 = vpop.permute.xlu0 %17166 }
 0x523   : > { %16489 = vmatpush1.msra.mxu0 %v16251_v57  ;;  %16552 = vmatprep.mubr.f32.mxu0 %v18296_v0 }
 0x524   : > { %16565 = vmatprep.subr.mxu0 %v16329_v60 }
 0x52a   : > { %16556 = vmatmul.mubr.f32.vlgmr.msra.gmra.mrb[2].mxu0 %v19939_v5  ;;  %v17171_v5 = vadd.f32 %v17167_v7, %v17162_v3 }
 0x52b   : > { %16569 = vmatpush1.msra.mxu0 %v16335_v19  ;;  %16632 = vmatprep.mubr.f32.mxu0 %v18296_v0 }
 0x52c   : > { %16641 = vmatprep.subr.mxu0 %v16249_v2 }
 0x532   : > { %16634 = vmatmul.mubr.f32.vlgmr.msra.gmra.mrb[2].mxu0 %v19913_v42 }
 0x533   : > { %16643 = vmatpush1.msra.mxu0 %v16251_v57  ;;  %16706 = vmatprep.mubr.f32.mxu0 %v18296_v0  ;;  %v17173_v0 = vld [vmem:[%s18359_s26 + $0x8] sm:$0xf]  ;;  %s251_s26 = scalar_lea.vmem %s20168_s6, %s18261_s23 }
 0x53a   : > { %16708 = vmatmul.mubr.f32.vlgmr.msra.gmra.mrb[2].mxu0 %v19913_v42 }
 0x60d   : > { %v16709_v22 = vpop.f32.mrb[2].mxu0 }
 0x60e   : > { %v17169_v9 = vadd.f32 %v17167_v7, %v16709_v22  ;;  %v16711_v51 = vpop.f32.mrb[3].mxu0 }
 0x60f   : > { %v17170_v33 = vadd.f32 %v17167_v7, %v16711_v51 }
 0x611   : > { %v17177_v59 = vcombine.low %v17169_v9, %v17170_v33 }
 0x613   : > { %17178 = vrot.lane.b32.xlu1 %v17177_v59, %s18307_s20 }
 0x617   : > { %17180 = vrot.lane.b32.xlu1 %v17171_v5, %s18307_s20 }
 0x685   : > { %v17179_v30 = vpop.permute.xlu1 %17178 }
 0x686   : > { %v17182_v45 = vrot.slane %v17179_v30, 4 }
 0x688   : > { %v17184_v12 = vsel %vm17183_vm15, %v17182_v45, %v17179_v30 }
 0x689   : > { %v17188_v44 = vadd.f32 %v17184_v12, %v17172_v32  ;;  %v17181_v42 = vpop.permute.xlu1 %17180 }
 0x68a   : > { %v17185_v20 = vsel %vm17183_vm15, %v17182_v45, %v17181_v42 }
 0x68b   : > { %v17189_v62 = vadd.f32 %v17185_v20, %v17173_v0  ;;  %vm17190_vm0 = vcmp.gt.f32.partialorder %v17188_v44, 0.0  ;;  %v17192_v18 = vmul.f32 0.2, %v17188_v44 }
 0x68d   : > { %v17194_v55 = vsel %vm17190_vm0, %v17188_v44, %v17192_v18  ;;  %vm17191_vm1 = vcmp.gt.f32.partialorder %v17189_v62, 0.0  ;;  %v17193_v61 = vmul.f32 0.2, %v17189_v62 }
 0x68e   : > { %17198 = vrot.lane.b32.xlu0 %v17194_v55, %s18305_s10 }
 0x68f   : > { %v17195_v35 = vsel %vm17191_vm1, %v17189_v62, %v17193_v61 }
 0x690   : > { %17200 = vrot.lane.b32.xlu1 %v17195_v35, %s18305_s10 }
 0x700   : > { %v17199_v58 = vpop.permute.xlu0 %17198 }
 0x701   : > { %v17202_v15 = vrot.slane %v17199_v58, 4 }
 0x702   : > { %v17201_v36 = vpop.permute.xlu1 %17200 }
 0x703   : > { %v17203_v52 = vrot.slane %v17201_v36, 4  ;;  %17210 = vst.msk [vmem:[%s251_s26 + $0x8] sm:$0xf] %vm17209_vm2, %v17201_v36 }
 0x705   : > { %v17204_v16 = vsel %vm273_vm3, %v17202_v15, %v17203_v52 }
 0x706   : > { %v17205_v37 = vsel %vm7769_vm10, %v17199_v58, %v17204_v16 }
 0x707   : > { %17208 = vst [vmem:[%s251_s26] sm:$0xff] %v17205_v37 }
 0x708 PF: > { %s16_s21 = sadd.s32 1, %s18294_s21  }
 0x709   : > { %p13_p4 = scmp.ge.s32.totalorder %s16_s21, 4  }
 0x70b   :  { %15 = sbr.rel (!%p13_p4) target bundleno = 1 (0x1), region = 90 }

</bundles_post_ra>
